<compile_context>
chip_gen: v5e
topology: v5e:2x2
jax: 0.10.0
libtpu: 0.0.40
codegen_flags: <defaults>
</compile_context>

<pallas_src>
import functools

import numpy as np
import jax
import jax.numpy as jnp
from jax.experimental import pallas as pl
from jax.experimental.pallas import tpu as pltpu


def _round_up(x, m):
    return ((x + m - 1) // m) * m


_VMEM_LIMIT = 32 * 1024 * 1024     # scoped-VMEM cap: safe on v5e/v6e and v7x (64 MiB phys)
_VMEM_BUDGET = 20 * 1024 * 1024    # soft per-step budget used when picking tile rows


# ---------------------------------------------------------------------------
# Weight-resident matmul kernels (whole K, whole N per grid step)
# ---------------------------------------------------------------------------
def _mm_kernel(x_ref, w_ref, o_ref):
    o_ref[...] = jnp.dot(x_ref[...], w_ref[...],
                         preferred_element_type=jnp.float32).astype(o_ref.dtype)


def _mm_bnrelu_kernel(x_ref, s_ref, b_ref, w_ref, o_ref):
    # Fused BatchNorm(scale/shift) + ReLU prologue (f32 math), then MXU matmul.
    x = x_ref[...].astype(jnp.float32)
    x = jnp.maximum(x * s_ref[...] + b_ref[...], 0.0)
    o_ref[...] = jnp.dot(x.astype(jnp.bfloat16), w_ref[...],
                         preferred_element_type=jnp.float32).astype(o_ref.dtype)


def _pick_tm(M, K, N, tm_max=512, budget=_VMEM_BUDGET):
    """Largest row-tile whose working set (double-buffered x/out + resident
    weight + f32 prologue headroom) fits the soft VMEM budget (v7x headroom)."""
    tm = min(tm_max, _round_up(M, 8))
    fixed = 2 * K * N * 2 + 4 * K * 4                 # weight (2 bufs, bf16) + scale/shift

    def usage(t):
        return fixed + 2 * t * K * 2 + 2 * t * N * 2 + t * max(K, N) * 4

    while tm > 8 and usage(tm) > budget:
        tm = max(8, ((tm // 2) // 8) * 8)
    return tm


def pallas_matmul_wres(x, w, scale=None, shift=None, out_dtype=jnp.bfloat16):
    """(M, K) @ (K, N) -> (M, N).

    The full (K, N) weight is VMEM-resident (constant block index across the
    1-D M grid, so it is DMA'd once).  If scale/shift are given, the kernel
    applies x = relu(x*scale + shift) per column before the dot (fused BN+ReLU
    prologue).  bf16 MXU inputs, f32 accumulation, `out_dtype` output.
    """
    M, K = x.shape
    K2, N = w.shape
    assert K == K2, (x.shape, w.shape)
    x = x.astype(jnp.bfloat16)
    w = w.astype(jnp.bfloat16)

    tm = _pick_tm(M, K, N)
    Mp = _round_up(M, tm)
    if Mp != M:
        x = jnp.pad(x, ((0, Mp - M), (0, 0)))

    if scale is not None:
        s = scale.reshape(1, K).astype(jnp.float32)
        b = shift.reshape(1, K).astype(jnp.float32)
        kernel = _mm_bnrelu_kernel
        in_specs = [pl.BlockSpec((tm, K), lambda i: (i, 0)),
                    pl.BlockSpec((1, K), lambda i: (0, 0)),
                    pl.BlockSpec((1, K), lambda i: (0, 0)),
                    pl.BlockSpec((K, N), lambda i: (0, 0))]
        operands = (x, s, b, w)
    else:
        kernel = _mm_kernel
        in_specs = [pl.BlockSpec((tm, K), lambda i: (i, 0)),
                    pl.BlockSpec((K, N), lambda i: (0, 0))]
        operands = (x, w)

    out = pl.pallas_call(
        kernel,
        out_shape=jax.ShapeDtypeStruct((Mp, N), out_dtype),
        grid=(Mp // tm,),
        in_specs=in_specs,
        out_specs=pl.BlockSpec((tm, N), lambda i: (i, 0)),
        compiler_params=pltpu.CompilerParams(
            dimension_semantics=("parallel",),
            vmem_limit_bytes=_VMEM_LIMIT),
    )(*operands)
    return out[:M] if Mp != M else out


# ---------------------------------------------------------------------------
# BatchNorm statistics (training-mode batch stats) -> per-channel scale/shift
# ---------------------------------------------------------------------------
def _bn_stats_kernel(x_ref, sum_ref, sq_ref):
    x = x_ref[...].astype(jnp.float32)                        # (tm, Cp)
    sum_ref[...] = jnp.sum(x, axis=0, keepdims=True)[None]    # (1, 1, Cp)
    sq_ref[...] = jnp.sum(x * x, axis=0, keepdims=True)[None]


def bn_scale_shift(x2d, gamma_p, beta_p, eps=1e-5):
    """Per-channel BN scale/shift from an (M, Cp) pre-BN activation slab.

    The stats pass writes per-tile partial sums on a "parallel" grid (both v7x
    TensorCores usable); the tiny (ntiles, 1, Cp) reduction + rsqrt is XLA.
    Statistics are global over the true M rows, so tiling does not change BN
    semantics.
    """
    M, Cp = x2d.shape
    tm = min(512, _round_up(M, 8))
    Mp = _round_up(M, tm)
    x = x2d
    if Mp != M:
        x = jnp.pad(x, ((0, Mp - M), (0, 0)))   # zero rows: no effect on sums
    ntiles = Mp // tm

    sums, sqs = pl.pallas_call(
        _bn_stats_kernel,
        out_shape=(jax.ShapeDtypeStruct((ntiles, 1, Cp), jnp.float32),
                   jax.ShapeDtypeStruct((ntiles, 1, Cp), jnp.float32)),
        grid=(ntiles,),
        in_specs=[pl.BlockSpec((tm, Cp), lambda i: (i, 0))],
        out_specs=(pl.BlockSpec((1, 1, Cp), lambda i: (i, 0, 0)),
                   pl.BlockSpec((1, 1, Cp), lambda i: (i, 0, 0))),
        compiler_params=pltpu.CompilerParams(
            dimension_semantics=("parallel",)),
    )(x)

    s = jnp.sum(sums, axis=(0, 1))
    ss = jnp.sum(sqs, axis=(0, 1))
    mean = s / M
    var = jnp.maximum(ss / M - mean * mean, 0.0)
    scale = gamma_p * jax.lax.rsqrt(var + eps)
    shift = beta_p - mean * scale
    return scale.reshape(1, Cp), shift.reshape(1, Cp)


# ---------------------------------------------------------------------------
# Tanh (lane-dense, tiled elementwise)
# ---------------------------------------------------------------------------
def _tanh_kernel(x_ref, o_ref):
    o_ref[...] = jnp.tanh(x_ref[...].astype(jnp.float32))


def pallas_tanh(x):
    shape = x.shape
    flat = x.reshape(-1)
    n = flat.shape[0]
    cols = 512
    rows = _round_up(-(-n // cols), 8)
    tr = min(rows, 256)
    rows_p = _round_up(rows, tr)
    total = rows_p * cols
    if total != n:
        flat = jnp.pad(flat, (0, total - n))
    x2 = flat.reshape(rows_p, cols)

    out = pl.pallas_call(
        _tanh_kernel,
        out_shape=jax.ShapeDtypeStruct((rows_p, cols), jnp.float32),
        grid=(rows_p // tr,),
        in_specs=[pl.BlockSpec((tr, cols), lambda i: (i, 0))],
        out_specs=pl.BlockSpec((tr, cols), lambda i: (i, 0)),
        compiler_params=pltpu.CompilerParams(
            dimension_semantics=("parallel",)),
    )(x2)
    return out.reshape(-1)[:n].reshape(shape)


# ---------------------------------------------------------------------------
# Stride-2 overlap-add ("col2im") for the 4x4 deconv kernel
# ---------------------------------------------------------------------------
def _col2im_s2(y, out_dtype=jnp.bfloat16):
    """y: (B, H, W, 4, 4, Cout) per-tap matmul results -> (B, 2H, 2W, Cout).

    Taps are grouped by (ky%2, kx%2) parity: 4 f32 adds per parity plus one
    stack/reshape interleave (no strided HBM scatter-adds).
    # TODO(synk): pure data-movement XLA glue; folding it (plus the BN sum/sumsq
    # accumulation and, for the last layer, tanh) into the matmul output
    # epilogue is future work.
    """
    B, H, W, _, _, C = y.shape
    y = y.astype(jnp.float32)
    parity = [[None, None], [None, None]]
    for ry in (0, 1):
        for rx in (0, 1):
            acc = None
            for dy in (0, 1):
                for dx in (0, 1):
                    tap = y[:, :, :, 2 * dy + ry, 2 * dx + rx, :]
                    tap = jnp.pad(tap, ((0, 0), (dy, 1 - dy), (dx, 1 - dx), (0, 0)))
                    acc = tap if acc is None else acc + tap
            parity[ry][rx] = acc                                # (B, H+1, W+1, C)
    rows = [jnp.stack([parity[ry][0], parity[ry][1]], axis=3)   # [b,q,p,rx,c]
            for ry in (0, 1)]
    full = jnp.stack(rows, axis=2)                              # [b,q,ry,p,rx,c]
    full = full.reshape(B, 2 * (H + 1), 2 * (W + 1), C)
    return full[:, 1:1 + 2 * H, 1:1 + 2 * W, :].astype(out_dtype)


# ---------------------------------------------------------------------------
# Parameters (deterministic synthetic init) + one-time packing
# ---------------------------------------------------------------------------
def init_generator_params(key, image_size=64, z_dim=100, conv_dim=64, channels=1):
    repeat_num = int(np.log2(image_size)) - 3
    mult = 2 ** repeat_num
    c1 = conv_dim * mult
    chans = [c1, c1 // 2, c1 // 4, c1 // 8]
    keys = jax.random.split(key, 5)
    params = {
        # ConvTranspose2d weight layout: (Cin, Cout, kH, kW)
        "w1": 0.05 * jax.random.normal(keys[0], (z_dim,    chans[0], 4, 4), jnp.float32),
        "w2": 0.05 * jax.random.normal(keys[1], (chans[0], chans[1], 4, 4), jnp.float32),
        "w3": 0.05 * jax.random.normal(keys[2], (chans[1], chans[2], 4, 4), jnp.float32),
        "w4": 0.05 * jax.random.normal(keys[3], (chans[2], chans[3], 4, 4), jnp.float32),
        "w5": 0.05 * jax.random.normal(keys[4], (chans[3], channels, 4, 4), jnp.float32),
    }
    # BatchNorm2d default init: gamma=1, beta=0
    for i, c in enumerate(chans, start=1):
        params[f"g{i}"] = jnp.ones((c,), jnp.float32)
        params[f"b{i}"] = jnp.zeros((c,), jnp.float32)
    return params


def prepare_params(params):
    """One-time weight packing (hoisted out of the forward pass).

    (Cin, Cout, 4, 4) -> (Kp, 16*Cout) bf16 with Cout the minor (lane) axis and
    the K rows zero-padded to the 128-aligned channel layout the activations are
    carried in.  The last layer keeps N = 16*channels (no lane padding), so its
    HBM writeback is not inflated 8x.  Gamma/beta are zero-padded to Cp.
    """
    z_dim = params["w1"].shape[0]
    chans = [params[f"w{i}"].shape[1] for i in (1, 2, 3, 4)]
    channels = params["w5"].shape[1]
    z_kp = _round_up(z_dim, 128)
    cps = [_round_up(c, 128) for c in chans]

    def pack_w(w, kp):
        cin, cout = w.shape[0], w.shape[1]
        wm = jnp.transpose(w, (0, 2, 3, 1)).reshape(cin, 16 * cout)
        if kp != cin:
            wm = jnp.pad(wm, ((0, kp - cin), (0, 0)))
        return wm.astype(jnp.bfloat16)

    packed = {
        "z_dim": z_dim, "z_kp": z_kp, "chans": chans, "cps": cps,
        "channels": channels,
        "w1": pack_w(params["w1"], z_kp),
        "w2": pack_w(params["w2"], cps[0]),
        "w3": pack_w(params["w3"], cps[1]),
        "w4": pack_w(params["w4"], cps[2]),
        "w5": pack_w(params["w5"], cps[3]),
    }
    for i in range(1, 5):
        c, cp = chans[i - 1], cps[i - 1]
        packed[f"g{i}"] = jnp.pad(params[f"g{i}"].astype(jnp.float32), (0, cp - c))
        packed[f"b{i}"] = jnp.pad(params[f"b{i}"].astype(jnp.float32), (0, cp - c))
    return packed


# ---------------------------------------------------------------------------
# Forward pass (matches Generator.forward; BatchNorm in training mode)
# ---------------------------------------------------------------------------
def generator_forward(packed, z):
    B = z.shape[0]
    chans, cps, channels = packed["chans"], packed["cps"], packed["channels"]

    # z.view(B, -1, 1, 1); pad the latent once to a lane-aligned K.
    z2d = z.reshape(B, -1).astype(jnp.bfloat16)
    if z2d.shape[1] != packed["z_kp"]:
        z2d = jnp.pad(z2d, ((0, 0), (0, packed["z_kp"] - z2d.shape[1])))

    # l1: ConvTranspose2d(z_dim, C1, 4, 1, 0) on a 1x1 input == one matmul,
    # emitted directly in NHWC (B, 4, 4, C1).
    x = pallas_matmul_wres(z2d, packed["w1"]).reshape(B, 4, 4, chans[0])
    H = W = 4

    # l2..l5: BatchNorm(prev)+ReLU fused into the deconv matmul prologue.
    for i, wname in enumerate(("w2", "w3", "w4", "w5"), start=1):
        cp = cps[i - 1]
        if x.shape[-1] != cp:               # carry a 128-padded channel layout
            x = jnp.pad(x, ((0, 0), (0, 0), (0, 0), (0, cp - x.shape[-1])))
        x2d = x.reshape(B * H * W, cp)
        scale, shift = bn_scale_shift(x2d, packed[f"g{i}"], packed[f"b{i}"])
        cout = chans[i] if i < 4 else channels
        last = (i == 4)
        y = pallas_matmul_wres(x2d, packed[wname], scale, shift)  # (BHW, 16*cout)
        y = y.reshape(B, H, W, 4, 4, cout)
        x = _col2im_s2(y, out_dtype=jnp.float32 if last else jnp.bfloat16)
        H, W = 2 * H, 2 * W

    out = pallas_tanh(x)                                          # (B, 64, 64, channels) f32
    return jnp.transpose(out, (0, 3, 1, 2))                       # NCHW


# ---------------------------------------------------------------------------
if __name__ == "__main__":
    key = jax.random.PRNGKey(0)
    kp, kz = jax.random.split(key)

    # small synthetic config (forward always produces 64x64: 1->4->8->16->32->64)
    image_size, z_dim, conv_dim, channels = 64, 16, 8, 1
    batch = 2

    params = init_generator_params(kp, image_size=image_size, z_dim=z_dim,
                                   conv_dim=conv_dim, channels=channels)
    packed = prepare_params(params)
    z = jax.random.normal(kz, (batch, z_dim), jnp.float32)

    fwd = jax.jit(functools.partial(generator_forward, packed))
    out = jax.block_until_ready(fwd(z))

    assert out.shape == (batch, channels, 64, 64), out.shape
    assert out.dtype == jnp.float32
    assert bool(jnp.all(jnp.isfinite(out)))
    assert bool(jnp.all(jnp.abs(out) <= 1.0 + 1e-6))              # tanh range
    print("KERNEL_OK")
</pallas_src>

<mosaic_0001>
module attributes {stable_mosaic.version = 11 : i64} {
  func.func @_mm_kernel(%arg0: i32, %arg1: memref<8x128xbf16, #tpu.memory_space<vmem>>, %arg2: memref<128x1024xbf16, #tpu.memory_space<vmem>>, %arg3: memref<8x1024xbf16, #tpu.memory_space<vmem>>) attributes {dimension_semantics = [#tpu.dimension_semantics<parallel>], iteration_bounds = array<i64: 1>, scalar_prefetch = 0 : i64, scratch_operands = 0 : i64, tpu.core_type = #tpu.core_type<tc>, window_params = [{transform_indices = @transform_0, window_bounds = array<i64: 8, 128>}, {pipeline_mode = #tpu.pipeline_mode<synchronous>, transform_indices = @transform_1, window_bounds = array<i64: 128, 1024>}, {transform_indices = @transform_2, window_bounds = array<i64: 8, 1024>}]} {
    %c0 = arith.constant 0 : index
    %c0_0 = arith.constant 0 : index
    %0 = vector.load %arg1[%c0, %c0_0] : memref<8x128xbf16, #tpu.memory_space<vmem>>, vector<8x128xbf16>
    %c0_1 = arith.constant 0 : index
    %c0_2 = arith.constant 0 : index
    %1 = vector.load %arg2[%c0_1, %c0_2] : memref<128x1024xbf16, #tpu.memory_space<vmem>>, vector<128x1024xbf16>
    %cst = arith.constant dense<0.000000e+00> : vector<8x1024xf32>
    %2 = tpu.matmul %0, %1, %cst {dimension_numbers = #tpu.dot_dimension_numbers<[1], [0], [0], [1], [0, 0, 1, 1], [], []>} : vector<8x128xbf16>, vector<128x1024xbf16>, vector<8x1024xf32> -> vector<8x1024xf32>
    %3 = arith.truncf %2 : vector<8x1024xf32> to vector<8x1024xbf16>
    %c0_3 = arith.constant 0 : index
    %c0_4 = arith.constant 0 : index
    %4 = vector.load %arg3[%c0_3, %c0_4] : memref<8x1024xbf16, #tpu.memory_space<vmem>>, vector<8x1024xbf16>
    tpu.vector_store %arg3[%c0_3, %c0_4], %3 {strides = array<i32>} : memref<8x1024xbf16, #tpu.memory_space<vmem>>, vector<8x1024xbf16>,
    return
  }
  func.func @transform_0(%arg0: i32) -> (i32, i32) {
    %c0_i32 = arith.constant 0 : i32
    %c0_i32_0 = arith.constant 0 : i32
    return %arg0, %c0_i32 : i32, i32
  }
  func.func @transform_1(%arg0: i32) -> (i32, i32) {
    %c0_i32 = arith.constant 0 : i32
    %c0_i32_0 = arith.constant 0 : i32
    %c0_i32_1 = arith.constant 0 : i32
    return %c0_i32, %c0_i32_0 : i32, i32
  }
  func.func @transform_2(%arg0: i32) -> (i32, i32) {
    %c0_i32 = arith.constant 0 : i32
    %c0_i32_0 = arith.constant 0 : i32
    return %arg0, %c0_i32 : i32, i32
  }
}

module attributes {stable_mosaic.version = 11 : i64} {
  func.func @_bn_stats_kernel(%arg0: i32, %arg1: memref<32x128xbf16, #tpu.memory_space<vmem>>, %arg2: memref<1x1x128xf32, #tpu.memory_space<vmem>>, %arg3: memref<1x1x128xf32, #tpu.memory_space<vmem>>) attributes {dimension_semantics = [#tpu.dimension_semantics<parallel>], iteration_bounds = array<i64: 1>, scalar_prefetch = 0 : i64, scratch_operands = 0 : i64, tpu.core_type = #tpu.core_type<tc>, window_params = [{transform_indices = @transform_0, window_bounds = array<i64: 32, 128>}, {transform_indices = @transform_1, window_bounds = array<i64: 1, 1, 128>}, {transform_indices = @transform_2, window_bounds = array<i64: 1, 1, 128>}]} {
    %c0 = arith.constant 0 : index
    %c0_0 = arith.constant 0 : index
    %0 = vector.load %arg1[%c0, %c0_0] : memref<32x128xbf16, #tpu.memory_space<vmem>>, vector<32x128xbf16>
    %1 = arith.extf %0 : vector<32x128xbf16> to vector<32x128xf32>
    %cst = arith.constant dense<0.000000e+00> : vector<128xf32>
    %2 = vector.multi_reduction <add>, %1, %cst [0] : vector<32x128xf32> to vector<128xf32>
    %3 = vector.shape_cast %2 : vector<128xf32> to vector<1x128xf32>
    %4 = vector.shape_cast %3 : vector<1x128xf32> to vector<1x1x128xf32>
    %c0_1 = arith.constant 0 : index
    %c0_2 = arith.constant 0 : index
    %c0_3 = arith.constant 0 : index
    %5 = vector.load %arg2[%c0_1, %c0_2, %c0_3] : memref<1x1x128xf32, #tpu.memory_space<vmem>>, vector<1x1x128xf32>
    tpu.vector_store %arg2[%c0_1, %c0_2, %c0_3], %4 {strides = array<i32>} : memref<1x1x128xf32, #tpu.memory_space<vmem>>, vector<1x1x128xf32>,
    %6 = arith.mulf %1, %1 : vector<32x128xf32>
    %cst_4 = arith.constant dense<0.000000e+00> : vector<128xf32>
    %7 = vector.multi_reduction <add>, %6, %cst_4 [0] : vector<32x128xf32> to vector<128xf32>
    %8 = vector.shape_cast %7 : vector<128xf32> to vector<1x128xf32>
    %9 = vector.shape_cast %8 : vector<1x128xf32> to vector<1x1x128xf32>
    %c0_5 = arith.constant 0 : index
    %c0_6 = arith.constant 0 : index
    %c0_7 = arith.constant 0 : index
    %10 = vector.load %arg3[%c0_5, %c0_6, %c0_7] : memref<1x1x128xf32, #tpu.memory_space<vmem>>, vector<1x1x128xf32>
    tpu.vector_store %arg3[%c0_5, %c0_6, %c0_7], %9 {strides = array<i32>} : memref<1x1x128xf32, #tpu.memory_space<vmem>>, vector<1x1x128xf32>,
    return
  }
  func.func @transform_0(%arg0: i32) -> (i32, i32) {
    %c0_i32 = arith.constant 0 : i32
    %c0_i32_0 = arith.constant 0 : i32
    return %arg0, %c0_i32 : i32, i32
  }
  func.func @transform_1(%arg0: i32) -> (i32, i32, i32) {
    %c0_i32 = arith.constant 0 : i32
    %c0_i32_0 = arith.constant 0 : i32
    %c0_i32_1 = arith.constant 0 : i32
    return %arg0, %c0_i32, %c0_i32_0 : i32, i32, i32
  }
  func.func @transform_2(%arg0: i32) -> (i32, i32, i32) {
    %c0_i32 = arith.constant 0 : i32
    %c0_i32_0 = arith.constant 0 : i32
    %c0_i32_1 = arith.constant 0 : i32
    return %arg0, %c0_i32, %c0_i32_0 : i32, i32, i32
  }
}

module attributes {stable_mosaic.version = 11 : i64} {
  func.func @_mm_bnrelu_kernel(%arg0: i32, %arg1: memref<32x128xbf16, #tpu.memory_space<vmem>>, %arg2: memref<1x128xf32, #tpu.memory_space<vmem>>, %arg3: memref<1x128xf32, #tpu.memory_space<vmem>>, %arg4: memref<128x512xbf16, #tpu.memory_space<vmem>>, %arg5: memref<32x512xbf16, #tpu.memory_space<vmem>>) attributes {dimension_semantics = [#tpu.dimension_semantics<parallel>], iteration_bounds = array<i64: 1>, scalar_prefetch = 0 : i64, scratch_operands = 0 : i64, tpu.core_type = #tpu.core_type<tc>, window_params = [{transform_indices = @transform_0, window_bounds = array<i64: 32, 128>}, {pipeline_mode = #tpu.pipeline_mode<synchronous>, transform_indices = @transform_1, window_bounds = array<i64: 1, 128>}, {pipeline_mode = #tpu.pipeline_mode<synchronous>, transform_indices = @transform_2, window_bounds = array<i64: 1, 128>}, {pipeline_mode = #tpu.pipeline_mode<synchronous>, transform_indices = @transform_3, window_bounds = array<i64: 128, 512>}, {transform_indices = @transform_4, window_bounds = array<i64: 32, 512>}]} {
    %c0 = arith.constant 0 : index
    %c0_0 = arith.constant 0 : index
    %0 = vector.load %arg1[%c0, %c0_0] : memref<32x128xbf16, #tpu.memory_space<vmem>>, vector<32x128xbf16>
    %1 = arith.extf %0 : vector<32x128xbf16> to vector<32x128xf32>
    %c0_1 = arith.constant 0 : index
    %c0_2 = arith.constant 0 : index
    %2 = vector.load %arg2[%c0_1, %c0_2] : memref<1x128xf32, #tpu.memory_space<vmem>>, vector<1x128xf32>
    %3 = vector.broadcast %2 : vector<1x128xf32> to vector<32x128xf32>
    %4 = arith.mulf %1, %3 : vector<32x128xf32>
    %c0_3 = arith.constant 0 : index
    %c0_4 = arith.constant 0 : index
    %5 = vector.load %arg3[%c0_3, %c0_4] : memref<1x128xf32, #tpu.memory_space<vmem>>, vector<1x128xf32>
    %6 = vector.broadcast %5 : vector<1x128xf32> to vector<32x128xf32>
    %7 = arith.addf %4, %6 : vector<32x128xf32>
    %cst = arith.constant 0.000000e+00 : f32
    %8 = vector.broadcast %cst : f32 to vector<32x128xf32>
    %9 = arith.maximumf %7, %8 : vector<32x128xf32>
    %10 = arith.truncf %9 : vector<32x128xf32> to vector<32x128xbf16>
    %c0_5 = arith.constant 0 : index
    %c0_6 = arith.constant 0 : index
    %11 = vector.load %arg4[%c0_5, %c0_6] : memref<128x512xbf16, #tpu.memory_space<vmem>>, vector<128x512xbf16>
    %cst_7 = arith.constant dense<0.000000e+00> : vector<32x512xf32>
    %12 = tpu.matmul %10, %11, %cst_7 {dimension_numbers = #tpu.dot_dimension_numbers<[1], [0], [0], [1], [0, 0, 1, 1], [], []>} : vector<32x128xbf16>, vector<128x512xbf16>, vector<32x512xf32> -> vector<32x512xf32>
    %13 = arith.truncf %12 : vector<32x512xf32> to vector<32x512xbf16>
    %c0_8 = arith.constant 0 : index
    %c0_9 = arith.constant 0 : index
    %14 = vector.load %arg5[%c0_8, %c0_9] : memref<32x512xbf16, #tpu.memory_space<vmem>>, vector<32x512xbf16>
    tpu.vector_store %arg5[%c0_8, %c0_9], %13 {strides = array<i32>} : memref<32x512xbf16, #tpu.memory_space<vmem>>, vector<32x512xbf16>,
    return
  }
  func.func @transform_0(%arg0: i32) -> (i32, i32) {
    %c0_i32 = arith.constant 0 : i32
    %c0_i32_0 = arith.constant 0 : i32
    return %arg0, %c0_i32 : i32, i32
  }
  func.func @transform_1(%arg0: i32) -> (i32, i32) {
    %c0_i32 = arith.constant 0 : i32
    %c0_i32_0 = arith.constant 0 : i32
    %c0_i32_1 = arith.constant 0 : i32
    return %c0_i32, %c0_i32_0 : i32, i32
  }
  func.func @transform_2(%arg0: i32) -> (i32, i32) {
    %c0_i32 = arith.constant 0 : i32
    %c0_i32_0 = arith.constant 0 : i32
    %c0_i32_1 = arith.constant 0 : i32
    return %c0_i32, %c0_i32_0 : i32, i32
  }
  func.func @transform_3(%arg0: i32) -> (i32, i32) {
    %c0_i32 = arith.constant 0 : i32
    %c0_i32_0 = arith.constant 0 : i32
    %c0_i32_1 = arith.constant 0 : i32
    return %c0_i32, %c0_i32_0 : i32, i32
  }
  func.func @transform_4(%arg0: i32) -> (i32, i32) {
    %c0_i32 = arith.constant 0 : i32
    %c0_i32_0 = arith.constant 0 : i32
    return %arg0, %c0_i32 : i32, i32
  }
}

module attributes {stable_mosaic.version = 11 : i64} {
  func.func @_bn_stats_kernel(%arg0: i32, %arg1: memref<128x128xbf16, #tpu.memory_space<vmem>>, %arg2: memref<1x1x128xf32, #tpu.memory_space<vmem>>, %arg3: memref<1x1x128xf32, #tpu.memory_space<vmem>>) attributes {dimension_semantics = [#tpu.dimension_semantics<parallel>], iteration_bounds = array<i64: 1>, scalar_prefetch = 0 : i64, scratch_operands = 0 : i64, tpu.core_type = #tpu.core_type<tc>, window_params = [{transform_indices = @transform_0, window_bounds = array<i64: 128, 128>}, {transform_indices = @transform_1, window_bounds = array<i64: 1, 1, 128>}, {transform_indices = @transform_2, window_bounds = array<i64: 1, 1, 128>}]} {
    %c0 = arith.constant 0 : index
    %c0_0 = arith.constant 0 : index
    %0 = vector.load %arg1[%c0, %c0_0] : memref<128x128xbf16, #tpu.memory_space<vmem>>, vector<128x128xbf16>
    %1 = arith.extf %0 : vector<128x128xbf16> to vector<128x128xf32>
    %cst = arith.constant dense<0.000000e+00> : vector<128xf32>
    %2 = vector.multi_reduction <add>, %1, %cst [0] : vector<128x128xf32> to vector<128xf32>
    %3 = vector.shape_cast %2 : vector<128xf32> to vector<1x128xf32>
    %4 = vector.shape_cast %3 : vector<1x128xf32> to vector<1x1x128xf32>
    %c0_1 = arith.constant 0 : index
    %c0_2 = arith.constant 0 : index
    %c0_3 = arith.constant 0 : index
    %5 = vector.load %arg2[%c0_1, %c0_2, %c0_3] : memref<1x1x128xf32, #tpu.memory_space<vmem>>, vector<1x1x128xf32>
    tpu.vector_store %arg2[%c0_1, %c0_2, %c0_3], %4 {strides = array<i32>} : memref<1x1x128xf32, #tpu.memory_space<vmem>>, vector<1x1x128xf32>,
    %6 = arith.mulf %1, %1 : vector<128x128xf32>
    %cst_4 = arith.constant dense<0.000000e+00> : vector<128xf32>
    %7 = vector.multi_reduction <add>, %6, %cst_4 [0] : vector<128x128xf32> to vector<128xf32>
    %8 = vector.shape_cast %7 : vector<128xf32> to vector<1x128xf32>
    %9 = vector.shape_cast %8 : vector<1x128xf32> to vector<1x1x128xf32>
    %c0_5 = arith.constant 0 : index
    %c0_6 = arith.constant 0 : index
    %c0_7 = arith.constant 0 : index
    %10 = vector.load %arg3[%c0_5, %c0_6, %c0_7] : memref<1x1x128xf32, #tpu.memory_space<vmem>>, vector<1x1x128xf32>
    tpu.vector_store %arg3[%c0_5, %c0_6, %c0_7], %9 {strides = array<i32>} : memref<1x1x128xf32, #tpu.memory_space<vmem>>, vector<1x1x128xf32>,
    return
  }
  func.func @transform_0(%arg0: i32) -> (i32, i32) {
    %c0_i32 = arith.constant 0 : i32
    %c0_i32_0 = arith.constant 0 : i32
    return %arg0, %c0_i32 : i32, i32
  }
  func.func @transform_1(%arg0: i32) -> (i32, i32, i32) {
    %c0_i32 = arith.constant 0 : i32
    %c0_i32_0 = arith.constant 0 : i32
    %c0_i32_1 = arith.constant 0 : i32
    return %arg0, %c0_i32, %c0_i32_0 : i32, i32, i32
  }
  func.func @transform_2(%arg0: i32) -> (i32, i32, i32) {
    %c0_i32 = arith.constant 0 : i32
    %c0_i32_0 = arith.constant 0 : i32
    %c0_i32_1 = arith.constant 0 : i32
    return %arg0, %c0_i32, %c0_i32_0 : i32, i32, i32
  }
}

module attributes {stable_mosaic.version = 11 : i64} {
  func.func @_mm_bnrelu_kernel(%arg0: i32, %arg1: memref<128x128xbf16, #tpu.memory_space<vmem>>, %arg2: memref<1x128xf32, #tpu.memory_space<vmem>>, %arg3: memref<1x128xf32, #tpu.memory_space<vmem>>, %arg4: memref<128x256xbf16, #tpu.memory_space<vmem>>, %arg5: memref<128x256xbf16, #tpu.memory_space<vmem>>) attributes {dimension_semantics = [#tpu.dimension_semantics<parallel>], iteration_bounds = array<i64: 1>, scalar_prefetch = 0 : i64, scratch_operands = 0 : i64, tpu.core_type = #tpu.core_type<tc>, window_params = [{transform_indices = @transform_0, window_bounds = array<i64: 128, 128>}, {pipeline_mode = #tpu.pipeline_mode<synchronous>, transform_indices = @transform_1, window_bounds = array<i64: 1, 128>}, {pipeline_mode = #tpu.pipeline_mode<synchronous>, transform_indices = @transform_2, window_bounds = array<i64: 1, 128>}, {pipeline_mode = #tpu.pipeline_mode<synchronous>, transform_indices = @transform_3, window_bounds = array<i64: 128, 256>}, {transform_indices = @transform_4, window_bounds = array<i64: 128, 256>}]} {
    %c0 = arith.constant 0 : index
    %c0_0 = arith.constant 0 : index
    %0 = vector.load %arg1[%c0, %c0_0] : memref<128x128xbf16, #tpu.memory_space<vmem>>, vector<128x128xbf16>
    %1 = arith.extf %0 : vector<128x128xbf16> to vector<128x128xf32>
    %c0_1 = arith.constant 0 : index
    %c0_2 = arith.constant 0 : index
    %2 = vector.load %arg2[%c0_1, %c0_2] : memref<1x128xf32, #tpu.memory_space<vmem>>, vector<1x128xf32>
    %3 = vector.broadcast %2 : vector<1x128xf32> to vector<128x128xf32>
    %4 = arith.mulf %1, %3 : vector<128x128xf32>
    %c0_3 = arith.constant 0 : index
    %c0_4 = arith.constant 0 : index
    %5 = vector.load %arg3[%c0_3, %c0_4] : memref<1x128xf32, #tpu.memory_space<vmem>>, vector<1x128xf32>
    %6 = vector.broadcast %5 : vector<1x128xf32> to vector<128x128xf32>
    %7 = arith.addf %4, %6 : vector<128x128xf32>
    %cst = arith.constant 0.000000e+00 : f32
    %8 = vector.broadcast %cst : f32 to vector<128x128xf32>
    %9 = arith.maximumf %7, %8 : vector<128x128xf32>
    %10 = arith.truncf %9 : vector<128x128xf32> to vector<128x128xbf16>
    %c0_5 = arith.constant 0 : index
    %c0_6 = arith.constant 0 : index
    %11 = vector.load %arg4[%c0_5, %c0_6] : memref<128x256xbf16, #tpu.memory_space<vmem>>, vector<128x256xbf16>
    %cst_7 = arith.constant dense<0.000000e+00> : vector<128x256xf32>
    %12 = tpu.matmul %10, %11, %cst_7 {dimension_numbers = #tpu.dot_dimension_numbers<[1], [0], [0], [1], [0, 0, 1, 1], [], []>} : vector<128x128xbf16>, vector<128x256xbf16>, vector<128x256xf32> -> vector<128x256xf32>
    %13 = arith.truncf %12 : vector<128x256xf32> to vector<128x256xbf16>
    %c0_8 = arith.constant 0 : index
    %c0_9 = arith.constant 0 : index
    %14 = vector.load %arg5[%c0_8, %c0_9] : memref<128x256xbf16, #tpu.memory_space<vmem>>, vector<128x256xbf16>
    tpu.vector_store %arg5[%c0_8, %c0_9], %13 {strides = array<i32>} : memref<128x256xbf16, #tpu.memory_space<vmem>>, vector<128x256xbf16>,
    return
  }
  func.func @transform_0(%arg0: i32) -> (i32, i32) {
    %c0_i32 = arith.constant 0 : i32
    %c0_i32_0 = arith.constant 0 : i32
    return %arg0, %c0_i32 : i32, i32
  }
  func.func @transform_1(%arg0: i32) -> (i32, i32) {
    %c0_i32 = arith.constant 0 : i32
    %c0_i32_0 = arith.constant 0 : i32
    %c0_i32_1 = arith.constant 0 : i32
    return %c0_i32, %c0_i32_0 : i32, i32
  }
  func.func @transform_2(%arg0: i32) -> (i32, i32) {
    %c0_i32 = arith.constant 0 : i32
    %c0_i32_0 = arith.constant 0 : i32
    %c0_i32_1 = arith.constant 0 : i32
    return %c0_i32, %c0_i32_0 : i32, i32
  }
  func.func @transform_3(%arg0: i32) -> (i32, i32) {
    %c0_i32 = arith.constant 0 : i32
    %c0_i32_0 = arith.constant 0 : i32
    %c0_i32_1 = arith.constant 0 : i32
    return %c0_i32, %c0_i32_0 : i32, i32
  }
  func.func @transform_4(%arg0: i32) -> (i32, i32) {
    %c0_i32 = arith.constant 0 : i32
    %c0_i32_0 = arith.constant 0 : i32
    return %arg0, %c0_i32 : i32, i32
  }
}

module attributes {stable_mosaic.version = 11 : i64} {
  func.func @_mm_bnrelu_kernel(%arg0: i32, %arg1: memref<512x128xbf16, #tpu.memory_space<vmem>>, %arg2: memref<1x128xf32, #tpu.memory_space<vmem>>, %arg3: memref<1x128xf32, #tpu.memory_space<vmem>>, %arg4: memref<128x128xbf16, #tpu.memory_space<vmem>>, %arg5: memref<512x128xbf16, #tpu.memory_space<vmem>>) attributes {dimension_semantics = [#tpu.dimension_semantics<parallel>], iteration_bounds = array<i64: 1>, scalar_prefetch = 0 : i64, scratch_operands = 0 : i64, tpu.core_type = #tpu.core_type<tc>, window_params = [{transform_indices = @transform_0, window_bounds = array<i64: 512, 128>}, {pipeline_mode = #tpu.pipeline_mode<synchronous>, transform_indices = @transform_1, window_bounds = array<i64: 1, 128>}, {pipeline_mode = #tpu.pipeline_mode<synchronous>, transform_indices = @transform_2, window_bounds = array<i64: 1, 128>}, {pipeline_mode = #tpu.pipeline_mode<synchronous>, transform_indices = @transform_3, window_bounds = array<i64: 128, 128>}, {transform_indices = @transform_4, window_bounds = array<i64: 512, 128>}]} {
    %c0 = arith.constant 0 : index
    %c0_0 = arith.constant 0 : index
    %0 = vector.load %arg1[%c0, %c0_0] : memref<512x128xbf16, #tpu.memory_space<vmem>>, vector<512x128xbf16>
    %1 = arith.extf %0 : vector<512x128xbf16> to vector<512x128xf32>
    %c0_1 = arith.constant 0 : index
    %c0_2 = arith.constant 0 : index
    %2 = vector.load %arg2[%c0_1, %c0_2] : memref<1x128xf32, #tpu.memory_space<vmem>>, vector<1x128xf32>
    %3 = vector.broadcast %2 : vector<1x128xf32> to vector<512x128xf32>
    %4 = arith.mulf %1, %3 : vector<512x128xf32>
    %c0_3 = arith.constant 0 : index
    %c0_4 = arith.constant 0 : index
    %5 = vector.load %arg3[%c0_3, %c0_4] : memref<1x128xf32, #tpu.memory_space<vmem>>, vector<1x128xf32>
    %6 = vector.broadcast %5 : vector<1x128xf32> to vector<512x128xf32>
    %7 = arith.addf %4, %6 : vector<512x128xf32>
    %cst = arith.constant 0.000000e+00 : f32
    %8 = vector.broadcast %cst : f32 to vector<512x128xf32>
    %9 = arith.maximumf %7, %8 : vector<512x128xf32>
    %10 = arith.truncf %9 : vector<512x128xf32> to vector<512x128xbf16>
    %c0_5 = arith.constant 0 : index
    %c0_6 = arith.constant 0 : index
    %11 = vector.load %arg4[%c0_5, %c0_6] : memref<128x128xbf16, #tpu.memory_space<vmem>>, vector<128x128xbf16>
    %cst_7 = arith.constant dense<0.000000e+00> : vector<512x128xf32>
    %12 = tpu.matmul %10, %11, %cst_7 {dimension_numbers = #tpu.dot_dimension_numbers<[1], [0], [0], [1], [0, 0, 1, 1], [], []>} : vector<512x128xbf16>, vector<128x128xbf16>, vector<512x128xf32> -> vector<512x128xf32>
    %13 = arith.truncf %12 : vector<512x128xf32> to vector<512x128xbf16>
    %c0_8 = arith.constant 0 : index
    %c0_9 = arith.constant 0 : index
    %14 = vector.load %arg5[%c0_8, %c0_9] : memref<512x128xbf16, #tpu.memory_space<vmem>>, vector<512x128xbf16>
    tpu.vector_store %arg5[%c0_8, %c0_9], %13 {strides = array<i32>} : memref<512x128xbf16, #tpu.memory_space<vmem>>, vector<512x128xbf16>,
    return
  }
  func.func @transform_0(%arg0: i32) -> (i32, i32) {
    %c0_i32 = arith.constant 0 : i32
    %c0_i32_0 = arith.constant 0 : i32
    return %arg0, %c0_i32 : i32, i32
  }
  func.func @transform_1(%arg0: i32) -> (i32, i32) {
    %c0_i32 = arith.constant 0 : i32
    %c0_i32_0 = arith.constant 0 : i32
    %c0_i32_1 = arith.constant 0 : i32
    return %c0_i32, %c0_i32_0 : i32, i32
  }
  func.func @transform_2(%arg0: i32) -> (i32, i32) {
    %c0_i32 = arith.constant 0 : i32
    %c0_i32_0 = arith.constant 0 : i32
    %c0_i32_1 = arith.constant 0 : i32
    return %c0_i32, %c0_i32_0 : i32, i32
  }
  func.func @transform_3(%arg0: i32) -> (i32, i32) {
    %c0_i32 = arith.constant 0 : i32
    %c0_i32_0 = arith.constant 0 : i32
    %c0_i32_1 = arith.constant 0 : i32
    return %c0_i32, %c0_i32_0 : i32, i32
  }
  func.func @transform_4(%arg0: i32) -> (i32, i32) {
    %c0_i32 = arith.constant 0 : i32
    %c0_i32_0 = arith.constant 0 : i32
    return %arg0, %c0_i32 : i32, i32
  }
}

module attributes {stable_mosaic.version = 11 : i64} {
  func.func @_bn_stats_kernel(%arg0: i32, %arg1: memref<512x128xbf16, #tpu.memory_space<vmem>>, %arg2: memref<1x1x128xf32, #tpu.memory_space<vmem>>, %arg3: memref<1x1x128xf32, #tpu.memory_space<vmem>>) attributes {dimension_semantics = [#tpu.dimension_semantics<parallel>], iteration_bounds = array<i64: 1>, scalar_prefetch = 0 : i64, scratch_operands = 0 : i64, tpu.core_type = #tpu.core_type<tc>, window_params = [{transform_indices = @transform_0, window_bounds = array<i64: 512, 128>}, {transform_indices = @transform_1, window_bounds = array<i64: 1, 1, 128>}, {transform_indices = @transform_2, window_bounds = array<i64: 1, 1, 128>}]} {
    %c0 = arith.constant 0 : index
    %c0_0 = arith.constant 0 : index
    %0 = vector.load %arg1[%c0, %c0_0] : memref<512x128xbf16, #tpu.memory_space<vmem>>, vector<512x128xbf16>
    %1 = arith.extf %0 : vector<512x128xbf16> to vector<512x128xf32>
    %cst = arith.constant dense<0.000000e+00> : vector<128xf32>
    %2 = vector.multi_reduction <add>, %1, %cst [0] : vector<512x128xf32> to vector<128xf32>
    %3 = vector.shape_cast %2 : vector<128xf32> to vector<1x128xf32>
    %4 = vector.shape_cast %3 : vector<1x128xf32> to vector<1x1x128xf32>
    %c0_1 = arith.constant 0 : index
    %c0_2 = arith.constant 0 : index
    %c0_3 = arith.constant 0 : index
    %5 = vector.load %arg2[%c0_1, %c0_2, %c0_3] : memref<1x1x128xf32, #tpu.memory_space<vmem>>, vector<1x1x128xf32>
    tpu.vector_store %arg2[%c0_1, %c0_2, %c0_3], %4 {strides = array<i32>} : memref<1x1x128xf32, #tpu.memory_space<vmem>>, vector<1x1x128xf32>,
    %6 = arith.mulf %1, %1 : vector<512x128xf32>
    %cst_4 = arith.constant dense<0.000000e+00> : vector<128xf32>
    %7 = vector.multi_reduction <add>, %6, %cst_4 [0] : vector<512x128xf32> to vector<128xf32>
    %8 = vector.shape_cast %7 : vector<128xf32> to vector<1x128xf32>
    %9 = vector.shape_cast %8 : vector<1x128xf32> to vector<1x1x128xf32>
    %c0_5 = arith.constant 0 : index
    %c0_6 = arith.constant 0 : index
    %c0_7 = arith.constant 0 : index
    %10 = vector.load %arg3[%c0_5, %c0_6, %c0_7] : memref<1x1x128xf32, #tpu.memory_space<vmem>>, vector<1x1x128xf32>
    tpu.vector_store %arg3[%c0_5, %c0_6, %c0_7], %9 {strides = array<i32>} : memref<1x1x128xf32, #tpu.memory_space<vmem>>, vector<1x1x128xf32>,
    return
  }
  func.func @transform_0(%arg0: i32) -> (i32, i32) {
    %c0_i32 = arith.constant 0 : i32
    %c0_i32_0 = arith.constant 0 : i32
    return %arg0, %c0_i32 : i32, i32
  }
  func.func @transform_1(%arg0: i32) -> (i32, i32, i32) {
    %c0_i32 = arith.constant 0 : i32
    %c0_i32_0 = arith.constant 0 : i32
    %c0_i32_1 = arith.constant 0 : i32
    return %arg0, %c0_i32, %c0_i32_0 : i32, i32, i32
  }
  func.func @transform_2(%arg0: i32) -> (i32, i32, i32) {
    %c0_i32 = arith.constant 0 : i32
    %c0_i32_0 = arith.constant 0 : i32
    %c0_i32_1 = arith.constant 0 : i32
    return %arg0, %c0_i32, %c0_i32_0 : i32, i32, i32
  }
}

module attributes {stable_mosaic.version = 11 : i64} {
  func.func @_bn_stats_kernel(%arg0: i32, %arg1: memref<512x128xbf16, #tpu.memory_space<vmem>>, %arg2: memref<1x1x128xf32, #tpu.memory_space<vmem>>, %arg3: memref<1x1x128xf32, #tpu.memory_space<vmem>>) attributes {dimension_semantics = [#tpu.dimension_semantics<parallel>], iteration_bounds = array<i64: 4>, scalar_prefetch = 0 : i64, scratch_operands = 0 : i64, tpu.core_type = #tpu.core_type<tc>, window_params = [{transform_indices = @transform_0, window_bounds = array<i64: 512, 128>}, {transform_indices = @transform_1, window_bounds = array<i64: 1, 1, 128>}, {transform_indices = @transform_2, window_bounds = array<i64: 1, 1, 128>}]} {
    %c0 = arith.constant 0 : index
    %c0_0 = arith.constant 0 : index
    %0 = vector.load %arg1[%c0, %c0_0] : memref<512x128xbf16, #tpu.memory_space<vmem>>, vector<512x128xbf16>
    %1 = arith.extf %0 : vector<512x128xbf16> to vector<512x128xf32>
    %cst = arith.constant dense<0.000000e+00> : vector<128xf32>
    %2 = vector.multi_reduction <add>, %1, %cst [0] : vector<512x128xf32> to vector<128xf32>
    %3 = vector.shape_cast %2 : vector<128xf32> to vector<1x128xf32>
    %4 = vector.shape_cast %3 : vector<1x128xf32> to vector<1x1x128xf32>
    %c0_1 = arith.constant 0 : index
    %c0_2 = arith.constant 0 : index
    %c0_3 = arith.constant 0 : index
    %5 = vector.load %arg2[%c0_1, %c0_2, %c0_3] : memref<1x1x128xf32, #tpu.memory_space<vmem>>, vector<1x1x128xf32>
    tpu.vector_store %arg2[%c0_1, %c0_2, %c0_3], %4 {strides = array<i32>} : memref<1x1x128xf32, #tpu.memory_space<vmem>>, vector<1x1x128xf32>,
    %6 = arith.mulf %1, %1 : vector<512x128xf32>
    %cst_4 = arith.constant dense<0.000000e+00> : vector<128xf32>
    %7 = vector.multi_reduction <add>, %6, %cst_4 [0] : vector<512x128xf32> to vector<128xf32>
    %8 = vector.shape_cast %7 : vector<128xf32> to vector<1x128xf32>
    %9 = vector.shape_cast %8 : vector<1x128xf32> to vector<1x1x128xf32>
    %c0_5 = arith.constant 0 : index
    %c0_6 = arith.constant 0 : index
    %c0_7 = arith.constant 0 : index
    %10 = vector.load %arg3[%c0_5, %c0_6, %c0_7] : memref<1x1x128xf32, #tpu.memory_space<vmem>>, vector<1x1x128xf32>
    tpu.vector_store %arg3[%c0_5, %c0_6, %c0_7], %9 {strides = array<i32>} : memref<1x1x128xf32, #tpu.memory_space<vmem>>, vector<1x1x128xf32>,
    return
  }
  func.func @transform_0(%arg0: i32) -> (i32, i32) {
    %c0_i32 = arith.constant 0 : i32
    %c0_i32_0 = arith.constant 0 : i32
    return %arg0, %c0_i32 : i32, i32
  }
  func.func @transform_1(%arg0: i32) -> (i32, i32, i32) {
    %c0_i32 = arith.constant 0 : i32
    %c0_i32_0 = arith.constant 0 : i32
    %c0_i32_1 = arith.constant 0 : i32
    return %arg0, %c0_i32, %c0_i32_0 : i32, i32, i32
  }
  func.func @transform_2(%arg0: i32) -> (i32, i32, i32) {
    %c0_i32 = arith.constant 0 : i32
    %c0_i32_0 = arith.constant 0 : i32
    %c0_i32_1 = arith.constant 0 : i32
    return %arg0, %c0_i32, %c0_i32_0 : i32, i32, i32
  }
}

module attributes {stable_mosaic.version = 11 : i64} {
  func.func @_mm_bnrelu_kernel(%arg0: i32, %arg1: memref<512x128xbf16, #tpu.memory_space<vmem>>, %arg2: memref<1x128xf32, #tpu.memory_space<vmem>>, %arg3: memref<1x128xf32, #tpu.memory_space<vmem>>, %arg4: memref<128x16xbf16, #tpu.memory_space<vmem>>, %arg5: memref<512x16xbf16, #tpu.memory_space<vmem>>) attributes {dimension_semantics = [#tpu.dimension_semantics<parallel>], iteration_bounds = array<i64: 4>, scalar_prefetch = 0 : i64, scratch_operands = 0 : i64, tpu.core_type = #tpu.core_type<tc>, window_params = [{transform_indices = @transform_0, window_bounds = array<i64: 512, 128>}, {pipeline_mode = #tpu.pipeline_mode<synchronous>, transform_indices = @transform_1, window_bounds = array<i64: 1, 128>}, {pipeline_mode = #tpu.pipeline_mode<synchronous>, transform_indices = @transform_2, window_bounds = array<i64: 1, 128>}, {pipeline_mode = #tpu.pipeline_mode<synchronous>, transform_indices = @transform_3, window_bounds = array<i64: 128, 16>}, {transform_indices = @transform_4, window_bounds = array<i64: 512, 16>}]} {
    %c0 = arith.constant 0 : index
    %c0_0 = arith.constant 0 : index
    %0 = vector.load %arg1[%c0, %c0_0] : memref<512x128xbf16, #tpu.memory_space<vmem>>, vector<512x128xbf16>
    %1 = arith.extf %0 : vector<512x128xbf16> to vector<512x128xf32>
    %c0_1 = arith.constant 0 : index
    %c0_2 = arith.constant 0 : index
    %2 = vector.load %arg2[%c0_1, %c0_2] : memref<1x128xf32, #tpu.memory_space<vmem>>, vector<1x128xf32>
    %3 = vector.broadcast %2 : vector<1x128xf32> to vector<512x128xf32>
    %4 = arith.mulf %1, %3 : vector<512x128xf32>
    %c0_3 = arith.constant 0 : index
    %c0_4 = arith.constant 0 : index
    %5 = vector.load %arg3[%c0_3, %c0_4] : memref<1x128xf32, #tpu.memory_space<vmem>>, vector<1x128xf32>
    %6 = vector.broadcast %5 : vector<1x128xf32> to vector<512x128xf32>
    %7 = arith.addf %4, %6 : vector<512x128xf32>
    %cst = arith.constant 0.000000e+00 : f32
    %8 = vector.broadcast %cst : f32 to vector<512x128xf32>
    %9 = arith.maximumf %7, %8 : vector<512x128xf32>
    %10 = arith.truncf %9 : vector<512x128xf32> to vector<512x128xbf16>
    %c0_5 = arith.constant 0 : index
    %c0_6 = arith.constant 0 : index
    %11 = vector.load %arg4[%c0_5, %c0_6] : memref<128x16xbf16, #tpu.memory_space<vmem>>, vector<128x16xbf16>
    %cst_7 = arith.constant dense<0.000000e+00> : vector<512x16xf32>
    %12 = tpu.matmul %10, %11, %cst_7 {dimension_numbers = #tpu.dot_dimension_numbers<[1], [0], [0], [1], [0, 0, 1, 1], [], []>} : vector<512x128xbf16>, vector<128x16xbf16>, vector<512x16xf32> -> vector<512x16xf32>
    %13 = arith.truncf %12 : vector<512x16xf32> to vector<512x16xbf16>
    %c0_8 = arith.constant 0 : index
    %c0_9 = arith.constant 0 : index
    %14 = vector.load %arg5[%c0_8, %c0_9] : memref<512x16xbf16, #tpu.memory_space<vmem>>, vector<512x16xbf16>
    tpu.vector_store %arg5[%c0_8, %c0_9], %13 {strides = array<i32>} : memref<512x16xbf16, #tpu.memory_space<vmem>>, vector<512x16xbf16>,
    return
  }
  func.func @transform_0(%arg0: i32) -> (i32, i32) {
    %c0_i32 = arith.constant 0 : i32
    %c0_i32_0 = arith.constant 0 : i32
    return %arg0, %c0_i32 : i32, i32
  }
  func.func @transform_1(%arg0: i32) -> (i32, i32) {
    %c0_i32 = arith.constant 0 : i32
    %c0_i32_0 = arith.constant 0 : i32
    %c0_i32_1 = arith.constant 0 : i32
    return %c0_i32, %c0_i32_0 : i32, i32
  }
  func.func @transform_2(%arg0: i32) -> (i32, i32) {
    %c0_i32 = arith.constant 0 : i32
    %c0_i32_0 = arith.constant 0 : i32
    %c0_i32_1 = arith.constant 0 : i32
    return %c0_i32, %c0_i32_0 : i32, i32
  }
  func.func @transform_3(%arg0: i32) -> (i32, i32) {
    %c0_i32 = arith.constant 0 : i32
    %c0_i32_0 = arith.constant 0 : i32
    %c0_i32_1 = arith.constant 0 : i32
    return %c0_i32, %c0_i32_0 : i32, i32
  }
  func.func @transform_4(%arg0: i32) -> (i32, i32) {
    %c0_i32 = arith.constant 0 : i32
    %c0_i32_0 = arith.constant 0 : i32
    return %arg0, %c0_i32 : i32, i32
  }
}

module attributes {stable_mosaic.version = 11 : i64} {
  func.func @_tanh_kernel(%arg0: i32, %arg1: memref<16x512xf32, #tpu.memory_space<vmem>>, %arg2: memref<16x512xf32, #tpu.memory_space<vmem>>) attributes {dimension_semantics = [#tpu.dimension_semantics<parallel>], iteration_bounds = array<i64: 1>, scalar_prefetch = 0 : i64, scratch_operands = 0 : i64, tpu.core_type = #tpu.core_type<tc>, window_params = [{transform_indices = @transform_0, window_bounds = array<i64: 16, 512>}, {transform_indices = @transform_1, window_bounds = array<i64: 16, 512>}]} {
    %c0 = arith.constant 0 : index
    %c0_0 = arith.constant 0 : index
    %0 = vector.load %arg1[%c0, %c0_0] : memref<16x512xf32, #tpu.memory_space<vmem>>, vector<16x512xf32>
    %1 = math.tanh %0 : vector<16x512xf32>
    %c0_1 = arith.constant 0 : index
    %c0_2 = arith.constant 0 : index
    %2 = vector.load %arg2[%c0_1, %c0_2] : memref<16x512xf32, #tpu.memory_space<vmem>>, vector<16x512xf32>
    tpu.vector_store %arg2[%c0_1, %c0_2], %1 {strides = array<i32>} : memref<16x512xf32, #tpu.memory_space<vmem>>, vector<16x512xf32>,
    return
  }
  func.func @transform_0(%arg0: i32) -> (i32, i32) {
    %c0_i32 = arith.constant 0 : i32
    %c0_i32_0 = arith.constant 0 : i32
    return %arg0, %c0_i32 : i32, i32
  }
  func.func @transform_1(%arg0: i32) -> (i32, i32) {
    %c0_i32 = arith.constant 0 : i32
    %c0_i32_0 = arith.constant 0 : i32
    return %arg0, %c0_i32 : i32, i32
  }
}

</mosaic_0001>

<bundles_post_ra>
// kernel: generator_forward.11
= control target key start
LH: loop header
LB: loop body
LE: loop exit
PB: predicated region body
PF: predicated region fallthrough
CT: control target
= control target key end

     0   :  { %s86_s0 = inlined_call_operand.vmem [shape: bf16[32,128], index: 0, kind: input, shape index: {}]   ;;  %s87_s1 = inlined_call_operand.vmem [shape: f32[1,1,128], index: 1, kind: output, shape index: {0}]   ;;  %s88_s2 = inlined_call_operand.vmem [shape: f32[1,1,128], index: 2, kind: output, shape index: {1}]  }
   0x1   :  { %v51_v0 = vld [vmem:[%s86_s0] sm:$0xff]   ;;  %v58_v1 = vld [vmem:[%s86_s0 + $0x8] sm:$0xff]  }
   0x2   :  { %v52_v2 = vunpack.c.l.bf16 %v51_v0  ;;  %v53_v3 = vunpack.c.h.bf16 %v51_v0  ;;  %v56_v4 = vunpack.c.l.bf16 %v58_v1  ;;  %v57_v5 = vunpack.c.h.bf16 %v58_v1 }
   0x4   :  { %v18_v6 = vadd.f32 %v53_v3, %v52_v2  ;;  %v28_v7 = vmul.f32 %v52_v2, %v52_v2  ;;  %v29_v8 = vmul.f32 %v53_v3, %v53_v3  ;;  %v30_v9 = vmul.f32 %v56_v4, %v56_v4 }
   0x5   :  { %v31_v11 = vmul.f32 %v57_v5, %v57_v5 }
   0x6   :  { %v19_v10 = vadd.f32 %v56_v4, %v18_v6  ;;  %v32_v12 = vadd.f32 %v29_v8, %v28_v7 }
   0x8   :  { %v20_v13 = vadd.f32 %v57_v5, %v19_v10  ;;  %v33_v14 = vadd.f32 %v32_v12, %v30_v9 }
   0xa   :  { %v21_v15 = vrot.slane %v20_v13, 4  ;;  %v34_v16 = vadd.f32 %v33_v14, %v31_v11 }
   0xc   :  { %v22_v17 = vadd.f32 %v21_v15, %v20_v13  ;;  %v35_v18 = vrot.slane %v34_v16, 4 }
   0xe   :  { %v23_v19 = vrot.slane %v22_v17, 2  ;;  %v36_v20 = vadd.f32 %v35_v18, %v34_v16 }
  0x10   :  { %v24_v21 = vadd.f32 %v23_v19, %v22_v17  ;;  %v37_v22 = vrot.slane %v36_v20, 2 }
  0x12   :  { %v25_v23 = vrot.slane %v24_v21, 1  ;;  %v38_v24 = vadd.f32 %v37_v22, %v36_v20 }
  0x14   :  { %v26_v25 = vadd.f32 %v25_v23, %v24_v21  ;;  %v39_v26 = vrot.slane %v38_v24, 1 }
  0x16   :  { %27 = vst [vmem:[%s87_s1] sm:$0x1] %v26_v25  ;;  %v40_v27 = vadd.f32 %v39_v26, %v38_v24 }
  0x18   :  { %41 = vst [vmem:[%s88_s2] sm:$0x1] %v40_v27 }

// kernel: generator_forward.10
= control target key start
LH: loop header
LB: loop body
LE: loop exit
PB: predicated region body
PF: predicated region fallthrough
CT: control target
= control target key end

     0   :  { %7 = vsyncpa [#allocation3], 0  ;;  %s878_s12 = smov [#allocation2]   ;;  %s879_s14 = smov 512   ;;  %s924_s0 = inlined_call_operand.vmem [shape: bf16[8,128], index: 0, kind: input, shape index: {}]   ;;  %s925_s1 = inlined_call_operand.hbm [shape: bf16[128,1024], index: 1, kind: input, shape index: {}]   ;;  %s926_s2 = inlined_call_operand.vmem [shape: bf16[8,1024], index: 2, kind: output, shape index: {}]  }
   0x1   :  { %s14_s11 = sshll.u32 %s925_s1, 4  ;;  %s16_s13 = sshll.u32 %s878_s12, 4  ;;  %s15_s11 = int_to_ptr.hbm [resolvable:$true] %s14_s11  ;;  %s17_s13 = int_to_ptr.vmem [resolvable:$true] %s16_s13 }
   0x2   :  { %s880_s15 = smov 32  }
   0x3   :  { %22 = dma.hbm_to_vmem [thread:$0]  %s15_s11, 8192, %s17_s13, [#allocation3], %s879_s14, %s879_s14, %s880_s15  }
   0x4   :  { %876 = dma.done.wait [#allocation3], 8192  }
   0x5   :  { %877 = vsyncadd [#allocation3], 4294959104  ;;  %v755_v0 = vld [vmem:[#allocation2 + $0x1c0] sm:$0xf]  ;;  %v841_v2 = vld [vmem:[#allocation2 + $0x1c4] sm:$0xf] }
   0x6   :  { %v845_v1 = vld [vmem:[#allocation2 + $0x1dc] sm:$0xf0]  ;;  %v757_v4 = vld [vmem:[#allocation2 + $0x1e0] sm:$0xf0]  ;;  %v763_v5 = vld [vmem:[#allocation2 + $0x1c8] sm:$0xf] }
   0x7   :  { %v756_v3 = vor.u32 %v845_v1, %v755_v0  ;;  %v846_v6 = vld [vmem:[#allocation2 + $0x1e4] sm:$0xf0]  ;;  %v760_v7 = vor.u32 %v841_v2, %v757_v4  ;;  %v842_v9 = vld [vmem:[#allocation2 + $0x1cc] sm:$0xf]  ;;  %v723_v11 = vld [vmem:[#allocation2 + $0x180] sm:$0xf] }
   0x8   :  { %v764_v8 = vor.u32 %v846_v6, %v763_v5  ;;  %v765_v10 = vld [vmem:[#allocation2 + $0x1e8] sm:$0xf0]  ;;  %v837_v13 = vld [vmem:[#allocation2 + $0x19c] sm:$0xf0]  ;;  %v833_v14 = vld [vmem:[#allocation2 + $0x184] sm:$0xf] }
   0x9   :  { %412 = vmatpush.bf16.msra.mxu0 %v756_v3  ;;  %v768_v12 = vor.u32 %v842_v9, %v765_v10  ;;  %v725_v15 = vld [vmem:[#allocation2 + $0x1a0] sm:$0xf0]  ;;  %425 = vmatpush.bf16.msra.mxu1 %v760_v7  ;;  %v724_v16 = vor.u32 %v837_v13, %v723_v11  ;;  %v731_v18 = vld [vmem:[#allocation2 + $0x188] sm:$0xf]  ;;  %v834_v20 = vld [vmem:[#allocation2 + $0x18c] sm:$0xf] }
   0xa   :  { %438 = vmatpush.bf16.msra.mxu2 %v764_v8  ;;  %v728_v17 = vor.u32 %v833_v14, %v725_v15  ;;  %v838_v19 = vld [vmem:[#allocation2 + $0x1a4] sm:$0xf0]  ;;  %v733_v22 = vld [vmem:[#allocation2 + $0x1a8] sm:$0xf0]  ;;  %v691_v23 = vld [vmem:[#allocation2 + $0x140] sm:$0xf] }
   0xb   :  { %451 = vmatpush.bf16.msra.mxu3 %v768_v12  ;;  %v732_v21 = vor.u32 %v838_v19, %v731_v18  ;;  %v829_v24 = vld [vmem:[#allocation2 + $0x15c] sm:$0xf0]  ;;  %v736_v25 = vor.u32 %v834_v20, %v733_v22  ;;  %v825_v26 = vld [vmem:[#allocation2 + $0x144] sm:$0xf]  ;;  %v699_v28 = vld [vmem:[#allocation2 + $0x148] sm:$0xf] }
   0xc   :  { %v693_v27 = vld [vmem:[#allocation2 + $0x160] sm:$0xf0]  ;;  %v692_v29 = vor.u32 %v829_v24, %v691_v23  ;;  %v830_v30 = vld [vmem:[#allocation2 + $0x164] sm:$0xf0]  ;;  %v826_v31 = vld [vmem:[#allocation2 + $0x14c] sm:$0xf] }
   0xd   :  { %413 = vmatpush.bf16.msra.mxu0 %v724_v16  ;;  %v701_v32 = vld [vmem:[#allocation2 + $0x168] sm:$0xf0]  ;;  %426 = vmatpush.bf16.msra.mxu1 %v728_v17  ;;  %v696_v33 = vor.u32 %v825_v26, %v693_v27  ;;  %v700_v34 = vor.u32 %v830_v30, %v699_v28  ;;  %v659_v35 = vld [vmem:[#allocation2 + $0x100] sm:$0xf]  ;;  %v817_v37 = vld [vmem:[#allocation2 + $0x104] sm:$0xf] }
   0xe   :  { %439 = vmatpush.bf16.msra.mxu2 %v732_v21  ;;  %v821_v36 = vld [vmem:[#allocation2 + $0x11c] sm:$0xf0]  ;;  %v704_v38 = vor.u32 %v826_v31, %v701_v32  ;;  %v661_v39 = vld [vmem:[#allocation2 + $0x120] sm:$0xf0]  ;;  %v667_v40 = vld [vmem:[#allocation2 + $0x108] sm:$0xf] }
   0xf   :  { %452 = vmatpush.bf16.msra.mxu3 %v736_v25  ;;  %v822_v41 = vld [vmem:[#allocation2 + $0x124] sm:$0xf0]  ;;  %v818_v42 = vld [vmem:[#allocation2 + $0x10c] sm:$0xf]  ;;  %v660_v44 = vor.u32 %v821_v36, %v659_v35  ;;  %v664_v45 = vor.u32 %v817_v37, %v661_v39  ;;  %v627_v47 = vld [vmem:[#allocation2 + $0xc0] sm:$0xf] }
  0x10   :  { %v669_v43 = vld [vmem:[#allocation2 + $0x128] sm:$0xf0]  ;;  %v668_v46 = vor.u32 %v822_v41, %v667_v40  ;;  %v813_v48 = vld [vmem:[#allocation2 + $0xdc] sm:$0xf0]  ;;  %v809_v49 = vld [vmem:[#allocation2 + $0xc4] sm:$0xf] }
  0x11   :  { %414 = vmatpush.bf16.msra.mxu0 %v692_v29  ;;  %427 = vmatpush.bf16.msra.mxu1 %v696_v33  ;;  %v672_v50 = vor.u32 %v818_v42, %v669_v43  ;;  %v629_v51 = vld [vmem:[#allocation2 + $0xe0] sm:$0xf0]  ;;  %v635_v52 = vld [vmem:[#allocation2 + $0xc8] sm:$0xf]  ;;  %v810_v54 = vld [vmem:[#allocation2 + $0xcc] sm:$0xf]  ;;  %v628_v56 = vor.u32 %v813_v48, %v627_v47 }
  0x12   :  { %440 = vmatpush.bf16.msra.mxu2 %v700_v34  ;;  %v814_v53 = vld [vmem:[#allocation2 + $0xe4] sm:$0xf0]  ;;  %v637_v55 = vld [vmem:[#allocation2 + $0xe8] sm:$0xf0]  ;;  %v632_v57 = vor.u32 %v809_v49, %v629_v51  ;;  %v595_v59 = vld [vmem:[#allocation2 + $0x80] sm:$0xf] }
  0x13   :  { %453 = vmatpush.bf16.msra.mxu3 %v704_v38  ;;  %v636_v58 = vor.u32 %v814_v53, %v635_v52  ;;  %v805_v60 = vld [vmem:[#allocation2 + $0x9c] sm:$0xf0]  ;;  %v801_v61 = vld [vmem:[#allocation2 + $0x84] sm:$0xf]  ;;  %v640_v62 = vor.u32 %v810_v54, %v637_v55  ;;  %v603_v0 = vld [vmem:[#allocation2 + $0x88] sm:$0xf] }
  0x14   :  { %v597_v63 = vld [vmem:[#allocation2 + $0xa0] sm:$0xf0]  ;;  %v806_v1 = vld [vmem:[#allocation2 + $0xa4] sm:$0xf0]  ;;  %v802_v2 = vld [vmem:[#allocation2 + $0x8c] sm:$0xf]  ;;  %v596_v4 = vor.u32 %v805_v60, %v595_v59 }
  0x15   :  { %415 = vmatpush.bf16.msra.mxu0 %v660_v44  ;;  %428 = vmatpush.bf16.msra.mxu1 %v664_v45  ;;  %v605_v3 = vld [vmem:[#allocation2 + $0xa8] sm:$0xf0]  ;;  %v600_v5 = vor.u32 %v801_v61, %v597_v63  ;;  %v604_v6 = vor.u32 %v806_v1, %v603_v0  ;;  %v563_v7 = vld [vmem:[#allocation2 + $0x40] sm:$0xf]  ;;  %v793_v9 = vld [vmem:[#allocation2 + $0x44] sm:$0xf] }
  0x16   :  { %441 = vmatpush.bf16.msra.mxu2 %v668_v46  ;;  %v797_v8 = vld [vmem:[#allocation2 + $0x5c] sm:$0xf0]  ;;  %v608_v10 = vor.u32 %v802_v2, %v605_v3  ;;  %v565_v11 = vld [vmem:[#allocation2 + $0x60] sm:$0xf0]  ;;  %v571_v12 = vld [vmem:[#allocation2 + $0x48] sm:$0xf] }
  0x17   :  { %454 = vmatpush.bf16.msra.mxu3 %v672_v50  ;;  %v798_v13 = vld [vmem:[#allocation2 + $0x64] sm:$0xf0]  ;;  %v794_v14 = vld [vmem:[#allocation2 + $0x4c] sm:$0xf]  ;;  %v564_v16 = vor.u32 %v797_v8, %v563_v7  ;;  %v531_v17 = vld [vmem:[#allocation2] sm:$0xf]  ;;  %v568_v19 = vor.u32 %v793_v9, %v565_v11 }
  0x18   :  { %v573_v15 = vld [vmem:[#allocation2 + $0x68] sm:$0xf0]  ;;  %v789_v18 = vld [vmem:[#allocation2 + $0x1c] sm:$0xf0]  ;;  %v572_v20 = vor.u32 %v798_v13, %v571_v12  ;;  %v785_v21 = vld [vmem:[#allocation2 + $0x4] sm:$0xf] }
  0x19   :  { %416 = vmatpush.bf16.msra.mxu0 %v628_v56  ;;  %429 = vmatpush.bf16.msra.mxu1 %v632_v57  ;;  %v533_v22 = vld [vmem:[#allocation2 + $0x20] sm:$0xf0]  ;;  %v539_v23 = vld [vmem:[#allocation2 + $0x8] sm:$0xf]  ;;  %v576_v24 = vor.u32 %v794_v14, %v573_v15  ;;  %v786_v26 = vld [vmem:[#allocation2 + $0xc] sm:$0xf]  ;;  %v532_v31 = vor.u32 %v789_v18, %v531_v17 }
  0x1a   :  { %442 = vmatpush.bf16.msra.mxu2 %v636_v58  ;;  %v790_v25 = vld [vmem:[#allocation2 + $0x24] sm:$0xf0]  ;;  %v541_v27 = vld [vmem:[#allocation2 + $0x28] sm:$0xf0]  ;;  %v771_v28 = vld [vmem:[#allocation2 + $0x1d0] sm:$0xf]  ;;  %v536_v35 = vor.u32 %v785_v21, %v533_v22 }
  0x1b   :  { %455 = vmatpush.bf16.msra.mxu3 %v640_v62  ;;  %v847_v29 = vld [vmem:[#allocation2 + $0x1ec] sm:$0xf0]  ;;  %v843_v30 = vld [vmem:[#allocation2 + $0x1d4] sm:$0xf]  ;;  %v779_v33 = vld [vmem:[#allocation2 + $0x1d8] sm:$0xf]  ;;  %v540_v36 = vor.u32 %v790_v25, %v539_v23  ;;  %v544_v39 = vor.u32 %v786_v26, %v541_v27 }
  0x1c   :  { %v773_v32 = vld [vmem:[#allocation2 + $0x1f0] sm:$0xf0]  ;;  %v848_v34 = vld [vmem:[#allocation2 + $0x1f4] sm:$0xf0]  ;;  %v844_v37 = vld [vmem:[#allocation2 + $0x1dc] sm:$0xf]  ;;  %v772_v40 = vor.u32 %v847_v29, %v771_v28 }
  0x1d   :  { %417 = vmatpush.bf16.msra.mxu0 %v596_v4  ;;  %430 = vmatpush.bf16.msra.mxu1 %v600_v5  ;;  %v781_v38 = vld [vmem:[#allocation2 + $0x1f8] sm:$0xf0]  ;;  %v776_v41 = vor.u32 %v843_v30, %v773_v32  ;;  %v780_v42 = vor.u32 %v848_v34, %v779_v33  ;;  %v739_v43 = vld [vmem:[#allocation2 + $0x190] sm:$0xf]  ;;  %v835_v45 = vld [vmem:[#allocation2 + $0x194] sm:$0xf] }
  0x1e   :  { %443 = vmatpush.bf16.msra.mxu2 %v604_v6  ;;  %v839_v44 = vld [vmem:[#allocation2 + $0x1ac] sm:$0xf0]  ;;  %v784_v46 = vor.u32 %v844_v37, %v781_v38  ;;  %v741_v47 = vld [vmem:[#allocation2 + $0x1b0] sm:$0xf0]  ;;  %v747_v48 = vld [vmem:[#allocation2 + $0x198] sm:$0xf] }
  0x1f   :  { %456 = vmatpush.bf16.msra.mxu3 %v608_v10  ;;  %v840_v49 = vld [vmem:[#allocation2 + $0x1b4] sm:$0xf0]  ;;  %v836_v50 = vld [vmem:[#allocation2 + $0x19c] sm:$0xf]  ;;  %v902_v52 = vld [vmem:[%s924_s0] sm:$0xf]  ;;  %v740_v53 = vor.u32 %v839_v44, %v739_v43  ;;  %v744_v54 = vor.u32 %v835_v45, %v741_v47 }
  0x20   :  { %v749_v51 = vld [vmem:[#allocation2 + $0x1b8] sm:$0xf0]  ;;  %v748_v55 = vor.u32 %v840_v49, %v747_v48  ;;  %v707_v56 = vld [vmem:[#allocation2 + $0x150] sm:$0xf]  ;;  %v827_v58 = vld [vmem:[#allocation2 + $0x154] sm:$0xf] }
  0x21   :  { %418 = vmatpush.bf16.msra.mxu0 %v564_v16  ;;  %431 = vmatpush.bf16.msra.mxu1 %v568_v19  ;;  %v831_v57 = vld [vmem:[#allocation2 + $0x16c] sm:$0xf0]  ;;  %v752_v59 = vor.u32 %v836_v50, %v749_v51  ;;  %v709_v60 = vld [vmem:[#allocation2 + $0x170] sm:$0xf0]  ;;  %v715_v61 = vld [vmem:[#allocation2 + $0x158] sm:$0xf] }
  0x22   :  { %444 = vmatpush.bf16.msra.mxu2 %v572_v20  ;;  %v832_v62 = vld [vmem:[#allocation2 + $0x174] sm:$0xf0]  ;;  %v828_v63 = vld [vmem:[#allocation2 + $0x15c] sm:$0xf]  ;;  %v708_v1 = vor.u32 %v831_v57, %v707_v56  ;;  %v712_v2 = vor.u32 %v827_v58, %v709_v60  ;;  %v675_v4 = vld [vmem:[#allocation2 + $0x110] sm:$0xf] }
  0x23   :  { %457 = vmatpush.bf16.msra.mxu3 %v576_v24  ;;  %v717_v0 = vld [vmem:[#allocation2 + $0x178] sm:$0xf0]  ;;  %v716_v3 = vor.u32 %v832_v62, %v715_v61  ;;  %v823_v5 = vld [vmem:[#allocation2 + $0x12c] sm:$0xf0]  ;;  %v819_v6 = vld [vmem:[#allocation2 + $0x114] sm:$0xf] }
  0x24   :  { %v720_v7 = vor.u32 %v828_v63, %v717_v0  ;;  %v677_v8 = vld [vmem:[#allocation2 + $0x130] sm:$0xf0]  ;;  %v683_v9 = vld [vmem:[#allocation2 + $0x118] sm:$0xf]  ;;  %v820_v11 = vld [vmem:[#allocation2 + $0x11c] sm:$0xf]  ;;  %v676_v13 = vor.u32 %v823_v5, %v675_v4 }
  0x25   :  { %419 = vmatpush.bf16.msra.mxu0 %v532_v31  ;;  %432 = vmatpush.bf16.msra.mxu1 %v536_v35  ;;  %v824_v10 = vld [vmem:[#allocation2 + $0x134] sm:$0xf0]  ;;  %v685_v12 = vld [vmem:[#allocation2 + $0x138] sm:$0xf0]  ;;  %v680_v14 = vor.u32 %v819_v6, %v677_v8  ;;  %v643_v16 = vld [vmem:[#allocation2 + $0xd0] sm:$0xf] }
  0x26   :  { %445 = vmatpush.bf16.msra.mxu2 %v540_v36  ;;  %v684_v15 = vor.u32 %v824_v10, %v683_v9  ;;  %v815_v17 = vld [vmem:[#allocation2 + $0xec] sm:$0xf0]  ;;  %v811_v18 = vld [vmem:[#allocation2 + $0xd4] sm:$0xf]  ;;  %v688_v19 = vor.u32 %v820_v11, %v685_v12  ;;  %v651_v21 = vld [vmem:[#allocation2 + $0xd8] sm:$0xf] }
  0x27   :  { %458 = vmatpush.bf16.msra.mxu3 %v544_v39  ;;  %v645_v20 = vld [vmem:[#allocation2 + $0xf0] sm:$0xf0]  ;;  %v816_v22 = vld [vmem:[#allocation2 + $0xf4] sm:$0xf0]  ;;  %v812_v23 = vld [vmem:[#allocation2 + $0xdc] sm:$0xf]  ;;  %v644_v25 = vor.u32 %v815_v17, %v643_v16 }
  0x28   :  { %420 = vmatmul.bf16.vlgmr.msra.gmra.mxu0 %v902_v52  ;;  %433 = vmatmul.bf16.vlgmr.msra.gmra.mxu1 %v902_v52  ;;  %v653_v24 = vld [vmem:[#allocation2 + $0xf8] sm:$0xf0]  ;;  %v648_v26 = vor.u32 %v811_v18, %v645_v20  ;;  %v652_v27 = vor.u32 %v816_v22, %v651_v21  ;;  %v611_v28 = vld [vmem:[#allocation2 + $0x90] sm:$0xf]  ;;  %v803_v30 = vld [vmem:[#allocation2 + $0x94] sm:$0xf] }
  0x29   :  { %464 = vmatpush.bf16.msrb.mxu0 %v772_v40  ;;  %477 = vmatpush.bf16.msrb.mxu1 %v776_v41  ;;  %v807_v29 = vld [vmem:[#allocation2 + $0xac] sm:$0xf0]  ;;  %v656_v31 = vor.u32 %v812_v23, %v653_v24  ;;  %v613_v32 = vld [vmem:[#allocation2 + $0xb0] sm:$0xf0]  ;;  %v619_v33 = vld [vmem:[#allocation2 + $0x98] sm:$0xf] }
  0x2a   :  { %490 = vmatpush.bf16.msrb.mxu2 %v780_v42  ;;  %459 = vmatmul.bf16.vlgmr.msra.gmra.mxu3 %v902_v52  ;;  %v808_v34 = vld [vmem:[#allocation2 + $0xb4] sm:$0xf0]  ;;  %v804_v35 = vld [vmem:[#allocation2 + $0x9c] sm:$0xf]  ;;  %v612_v37 = vor.u32 %v807_v29, %v611_v28  ;;  %v616_v38 = vor.u32 %v803_v30, %v613_v32  ;;  %v579_v40 = vld [vmem:[#allocation2 + $0x50] sm:$0xf] }
  0x2b   :  { %503 = vmatpush.bf16.msrb.mxu3 %v784_v46  ;;  %446 = vmatmul.bf16.vlgmr.msra.gmra.mxu2 %v902_v52  ;;  %v621_v36 = vld [vmem:[#allocation2 + $0xb8] sm:$0xf0]  ;;  %v620_v39 = vor.u32 %v808_v34, %v619_v33  ;;  %v799_v41 = vld [vmem:[#allocation2 + $0x6c] sm:$0xf0]  ;;  %v795_v42 = vld [vmem:[#allocation2 + $0x54] sm:$0xf] }
  0x2c   :  { %v624_v43 = vor.u32 %v804_v35, %v621_v36  ;;  %v581_v44 = vld [vmem:[#allocation2 + $0x70] sm:$0xf0]  ;;  %v587_v45 = vld [vmem:[#allocation2 + $0x58] sm:$0xf]  ;;  %v796_v47 = vld [vmem:[#allocation2 + $0x5c] sm:$0xf]  ;;  %v580_v49 = vor.u32 %v799_v41, %v579_v40 }
  0x2d   :  { %465 = vmatpush.bf16.msrb.mxu0 %v740_v53  ;;  %478 = vmatpush.bf16.msrb.mxu1 %v744_v54  ;;  %v800_v46 = vld [vmem:[#allocation2 + $0x74] sm:$0xf0]  ;;  %v589_v48 = vld [vmem:[#allocation2 + $0x78] sm:$0xf0]  ;;  %v584_v50 = vor.u32 %v795_v42, %v581_v44  ;;  %v547_v53 = vld [vmem:[#allocation2 + $0x10] sm:$0xf] }
  0x2e   :  { %491 = vmatpush.bf16.msrb.mxu2 %v748_v55  ;;  %v588_v51 = vor.u32 %v800_v46, %v587_v45  ;;  %v791_v54 = vld [vmem:[#allocation2 + $0x2c] sm:$0xf0]  ;;  %v787_v55 = vld [vmem:[#allocation2 + $0x14] sm:$0xf]  ;;  %v592_v56 = vor.u32 %v796_v47, %v589_v48  ;;  %v555_v58 = vld [vmem:[#allocation2 + $0x18] sm:$0xf] }
  0x2f   :  { %504 = vmatpush.bf16.msrb.mxu3 %v752_v59  ;;  %v549_v57 = vld [vmem:[#allocation2 + $0x30] sm:$0xf0]  ;;  %v792_v59 = vld [vmem:[#allocation2 + $0x34] sm:$0xf0]  ;;  %v788_v60 = vld [vmem:[#allocation2 + $0x1c] sm:$0xf]  ;;  %v548_v62 = vor.u32 %v791_v54, %v547_v53 }
  0x30   :  { %v557_v61 = vld [vmem:[#allocation2 + $0x38] sm:$0xf0]  ;;  %v552_v63 = vor.u32 %v787_v55, %v549_v57  ;;  %v556_v0 = vor.u32 %v792_v59, %v555_v58 }
  0x31   :  { %466 = vmatpush.bf16.msrb.mxu0 %v708_v1  ;;  %479 = vmatpush.bf16.msrb.mxu1 %v712_v2  ;;  %v560_v1 = vor.u32 %v788_v60, %v557_v61 }
  0x32   :  { %492 = vmatpush.bf16.msrb.mxu2 %v716_v3 }
  0x33   :  { %505 = vmatpush.bf16.msrb.mxu3 %v720_v7 }
  0x35   :  { %467 = vmatpush.bf16.msrb.mxu0 %v676_v13  ;;  %480 = vmatpush.bf16.msrb.mxu1 %v680_v14 }
  0x36   :  { %493 = vmatpush.bf16.msrb.mxu2 %v684_v15 }
  0x37   :  { %506 = vmatpush.bf16.msrb.mxu3 %v688_v19 }
  0x39   :  { %468 = vmatpush.bf16.msrb.mxu0 %v644_v25  ;;  %481 = vmatpush.bf16.msrb.mxu1 %v648_v26 }
  0x3a   :  { %494 = vmatpush.bf16.msrb.mxu2 %v652_v27 }
  0x3b   :  { %507 = vmatpush.bf16.msrb.mxu3 %v656_v31 }
  0x3d   :  { %469 = vmatpush.bf16.msrb.mxu0 %v612_v37  ;;  %482 = vmatpush.bf16.msrb.mxu1 %v616_v38 }
  0x3e   :  { %495 = vmatpush.bf16.msrb.mxu2 %v620_v39 }
  0x3f   :  { %508 = vmatpush.bf16.msrb.mxu3 %v624_v43 }
  0x41   :  { %470 = vmatpush.bf16.msrb.mxu0 %v580_v49  ;;  %483 = vmatpush.bf16.msrb.mxu1 %v584_v50 }
  0x42   :  { %496 = vmatpush.bf16.msrb.mxu2 %v588_v51 }
  0x43   :  { %509 = vmatpush.bf16.msrb.mxu3 %v592_v56 }
  0x45   :  { %471 = vmatpush.bf16.msrb.mxu0 %v548_v62  ;;  %484 = vmatpush.bf16.msrb.mxu1 %v552_v63 }
  0x46   :  { %497 = vmatpush.bf16.msrb.mxu2 %v556_v0 }
  0x47   :  { %510 = vmatpush.bf16.msrb.mxu3 %v560_v1 }
  0x48   :  { %472 = vmatmul.bf16.vlgmr.msrb.gmra.mxu0 %v902_v52  ;;  %485 = vmatmul.bf16.vlgmr.msrb.gmra.mxu1 %v902_v52 }
  0x49   :  { %498 = vmatmul.bf16.vlgmr.msrb.gmra.mxu2 %v902_v52 }
  0x4a   :  { %511 = vmatmul.bf16.vlgmr.msrb.gmra.mxu3 %v902_v52 }
  0xa5   :  { %v421_v2 = vpop.f32.mrf.mxu0  ;;  %v434_v3 = vpop.f32.mrf.mxu1 }
  0xa6   :  { %v516_v4 = vpack.c.bf16 %v434_v3, %v421_v2 }
  0xa8   :  { %520 = vst [vmem:[%s926_s2] sm:$0xff] %v516_v4 }
  0xad   :  { %v460_v6 = vpop.f32.mrf.mxu3  ;;  %v423_v8 = vpop.f32.mrf.mxu0 }
  0xae   :  { %v447_v5 = vpop.f32.mrf.mxu2  ;;  %v436_v9 = vpop.f32.mrf.mxu1 }
  0xaf   :  { %v517_v7 = vpack.c.bf16 %v460_v6, %v447_v5 }
  0xb1   :  { %521 = vst [vmem:[%s926_s2 + $0x8] sm:$0xff] %v517_v7 }
  0xb5   :  { %v462_v11 = vpop.f32.mrf.mxu3 }
  0xb6   :  { %v449_v10 = vpop.f32.mrf.mxu2 }
  0xc5   :  { %v473_v12 = vpop.f32.mrf.mxu0  ;;  %v486_v52 = vpop.f32.mrf.mxu1 }
  0xc6   :  { %v518_v13 = vpack.c.bf16 %v486_v52, %v473_v12 }
  0xc8   :  { %522 = vst [vmem:[%s926_s2 + $0x10] sm:$0xff] %v518_v13 }
  0xcc   :  { %v499_v14 = vpop.f32.mrf.mxu2 }
  0xcd   :  { %v512_v15 = vpop.f32.mrf.mxu3  ;;  %v475_v16 = vpop.f32.mrf.mxu0 }
  0xce   :  { %v519_v17 = vpack.c.bf16 %v512_v15, %v499_v14  ;;  %v488_v18 = vpop.f32.mrf.mxu1 }
  0xd0   :  { %523 = vst [vmem:[%s926_s2 + $0x18] sm:$0xff] %v519_v17 }
  0xd4   :  { %v501_v19 = vpop.f32.mrf.mxu2 }
  0xd5   :  { %v514_v20 = vpop.f32.mrf.mxu3 }
  0xd6   :  { %528 = vsyncpa [#allocation3], 1 }

// kernel: generator_forward.12
= control target key start
LH: loop header
LB: loop body
LE: loop exit
PB: predicated region body
PF: predicated region fallthrough
CT: control target
= control target key end

     0   :  { %9 = vsyncpa [#allocation3], 0  ;;  %s552_s18 = smov [#allocation2]   ;;  %s553_s20 = smov 256   ;;  %s619_s0 = inlined_call_operand.vmem [shape: bf16[32,128], index: 0, kind: input, shape index: {}]   ;;  %s620_s1 = inlined_call_operand.vmem [shape: f32[1,128], index: 1, kind: input, shape index: {}]   ;;  %s621_s2 = inlined_call_operand.vmem [shape: f32[1,128], index: 2, kind: input, shape index: {}]   ;;  %s622_s3 = inlined_call_operand.hbm [shape: bf16[128,512], index: 3, kind: input, shape index: {}]   ;;  %s623_s4 = inlined_call_operand.vmem [shape: bf16[32,512], index: 4, kind: output, shape index: {}]  }
   0x1   :  { %s20_s17 = sshll.u32 %s622_s3, 4  ;;  %s22_s19 = sshll.u32 %s552_s18, 4  ;;  %s21_s17 = int_to_ptr.hbm [resolvable:$true] %s20_s17  ;;  %s23_s19 = int_to_ptr.vmem [resolvable:$true] %s22_s19 }
   0x2   :  { %s554_s21 = smov 16  }
   0x3   :  { %28 = dma.hbm_to_vmem [thread:$0]  %s21_s17, 4096, %s23_s19, [#allocation3], %s553_s20, %s553_s20, %s554_s21  }
   0x4   :  { %550 = dma.done.wait [#allocation3], 4096  }
   0x5   :  { %551 = vsyncadd [#allocation3], 4294963200  ;;  %v466_v0 = vld [vmem:[#allocation2 + $0xe0] sm:$0xf]  ;;  %v510_v1 = vld [vmem:[#allocation2 + $0xec] sm:$0xf0] }
   0x6   :  { %v508_v2 = vld [vmem:[#allocation2 + $0xe4] sm:$0xf]  ;;  %v467_v3 = vor.u32 %v510_v1, %v466_v0  ;;  %v468_v4 = vld [vmem:[#allocation2 + $0xf0] sm:$0xf0]  ;;  %v474_v5 = vld [vmem:[#allocation2 + $0xe8] sm:$0xf] }
   0x7   :  { %v511_v6 = vld [vmem:[#allocation2 + $0xf4] sm:$0xf0]  ;;  %v471_v7 = vor.u32 %v508_v2, %v468_v4  ;;  %v509_v9 = vld [vmem:[#allocation2 + $0xec] sm:$0xf]  ;;  %v476_v10 = vld [vmem:[#allocation2 + $0xf8] sm:$0xf0] }
   0x8   :  { %v475_v8 = vor.u32 %v511_v6, %v474_v5  ;;  %v450_v11 = vld [vmem:[#allocation2 + $0xc0] sm:$0xf]  ;;  %255 = vmatpush.bf16.msra.mxu0 %v467_v3  ;;  %v479_v12 = vor.u32 %v509_v9, %v476_v10  ;;  %v506_v13 = vld [vmem:[#allocation2 + $0xcc] sm:$0xf0]  ;;  %v504_v14 = vld [vmem:[#allocation2 + $0xc4] sm:$0xf] }
   0x9   :  { %v452_v15 = vld [vmem:[#allocation2 + $0xd0] sm:$0xf0]  ;;  %274 = vmatpush.bf16.msra.mxu1 %v471_v7  ;;  %v451_v16 = vor.u32 %v506_v13, %v450_v11  ;;  %v458_v18 = vld [vmem:[#allocation2 + $0xc8] sm:$0xf]  ;;  %v507_v19 = vld [vmem:[#allocation2 + $0xd4] sm:$0xf0] }
   0xa   :  { %293 = vmatpush.bf16.msra.mxu2 %v475_v8  ;;  %v455_v17 = vor.u32 %v504_v14, %v452_v15  ;;  %v505_v20 = vld [vmem:[#allocation2 + $0xcc] sm:$0xf]  ;;  %312 = vmatpush.bf16.msra.mxu3 %v479_v12  ;;  %v459_v21 = vor.u32 %v507_v19, %v458_v18  ;;  %v460_v22 = vld [vmem:[#allocation2 + $0xd8] sm:$0xf0]  ;;  %v434_v23 = vld [vmem:[#allocation2 + $0xa0] sm:$0xf] }
   0xb   :  { %v502_v24 = vld [vmem:[#allocation2 + $0xac] sm:$0xf0]  ;;  %v463_v25 = vor.u32 %v505_v20, %v460_v22  ;;  %v500_v26 = vld [vmem:[#allocation2 + $0xa4] sm:$0xf]  ;;  %v436_v27 = vld [vmem:[#allocation2 + $0xb0] sm:$0xf0] }
   0xc   :  { %v442_v28 = vld [vmem:[#allocation2 + $0xa8] sm:$0xf]  ;;  %256 = vmatpush.bf16.msra.mxu0 %v451_v16  ;;  %v435_v29 = vor.u32 %v502_v24, %v434_v23  ;;  %v503_v30 = vld [vmem:[#allocation2 + $0xb4] sm:$0xf0]  ;;  %v501_v31 = vld [vmem:[#allocation2 + $0xac] sm:$0xf]  ;;  %v439_v33 = vor.u32 %v500_v26, %v436_v27 }
   0xd   :  { %v444_v32 = vld [vmem:[#allocation2 + $0xb8] sm:$0xf0]  ;;  %275 = vmatpush.bf16.msra.mxu1 %v455_v17  ;;  %v443_v34 = vor.u32 %v503_v30, %v442_v28  ;;  %v418_v35 = vld [vmem:[#allocation2 + $0x80] sm:$0xf]  ;;  %v498_v36 = vld [vmem:[#allocation2 + $0x8c] sm:$0xf0] }
   0xe   :  { %294 = vmatpush.bf16.msra.mxu2 %v459_v21  ;;  %v496_v37 = vld [vmem:[#allocation2 + $0x84] sm:$0xf]  ;;  %313 = vmatpush.bf16.msra.mxu3 %v463_v25  ;;  %v447_v38 = vor.u32 %v501_v31, %v444_v32  ;;  %v420_v39 = vld [vmem:[#allocation2 + $0x90] sm:$0xf0]  ;;  %v426_v40 = vld [vmem:[#allocation2 + $0x88] sm:$0xf]  ;;  %v419_v44 = vor.u32 %v498_v36, %v418_v35 }
   0xf   :  { %v499_v41 = vld [vmem:[#allocation2 + $0x94] sm:$0xf0]  ;;  %v497_v42 = vld [vmem:[#allocation2 + $0x8c] sm:$0xf]  ;;  %v428_v43 = vld [vmem:[#allocation2 + $0x98] sm:$0xf0]  ;;  %v423_v45 = vor.u32 %v496_v37, %v420_v39 }
  0x10   :  { %257 = vmatpush.bf16.msra.mxu0 %v435_v29  ;;  %v427_v46 = vor.u32 %v499_v41, %v426_v40  ;;  %v402_v47 = vld [vmem:[#allocation2 + $0x60] sm:$0xf]  ;;  %v494_v48 = vld [vmem:[#allocation2 + $0x6c] sm:$0xf0]  ;;  %v492_v49 = vld [vmem:[#allocation2 + $0x64] sm:$0xf]  ;;  %v431_v50 = vor.u32 %v497_v42, %v428_v43 }
  0x11   :  { %276 = vmatpush.bf16.msra.mxu1 %v439_v33  ;;  %v404_v51 = vld [vmem:[#allocation2 + $0x70] sm:$0xf0]  ;;  %v410_v52 = vld [vmem:[#allocation2 + $0x68] sm:$0xf]  ;;  %v495_v53 = vld [vmem:[#allocation2 + $0x74] sm:$0xf0]  ;;  %v403_v56 = vor.u32 %v494_v48, %v402_v47 }
  0x12   :  { %295 = vmatpush.bf16.msra.mxu2 %v443_v34  ;;  %314 = vmatpush.bf16.msra.mxu3 %v447_v38  ;;  %v493_v54 = vld [vmem:[#allocation2 + $0x6c] sm:$0xf]  ;;  %v412_v55 = vld [vmem:[#allocation2 + $0x78] sm:$0xf0]  ;;  %v407_v57 = vor.u32 %v492_v49, %v404_v51  ;;  %v411_v58 = vor.u32 %v495_v53, %v410_v52  ;;  %v386_v59 = vld [vmem:[#allocation2 + $0x40] sm:$0xf] }
  0x13   :  { %v490_v60 = vld [vmem:[#allocation2 + $0x4c] sm:$0xf0]  ;;  %v488_v61 = vld [vmem:[#allocation2 + $0x44] sm:$0xf]  ;;  %v415_v62 = vor.u32 %v493_v54, %v412_v55  ;;  %v388_v63 = vld [vmem:[#allocation2 + $0x50] sm:$0xf0] }
  0x14   :  { %258 = vmatpush.bf16.msra.mxu0 %v419_v44  ;;  %v394_v0 = vld [vmem:[#allocation2 + $0x48] sm:$0xf]  ;;  %v491_v1 = vld [vmem:[#allocation2 + $0x54] sm:$0xf0]  ;;  %v489_v2 = vld [vmem:[#allocation2 + $0x4c] sm:$0xf]  ;;  %v387_v5 = vor.u32 %v490_v60, %v386_v59  ;;  %v391_v9 = vor.u32 %v488_v61, %v388_v63 }
  0x15   :  { %277 = vmatpush.bf16.msra.mxu1 %v423_v45  ;;  %v396_v3 = vld [vmem:[#allocation2 + $0x58] sm:$0xf0]  ;;  %v370_v4 = vld [vmem:[#allocation2 + $0x20] sm:$0xf]  ;;  %v486_v6 = vld [vmem:[#allocation2 + $0x2c] sm:$0xf0]  ;;  %v395_v10 = vor.u32 %v491_v1, %v394_v0 }
  0x16   :  { %296 = vmatpush.bf16.msra.mxu2 %v427_v46  ;;  %315 = vmatpush.bf16.msra.mxu3 %v431_v50  ;;  %v484_v7 = vld [vmem:[#allocation2 + $0x24] sm:$0xf]  ;;  %v372_v8 = vld [vmem:[#allocation2 + $0x30] sm:$0xf0]  ;;  %v378_v11 = vld [vmem:[#allocation2 + $0x28] sm:$0xf]  ;;  %v399_v14 = vor.u32 %v489_v2, %v396_v3  ;;  %v371_v21 = vor.u32 %v486_v6, %v370_v4 }
  0x17   :  { %v487_v12 = vld [vmem:[#allocation2 + $0x34] sm:$0xf0]  ;;  %v485_v13 = vld [vmem:[#allocation2 + $0x2c] sm:$0xf]  ;;  %v380_v15 = vld [vmem:[#allocation2 + $0x38] sm:$0xf0]  ;;  %v375_v22 = vor.u32 %v484_v7, %v372_v8 }
  0x18   :  { %259 = vmatpush.bf16.msra.mxu0 %v403_v56  ;;  %v513_v16 = vld [vmem:[%s619_s0] sm:$0xff]   ;;  %v379_v23 = vor.u32 %v487_v12, %v378_v11  ;;  %v482_v25 = vld [vmem:[#allocation2 + $0xc] sm:$0xf0]  ;;  %v383_v29 = vor.u32 %v485_v13, %v380_v15  ;;  %v356_v30 = vld [vmem:[#allocation2 + $0x10] sm:$0xf0] }
  0x19   :  { %278 = vmatpush.bf16.msra.mxu1 %v407_v57  ;;  %v514_v17 = vunpack.c.l.bf16 %v513_v16  ;;  %v515_v18 = vunpack.c.h.bf16 %v513_v16  ;;  %v524_v19 = vld [vmem:[%s620_s1] ss:$0 sm:$0xff]  ;;  %v480_v26 = vld [vmem:[#allocation2 + $0x4] sm:$0xf]  ;;  %v362_v31 = vld [vmem:[#allocation2 + $0x8] sm:$0xf] }
  0x1a   :  { %297 = vmatpush.bf16.msra.mxu2 %v411_v58  ;;  %316 = vmatpush.bf16.msra.mxu3 %v415_v62  ;;  %v525_v20 = vld [vmem:[%s621_s2] ss:$0 sm:$0xff]  ;;  %v483_v32 = vld [vmem:[#allocation2 + $0x14] sm:$0xf0]  ;;  %v481_v33 = vld [vmem:[#allocation2 + $0xc] sm:$0xf]  ;;  %v359_v39 = vor.u32 %v480_v26, %v356_v30 }
  0x1b   :  { %v354_v24 = vld [vmem:[#allocation2] sm:$0xf]  ;;  %v45_v27 = vmul.f32 %v524_v19, %v514_v17  ;;  %v46_v28 = vmul.f32 %v524_v19, %v515_v18  ;;  %v364_v34 = vld [vmem:[#allocation2 + $0x18] sm:$0xf0]  ;;  %v520_v38 = vld [vmem:[%s619_s0 + $0x8] sm:$0xff]   ;;  %v363_v40 = vor.u32 %v483_v32, %v362_v31 }
  0x1c   :  { %260 = vmatpush.bf16.msra.mxu0 %v387_v5  ;;  %v355_v37 = vor.u32 %v482_v25, %v354_v24  ;;  %v367_v43 = vor.u32 %v481_v33, %v364_v34  ;;  %v518_v45 = vunpack.c.l.bf16 %v520_v38  ;;  %v519_v46 = vunpack.c.h.bf16 %v520_v38 }
  0x1d   :  { %279 = vmatpush.bf16.msra.mxu1 %v391_v9  ;;  %v53_v35 = vadd.f32 %v525_v20, %v45_v27  ;;  %v54_v36 = vadd.f32 %v525_v20, %v46_v28 }
  0x1e   :  { %298 = vmatpush.bf16.msra.mxu2 %v395_v10  ;;  %317 = vmatpush.bf16.msra.mxu3 %v399_v14  ;;  %v47_v47 = vmul.f32 %v524_v19, %v518_v45  ;;  %v48_v48 = vmul.f32 %v524_v19, %v519_v46 }
  0x1f   :  { %v57_v41 = vmax.f32 %v53_v35, 0.0  ;;  %v58_v42 = vmax.f32 %v54_v36, 0.0 }
  0x20   :  { %261 = vmatpush.bf16.msra.mxu0 %v371_v21  ;;  %v55_v49 = vadd.f32 %v525_v20, %v47_v47  ;;  %v56_v50 = vadd.f32 %v525_v20, %v48_v48 }
  0x21   :  { %280 = vmatpush.bf16.msra.mxu1 %v375_v22  ;;  %v61_v44 = vpack.c.bf16 %v58_v42, %v57_v41 }
  0x22   :  { %299 = vmatpush.bf16.msra.mxu2 %v379_v23  ;;  %318 = vmatpush.bf16.msra.mxu3 %v383_v29  ;;  %v59_v51 = vmax.f32 %v55_v49, 0.0  ;;  %v60_v52 = vmax.f32 %v56_v50, 0.0 }
  0x24   :  { %262 = vmatpush.bf16.msra.mxu0 %v355_v37  ;;  %v62_v53 = vpack.c.bf16 %v60_v52, %v59_v51 }
  0x25   :  { %281 = vmatpush.bf16.msra.mxu1 %v359_v39 }
  0x26   :  { %300 = vmatpush.bf16.msra.mxu2 %v363_v40  ;;  %319 = vmatpush.bf16.msra.mxu3 %v367_v43 }
  0x27   :  { %263 = vmatmul.bf16.vlgmr.msra.gmra.mxu0 %v61_v44 }
  0x28   :  { %282 = vmatmul.bf16.vlgmr.msra.gmra.mxu1 %v61_v44 }
  0x29   :  { %301 = vmatmul.bf16.vlgmr.msra.gmra.mxu2 %v61_v44  ;;  %320 = vmatmul.bf16.vlgmr.msra.gmra.mxu3 %v61_v44 }
  0x37   :  { %268 = vmatmul.bf16.gmra.mxu0 %v62_v53 }
  0x38   :  { %287 = vmatmul.bf16.gmra.mxu1 %v62_v53 }
  0x39   :  { %306 = vmatmul.bf16.gmra.mxu2 %v62_v53  ;;  %325 = vmatmul.bf16.gmra.mxu3 %v62_v53 }
  0xa4   :  { %v264_v54 = vpop.f32.mrf.mxu0 }
  0xa5   :  { %v283_v55 = vpop.f32.mrf.mxu1 }
  0xa6   :  { %v331_v56 = vpack.c.bf16 %v283_v55, %v264_v54 }
  0xa8   :  { %339 = vst [vmem:[%s623_s4] sm:$0xff] %v331_v56 }
  0xac   :  { %v302_v57 = vpop.f32.mrf.mxu2  ;;  %v321_v58 = vpop.f32.mrf.mxu3 }
  0xad   :  { %v266_v59 = vpop.f32.mrf.mxu0  ;;  %v332_v60 = vpack.c.bf16 %v321_v58, %v302_v57  ;;  %v285_v61 = vpop.f32.mrf.mxu1 }
  0xae   :  { %v333_v62 = vpack.c.bf16 %v285_v61, %v266_v59 }
  0xaf   :  { %340 = vst [vmem:[%s623_s4 + $0x8] sm:$0xff] %v332_v60 }
  0xb0   :  { %341 = vst [vmem:[%s623_s4 + $0x10] sm:$0xff] %v333_v62 }
  0xb4   :  { %v304_v63 = vpop.f32.mrf.mxu2  ;;  %v323_v0 = vpop.f32.mrf.mxu3 }
  0xb5   :  { %v269_v1 = vpop.f32.mrf.mxu0  ;;  %v334_v2 = vpack.c.bf16 %v323_v0, %v304_v63  ;;  %v288_v3 = vpop.f32.mrf.mxu1 }
  0xb6   :  { %v335_v4 = vpack.c.bf16 %v288_v3, %v269_v1 }
  0xb7   :  { %342 = vst [vmem:[%s623_s4 + $0x18] sm:$0xff] %v334_v2 }
  0xb8   :  { %343 = vst [vmem:[%s623_s4 + $0x20] sm:$0xff] %v335_v4 }
  0xbc   :  { %v307_v5 = vpop.f32.mrf.mxu2  ;;  %v326_v6 = vpop.f32.mrf.mxu3 }
  0xbd   :  { %v271_v7 = vpop.f32.mrf.mxu0  ;;  %v336_v8 = vpack.c.bf16 %v326_v6, %v307_v5  ;;  %v290_v9 = vpop.f32.mrf.mxu1 }
  0xbe   :  { %v337_v10 = vpack.c.bf16 %v290_v9, %v271_v7 }
  0xbf   :  { %344 = vst [vmem:[%s623_s4 + $0x28] sm:$0xff] %v336_v8 }
  0xc0   :  { %345 = vst [vmem:[%s623_s4 + $0x30] sm:$0xff] %v337_v10 }
  0xc4   :  { %v309_v11 = vpop.f32.mrf.mxu2  ;;  %v328_v12 = vpop.f32.mrf.mxu3 }
  0xc5   :  { %v338_v13 = vpack.c.bf16 %v328_v12, %v309_v11 }
  0xc7   :  { %346 = vst [vmem:[%s623_s4 + $0x38] sm:$0xff] %v338_v13 }
  0xc8   :  { %351 = vsyncpa [#allocation3], 1 }

// kernel: generator_forward.13
= control target key start
LH: loop header
LB: loop body
LE: loop exit
PB: predicated region body
PF: predicated region fallthrough
CT: control target
= control target key end

     0   :  { %s194_s0 = inlined_call_operand.vmem [shape: bf16[128,128], index: 0, kind: input, shape index: {}]   ;;  %s195_s1 = inlined_call_operand.vmem [shape: f32[1,1,128], index: 1, kind: output, shape index: {0}]   ;;  %s196_s2 = inlined_call_operand.vmem [shape: f32[1,1,128], index: 2, kind: output, shape index: {1}]  }
   0x1   :  { %v111_v0 = vld [vmem:[%s194_s0] sm:$0xff]   ;;  %v142_v1 = vld [vmem:[%s194_s0 + $0x8] sm:$0xff]   ;;  %v143_v5 = vld [vmem:[%s194_s0 + $0x10] sm:$0xff]  }
   0x2   :  { %v112_v2 = vunpack.c.l.bf16 %v111_v0  ;;  %v113_v3 = vunpack.c.h.bf16 %v111_v0  ;;  %v116_v4 = vunpack.c.l.bf16 %v142_v1  ;;  %v117_v6 = vunpack.c.h.bf16 %v142_v1  ;;  %v144_v13 = vld [vmem:[%s194_s0 + $0x18] sm:$0xff]   ;;  %v145_v22 = vld [vmem:[%s194_s0 + $0x20] sm:$0xff]   ;;  %v146_v31 = vld [vmem:[%s194_s0 + $0x28] sm:$0xff]  }
   0x3   :  { %v120_v10 = vunpack.c.l.bf16 %v143_v5  ;;  %v121_v14 = vunpack.c.h.bf16 %v143_v5  ;;  %v124_v18 = vunpack.c.l.bf16 %v144_v13  ;;  %v125_v23 = vunpack.c.h.bf16 %v144_v13  ;;  %v147_v40 = vld [vmem:[%s194_s0 + $0x30] sm:$0xff]   ;;  %v148_v49 = vld [vmem:[%s194_s0 + $0x38] sm:$0xff]  }
   0x4   :  { %v42_v7 = vadd.f32 %v113_v3, %v112_v2  ;;  %v64_v8 = vmul.f32 %v112_v2, %v112_v2  ;;  %v65_v9 = vmul.f32 %v113_v3, %v113_v3  ;;  %v66_v12 = vmul.f32 %v116_v4, %v116_v4 }
   0x5   :  { %v67_v16 = vmul.f32 %v117_v6, %v117_v6  ;;  %v68_v20 = vmul.f32 %v120_v10, %v120_v10  ;;  %v69_v25 = vmul.f32 %v121_v14, %v121_v14  ;;  %v128_v27 = vunpack.c.l.bf16 %v145_v22 }
   0x6   :  { %v43_v11 = vadd.f32 %v116_v4, %v42_v7  ;;  %v80_v17 = vadd.f32 %v65_v9, %v64_v8  ;;  %v70_v29 = vmul.f32 %v124_v18, %v124_v18  ;;  %v129_v32 = vunpack.c.h.bf16 %v145_v22 }
   0x7   :  { %v71_v34 = vmul.f32 %v125_v23, %v125_v23  ;;  %v132_v36 = vunpack.c.l.bf16 %v146_v31  ;;  %v72_v38 = vmul.f32 %v128_v27, %v128_v27  ;;  %v133_v41 = vunpack.c.h.bf16 %v146_v31 }
   0x8   :  { %v44_v15 = vadd.f32 %v117_v6, %v43_v11  ;;  %v81_v21 = vadd.f32 %v80_v17, %v66_v12  ;;  %v73_v43 = vmul.f32 %v129_v32, %v129_v32  ;;  %v136_v45 = vunpack.c.l.bf16 %v147_v40 }
   0x9   :  { %v74_v47 = vmul.f32 %v132_v36, %v132_v36  ;;  %v137_v50 = vunpack.c.h.bf16 %v147_v40  ;;  %v75_v52 = vmul.f32 %v133_v41, %v133_v41  ;;  %v140_v54 = vunpack.c.l.bf16 %v148_v49 }
   0xa   :  { %v45_v19 = vadd.f32 %v120_v10, %v44_v15  ;;  %v82_v26 = vadd.f32 %v81_v21, %v67_v16  ;;  %v76_v56 = vmul.f32 %v136_v45, %v136_v45  ;;  %v141_v58 = vunpack.c.h.bf16 %v148_v49 }
   0xb   :  { %v77_v60 = vmul.f32 %v137_v50, %v137_v50  ;;  %v78_v63 = vmul.f32 %v140_v54, %v140_v54 }
   0xc   :  { %v46_v24 = vadd.f32 %v121_v14, %v45_v19  ;;  %v83_v30 = vadd.f32 %v82_v26, %v68_v20  ;;  %v79_v2 = vmul.f32 %v141_v58, %v141_v58 }
   0xe   :  { %v47_v28 = vadd.f32 %v124_v18, %v46_v24  ;;  %v84_v35 = vadd.f32 %v83_v30, %v69_v25 }
  0x10   :  { %v48_v33 = vadd.f32 %v125_v23, %v47_v28  ;;  %v85_v39 = vadd.f32 %v84_v35, %v70_v29 }
  0x12   :  { %v49_v37 = vadd.f32 %v128_v27, %v48_v33  ;;  %v86_v44 = vadd.f32 %v85_v39, %v71_v34 }
  0x14   :  { %v50_v42 = vadd.f32 %v129_v32, %v49_v37  ;;  %v87_v48 = vadd.f32 %v86_v44, %v72_v38 }
  0x16   :  { %v51_v46 = vadd.f32 %v132_v36, %v50_v42  ;;  %v88_v53 = vadd.f32 %v87_v48, %v73_v43 }
  0x18   :  { %v52_v51 = vadd.f32 %v133_v41, %v51_v46  ;;  %v89_v57 = vadd.f32 %v88_v53, %v74_v47 }
  0x1a   :  { %v53_v55 = vadd.f32 %v136_v45, %v52_v51  ;;  %v90_v61 = vadd.f32 %v89_v57, %v75_v52 }
  0x1c   :  { %v54_v59 = vadd.f32 %v137_v50, %v53_v55  ;;  %v91_v0 = vadd.f32 %v90_v61, %v76_v56 }
  0x1e   :  { %v55_v62 = vadd.f32 %v140_v54, %v54_v59  ;;  %v92_v3 = vadd.f32 %v91_v0, %v77_v60 }
  0x20   :  { %v56_v1 = vadd.f32 %v141_v58, %v55_v62  ;;  %v93_v5 = vadd.f32 %v92_v3, %v78_v63 }
  0x22   :  { %v57_v4 = vrot.slane %v56_v1, 4  ;;  %v94_v7 = vadd.f32 %v93_v5, %v79_v2 }
  0x24   :  { %v58_v6 = vadd.f32 %v57_v4, %v56_v1  ;;  %v95_v9 = vrot.slane %v94_v7, 4 }
  0x26   :  { %v59_v8 = vrot.slane %v58_v6, 2  ;;  %v96_v11 = vadd.f32 %v95_v9, %v94_v7 }
  0x28   :  { %v60_v10 = vadd.f32 %v59_v8, %v58_v6  ;;  %v97_v13 = vrot.slane %v96_v11, 2 }
  0x2a   :  { %v61_v12 = vrot.slane %v60_v10, 1  ;;  %v98_v15 = vadd.f32 %v97_v13, %v96_v11 }
  0x2c   :  { %v62_v14 = vadd.f32 %v61_v12, %v60_v10  ;;  %v99_v16 = vrot.slane %v98_v15, 1 }
  0x2e   :  { %63 = vst [vmem:[%s195_s1] sm:$0x1] %v62_v14  ;;  %v100_v17 = vadd.f32 %v99_v16, %v98_v15 }
  0x30   :  { %101 = vst [vmem:[%s196_s2] sm:$0x1] %v100_v17 }

// kernel: generator_forward.14
= control target key start
LH: loop header
LB: loop body
LE: loop exit
PB: predicated region body
PF: predicated region fallthrough
CT: control target
= control target key end

     0   :  { %s715_s3 = inlined_call_operand.vmem [shape: bf16[128,256], index: 3, kind: input, shape index: {}]   ;;  %s716_s0 = inlined_call_operand.vmem [shape: bf16[128,128], index: 0, kind: input, shape index: {}]   ;;  %s717_s1 = inlined_call_operand.vmem [shape: f32[1,128], index: 1, kind: input, shape index: {}]   ;;  %s718_s2 = inlined_call_operand.vmem [shape: f32[1,128], index: 2, kind: input, shape index: {}]   ;;  %s719_s4 = inlined_call_operand.vmem [shape: bf16[128,256], index: 4, kind: output, shape index: {}]  }
   0x1   :  { %v401_v0 = vld [vmem:[%s715_s3 + $0x70] sm:$0xf]  ;;  %v422_v1 = vld [vmem:[%s715_s3 + $0x74] sm:$0xf0]  ;;  %v421_v2 = vld [vmem:[%s715_s3 + $0x74] sm:$0xf] }
   0x2   :  { %v402_v3 = vor.u32 %v422_v1, %v401_v0  ;;  %v403_v4 = vld [vmem:[%s715_s3 + $0x78] sm:$0xf0]  ;;  %v393_v5 = vld [vmem:[%s715_s3 + $0x60] sm:$0xf]  ;;  %v420_v6 = vld [vmem:[%s715_s3 + $0x64] sm:$0xf0] }
   0x3   :  { %v406_v7 = vor.u32 %v421_v2, %v403_v4  ;;  %v419_v8 = vld [vmem:[%s715_s3 + $0x64] sm:$0xf]  ;;  %v395_v9 = vld [vmem:[%s715_s3 + $0x68] sm:$0xf0]  ;;  %v394_v10 = vor.u32 %v420_v6, %v393_v5  ;;  %v385_v12 = vld [vmem:[%s715_s3 + $0x50] sm:$0xf] }
   0x4   :  { %209 = vmatpush.bf16.msra.mxu0 %v402_v3  ;;  %462 = vmatpush.bf16.msra.mxu2 %v402_v3  ;;  %v398_v11 = vor.u32 %v419_v8, %v395_v9  ;;  %v418_v13 = vld [vmem:[%s715_s3 + $0x54] sm:$0xf0]  ;;  %v417_v14 = vld [vmem:[%s715_s3 + $0x54] sm:$0xf]  ;;  %v387_v15 = vld [vmem:[%s715_s3 + $0x58] sm:$0xf0] }
   0x5   :  { %258 = vmatpush.bf16.msra.mxu1 %v406_v7  ;;  %470 = vmatpush.bf16.msra.mxu3 %v406_v7  ;;  %v386_v16 = vor.u32 %v418_v13, %v385_v12  ;;  %v390_v17 = vor.u32 %v417_v14, %v387_v15  ;;  %v377_v18 = vld [vmem:[%s715_s3 + $0x40] sm:$0xf]  ;;  %v416_v19 = vld [vmem:[%s715_s3 + $0x44] sm:$0xf0]  ;;  %v415_v20 = vld [vmem:[%s715_s3 + $0x44] sm:$0xf] }
   0x6   :  { %v379_v21 = vld [vmem:[%s715_s3 + $0x48] sm:$0xf0]  ;;  %v378_v22 = vor.u32 %v416_v19, %v377_v18  ;;  %v424_v23 = vld [vmem:[%s716_s0] sm:$0xff]   ;;  %v369_v25 = vld [vmem:[%s715_s3 + $0x30] sm:$0xf] }
   0x7   :  { %v382_v24 = vor.u32 %v415_v20, %v379_v21  ;;  %v414_v26 = vld [vmem:[%s715_s3 + $0x34] sm:$0xf0]  ;;  %v458_v27 = vld [vmem:[%s716_s0 + $0x20] sm:$0xff]   ;;  %v413_v28 = vld [vmem:[%s715_s3 + $0x34] sm:$0xf]  ;;  %v425_v30 = vunpack.c.l.bf16 %v424_v23  ;;  %v426_v31 = vunpack.c.h.bf16 %v424_v23 }
   0x8   :  { %210 = vmatpush.bf16.msra.mxu0 %v394_v10  ;;  %463 = vmatpush.bf16.msra.mxu2 %v394_v10  ;;  %v371_v29 = vld [vmem:[%s715_s3 + $0x38] sm:$0xf0]  ;;  %v574_v32 = vld [vmem:[%s717_s1] ss:$0 sm:$0xff]  ;;  %v441_v33 = vunpack.c.l.bf16 %v458_v27  ;;  %v442_v34 = vunpack.c.h.bf16 %v458_v27  ;;  %v370_v35 = vor.u32 %v414_v26, %v369_v25  ;;  %v412_v38 = vld [vmem:[%s715_s3 + $0x24] sm:$0xf0] }
   0x9   :  { %259 = vmatpush.bf16.msra.mxu1 %v398_v11  ;;  %471 = vmatpush.bf16.msra.mxu3 %v398_v11  ;;  %v374_v36 = vor.u32 %v413_v28, %v371_v29  ;;  %v361_v37 = vld [vmem:[%s715_s3 + $0x20] sm:$0xf]  ;;  %v411_v39 = vld [vmem:[%s715_s3 + $0x24] sm:$0xf]  ;;  %v363_v40 = vld [vmem:[%s715_s3 + $0x28] sm:$0xf0]  ;;  %v53_v41 = vmul.f32 %v574_v32, %v425_v30  ;;  %v54_v42 = vmul.f32 %v574_v32, %v426_v31 }
   0xa   :  { %v593_v43 = vld [vmem:[%s718_s2] ss:$0 sm:$0xff]  ;;  %v61_v44 = vmul.f32 %v574_v32, %v441_v33  ;;  %v62_v45 = vmul.f32 %v574_v32, %v442_v34  ;;  %v362_v46 = vor.u32 %v412_v38, %v361_v37  ;;  %v366_v47 = vor.u32 %v411_v39, %v363_v40  ;;  %v353_v48 = vld [vmem:[%s715_s3 + $0x10] sm:$0xf]  ;;  %v410_v49 = vld [vmem:[%s715_s3 + $0x14] sm:$0xf0] }
   0xb   :  { %v409_v50 = vld [vmem:[%s715_s3 + $0x14] sm:$0xf]  ;;  %v355_v51 = vld [vmem:[%s715_s3 + $0x18] sm:$0xf0]  ;;  %v73_v52 = vadd.f32 %v593_v43, %v53_v41  ;;  %v74_v53 = vadd.f32 %v593_v43, %v54_v42  ;;  %v354_v56 = vor.u32 %v410_v49, %v353_v48  ;;  %v345_v58 = vld [vmem:[%s715_s3] sm:$0xf] }
   0xc   :  { %211 = vmatpush.bf16.msra.mxu0 %v386_v16  ;;  %464 = vmatpush.bf16.msra.mxu2 %v386_v16  ;;  %v81_v54 = vadd.f32 %v593_v43, %v61_v44  ;;  %v82_v55 = vadd.f32 %v593_v43, %v62_v45  ;;  %v358_v57 = vor.u32 %v409_v50, %v355_v51  ;;  %v408_v59 = vld [vmem:[%s715_s3 + $0x4] sm:$0xf0]  ;;  %v407_v60 = vld [vmem:[%s715_s3 + $0x4] sm:$0xf]  ;;  %v347_v61 = vld [vmem:[%s715_s3 + $0x8] sm:$0xf0] }
   0xd   :  { %260 = vmatpush.bf16.msra.mxu1 %v390_v17  ;;  %472 = vmatpush.bf16.msra.mxu3 %v390_v17  ;;  %v89_v62 = vmax.f32 %v73_v52, 0.0  ;;  %v90_v63 = vmax.f32 %v74_v53, 0.0  ;;  %v455_v2 = vld [vmem:[%s716_s0 + $0x8] sm:$0xff]   ;;  %v346_v3 = vor.u32 %v408_v59, %v345_v58  ;;  %v350_v5 = vor.u32 %v407_v60, %v347_v61  ;;  %v460_v25 = vld [vmem:[%s716_s0 + $0x30] sm:$0xff]  }
   0xe   :  { %v97_v0 = vmax.f32 %v81_v54, 0.0  ;;  %v98_v1 = vmax.f32 %v82_v55, 0.0  ;;  %v459_v4 = vld [vmem:[%s716_s0 + $0x28] sm:$0xff]   ;;  %v429_v6 = vunpack.c.l.bf16 %v455_v2  ;;  %v430_v7 = vunpack.c.h.bf16 %v455_v2 }
   0xf   :  { %v105_v8 = vpack.c.bf16 %v90_v63, %v89_v62  ;;  %v445_v10 = vunpack.c.l.bf16 %v459_v4  ;;  %v446_v11 = vunpack.c.h.bf16 %v459_v4  ;;  %v449_v30 = vunpack.c.l.bf16 %v460_v25 }
  0x10   :  { %212 = vmatpush.bf16.msra.mxu0 %v378_v22  ;;  %465 = vmatpush.bf16.msra.mxu2 %v378_v22  ;;  %v109_v9 = vpack.c.bf16 %v98_v1, %v97_v0  ;;  %v55_v12 = vmul.f32 %v574_v32, %v429_v6  ;;  %v56_v13 = vmul.f32 %v574_v32, %v430_v7  ;;  %v450_v31 = vunpack.c.h.bf16 %v460_v25 }
  0x11   :  { %261 = vmatpush.bf16.msra.mxu1 %v382_v24  ;;  %473 = vmatpush.bf16.msra.mxu3 %v382_v24  ;;  %v63_v14 = vmul.f32 %v574_v32, %v445_v10  ;;  %v64_v15 = vmul.f32 %v574_v32, %v446_v11  ;;  %v456_v24 = vld [vmem:[%s716_s0 + $0x10] sm:$0xff]  }
  0x12   :  { %v75_v16 = vadd.f32 %v593_v43, %v55_v12  ;;  %v76_v17 = vadd.f32 %v593_v43, %v56_v13  ;;  %v433_v26 = vunpack.c.l.bf16 %v456_v24  ;;  %v434_v27 = vunpack.c.h.bf16 %v456_v24 }
  0x13   :  { %v83_v18 = vadd.f32 %v593_v43, %v63_v14  ;;  %v84_v19 = vadd.f32 %v593_v43, %v64_v15 }
  0x14   :  { %213 = vmatpush.bf16.msra.mxu0 %v370_v35  ;;  %466 = vmatpush.bf16.msra.mxu2 %v370_v35  ;;  %v91_v20 = vmax.f32 %v75_v16, 0.0  ;;  %v92_v21 = vmax.f32 %v76_v17, 0.0  ;;  %v57_v33 = vmul.f32 %v574_v32, %v433_v26  ;;  %v58_v34 = vmul.f32 %v574_v32, %v434_v27 }
  0x15   :  { %262 = vmatpush.bf16.msra.mxu1 %v374_v36  ;;  %474 = vmatpush.bf16.msra.mxu3 %v374_v36  ;;  %v99_v22 = vmax.f32 %v83_v18, 0.0  ;;  %v100_v23 = vmax.f32 %v84_v19, 0.0  ;;  %v65_v35 = vmul.f32 %v574_v32, %v449_v30  ;;  %v66_v36 = vmul.f32 %v574_v32, %v450_v31 }
  0x16   :  { %v106_v28 = vpack.c.bf16 %v92_v21, %v91_v20  ;;  %v77_v37 = vadd.f32 %v593_v43, %v57_v33  ;;  %v78_v38 = vadd.f32 %v593_v43, %v58_v34 }
  0x17   :  { %v110_v29 = vpack.c.bf16 %v100_v23, %v99_v22  ;;  %v85_v39 = vadd.f32 %v593_v43, %v65_v35  ;;  %v86_v40 = vadd.f32 %v593_v43, %v66_v36 }
  0x18   :  { %214 = vmatpush.bf16.msra.mxu0 %v362_v46  ;;  %467 = vmatpush.bf16.msra.mxu2 %v362_v46  ;;  %v93_v41 = vmax.f32 %v77_v37, 0.0  ;;  %v94_v42 = vmax.f32 %v78_v38, 0.0  ;;  %v457_v46 = vld [vmem:[%s716_s0 + $0x18] sm:$0xff]  }
  0x19   :  { %263 = vmatpush.bf16.msra.mxu1 %v366_v47  ;;  %475 = vmatpush.bf16.msra.mxu3 %v366_v47  ;;  %v101_v44 = vmax.f32 %v85_v39, 0.0  ;;  %v102_v45 = vmax.f32 %v86_v40, 0.0  ;;  %v461_v47 = vld [vmem:[%s716_s0 + $0x38] sm:$0xff]   ;;  %v437_v49 = vunpack.c.l.bf16 %v457_v46  ;;  %v438_v51 = vunpack.c.h.bf16 %v457_v46 }
  0x1a   :  { %v107_v48 = vpack.c.bf16 %v94_v42, %v93_v41  ;;  %v453_v52 = vunpack.c.l.bf16 %v461_v47  ;;  %v454_v53 = vunpack.c.h.bf16 %v461_v47 }
  0x1b   :  { %v111_v50 = vpack.c.bf16 %v102_v45, %v101_v44  ;;  %v59_v54 = vmul.f32 %v574_v32, %v437_v49  ;;  %v60_v55 = vmul.f32 %v574_v32, %v438_v51 }
  0x1c   :  { %215 = vmatpush.bf16.msra.mxu0 %v354_v56  ;;  %468 = vmatpush.bf16.msra.mxu2 %v354_v56  ;;  %v67_v56 = vmul.f32 %v574_v32, %v453_v52 }
  0x1d   :  { %264 = vmatpush.bf16.msra.mxu1 %v358_v57  ;;  %476 = vmatpush.bf16.msra.mxu3 %v358_v57  ;;  %v68_v57 = vmul.f32 %v574_v32, %v454_v53  ;;  %v79_v58 = vadd.f32 %v593_v43, %v59_v54  ;;  %v80_v59 = vadd.f32 %v593_v43, %v60_v55 }
  0x1e   :  { %v87_v60 = vadd.f32 %v593_v43, %v67_v56 }
  0x1f   :  { %v88_v61 = vadd.f32 %v593_v43, %v68_v57  ;;  %v95_v62 = vmax.f32 %v79_v58, 0.0  ;;  %v96_v63 = vmax.f32 %v80_v59, 0.0 }
  0x20   :  { %216 = vmatpush.bf16.msra.mxu0 %v346_v3  ;;  %469 = vmatpush.bf16.msra.mxu2 %v346_v3  ;;  %v103_v0 = vmax.f32 %v87_v60, 0.0 }
  0x21   :  { %265 = vmatpush.bf16.msra.mxu1 %v350_v5  ;;  %477 = vmatpush.bf16.msra.mxu3 %v350_v5  ;;  %v104_v1 = vmax.f32 %v88_v61, 0.0  ;;  %v108_v2 = vpack.c.bf16 %v96_v63, %v95_v62 }
  0x23   :  { %217 = vmatmul.bf16.vlgmr.msra.gmra.mxu0 %v105_v8  ;;  %237 = vmatmul.bf16.vlgmr.msra.gmra.mxu2 %v109_v9  ;;  %v112_v3 = vpack.c.bf16 %v104_v1, %v103_v0 }
  0x24   :  { %266 = vmatmul.bf16.vlgmr.msra.gmra.mxu1 %v105_v8  ;;  %286 = vmatmul.bf16.vlgmr.msra.gmra.mxu3 %v109_v9 }
  0x33   :  { %222 = vmatmul.bf16.gmra.mxu0 %v106_v28  ;;  %242 = vmatmul.bf16.gmra.mxu2 %v110_v29 }
  0x34   :  { %271 = vmatmul.bf16.gmra.mxu1 %v106_v28  ;;  %291 = vmatmul.bf16.gmra.mxu3 %v110_v29 }
  0x43   :  { %227 = vmatmul.bf16.gmra.mxu0 %v107_v48  ;;  %247 = vmatmul.bf16.gmra.mxu2 %v111_v50 }
  0x44   :  { %276 = vmatmul.bf16.gmra.mxu1 %v107_v48  ;;  %296 = vmatmul.bf16.gmra.mxu3 %v111_v50 }
  0x53   :  { %232 = vmatmul.bf16.gmra.mxu0 %v108_v2  ;;  %252 = vmatmul.bf16.gmra.mxu2 %v112_v3 }
  0x54   :  { %281 = vmatmul.bf16.gmra.mxu1 %v108_v2  ;;  %301 = vmatmul.bf16.gmra.mxu3 %v112_v3 }
  0xa0   :  { %v218_v32 = vpop.f32.mrf.mxu0 }
  0xa1   :  { %v267_v4 = vpop.f32.mrf.mxu1 }
  0xa2   :  { %v307_v5 = vpack.c.bf16 %v267_v4, %v218_v32 }
  0xa4   :  { %323 = vst [vmem:[%s719_s4] sm:$0xff] %v307_v5 }
  0xa6   :  { %v238_v6 = vpop.f32.mrf.mxu2 }
  0xa7   :  { %v287_v7 = vpop.f32.mrf.mxu3 }
  0xa8   :  { %v315_v43 = vpack.c.bf16 %v287_v7, %v238_v6  ;;  %v220_v8 = vpop.f32.mrf.mxu0 }
  0xa9   :  { %v269_v9 = vpop.f32.mrf.mxu1 }
  0xaa   :  { %331 = vst [vmem:[%s719_s4 + $0x40] sm:$0xff] %v315_v43  ;;  %v308_v10 = vpack.c.bf16 %v269_v9, %v220_v8 }
  0xac   :  { %324 = vst [vmem:[%s719_s4 + $0x8] sm:$0xff] %v308_v10 }
  0xae   :  { %v240_v11 = vpop.f32.mrf.mxu2 }
  0xaf   :  { %v289_v12 = vpop.f32.mrf.mxu3 }
  0xb0   :  { %v316_v13 = vpack.c.bf16 %v289_v12, %v240_v11  ;;  %v223_v14 = vpop.f32.mrf.mxu0 }
  0xb1   :  { %v272_v15 = vpop.f32.mrf.mxu1 }
  0xb2   :  { %332 = vst [vmem:[%s719_s4 + $0x48] sm:$0xff] %v316_v13  ;;  %v309_v16 = vpack.c.bf16 %v272_v15, %v223_v14 }
  0xb4   :  { %325 = vst [vmem:[%s719_s4 + $0x10] sm:$0xff] %v309_v16 }
  0xb6   :  { %v243_v17 = vpop.f32.mrf.mxu2 }
  0xb7   :  { %v292_v18 = vpop.f32.mrf.mxu3 }
  0xb8   :  { %v317_v19 = vpack.c.bf16 %v292_v18, %v243_v17  ;;  %v225_v20 = vpop.f32.mrf.mxu0 }
  0xb9   :  { %v274_v21 = vpop.f32.mrf.mxu1 }
  0xba   :  { %333 = vst [vmem:[%s719_s4 + $0x50] sm:$0xff] %v317_v19  ;;  %v310_v22 = vpack.c.bf16 %v274_v21, %v225_v20 }
  0xbc   :  { %326 = vst [vmem:[%s719_s4 + $0x18] sm:$0xff] %v310_v22 }
  0xbe   :  { %v245_v23 = vpop.f32.mrf.mxu2 }
  0xbf   :  { %v294_v24 = vpop.f32.mrf.mxu3 }
  0xc0   :  { %v318_v25 = vpack.c.bf16 %v294_v24, %v245_v23  ;;  %v228_v26 = vpop.f32.mrf.mxu0 }
  0xc1   :  { %v277_v27 = vpop.f32.mrf.mxu1 }
  0xc2   :  { %334 = vst [vmem:[%s719_s4 + $0x58] sm:$0xff] %v318_v25  ;;  %v311_v28 = vpack.c.bf16 %v277_v27, %v228_v26 }
  0xc4   :  { %327 = vst [vmem:[%s719_s4 + $0x20] sm:$0xff] %v311_v28 }
  0xc6   :  { %v248_v29 = vpop.f32.mrf.mxu2 }
  0xc7   :  { %v297_v30 = vpop.f32.mrf.mxu3 }
  0xc8   :  { %v319_v31 = vpack.c.bf16 %v297_v30, %v248_v29  ;;  %v230_v33 = vpop.f32.mrf.mxu0 }
  0xc9   :  { %v279_v34 = vpop.f32.mrf.mxu1 }
  0xca   :  { %335 = vst [vmem:[%s719_s4 + $0x60] sm:$0xff] %v319_v31  ;;  %v312_v35 = vpack.c.bf16 %v279_v34, %v230_v33 }
  0xcc   :  { %328 = vst [vmem:[%s719_s4 + $0x28] sm:$0xff] %v312_v35 }
  0xce   :  { %v250_v36 = vpop.f32.mrf.mxu2 }
  0xcf   :  { %v299_v37 = vpop.f32.mrf.mxu3 }
  0xd0   :  { %v320_v38 = vpack.c.bf16 %v299_v37, %v250_v36  ;;  %v233_v39 = vpop.f32.mrf.mxu0 }
  0xd1   :  { %v282_v40 = vpop.f32.mrf.mxu1 }
  0xd2   :  { %336 = vst [vmem:[%s719_s4 + $0x68] sm:$0xff] %v320_v38  ;;  %v313_v41 = vpack.c.bf16 %v282_v40, %v233_v39 }
  0xd4   :  { %329 = vst [vmem:[%s719_s4 + $0x30] sm:$0xff] %v313_v41 }
  0xd6   :  { %v253_v42 = vpop.f32.mrf.mxu2 }
  0xd7   :  { %v302_v44 = vpop.f32.mrf.mxu3 }
  0xd8   :  { %v321_v45 = vpack.c.bf16 %v302_v44, %v253_v42  ;;  %v235_v46 = vpop.f32.mrf.mxu0 }
  0xd9   :  { %v284_v47 = vpop.f32.mrf.mxu1 }
  0xda   :  { %337 = vst [vmem:[%s719_s4 + $0x70] sm:$0xff] %v321_v45  ;;  %v314_v48 = vpack.c.bf16 %v284_v47, %v235_v46 }
  0xdc   :  { %330 = vst [vmem:[%s719_s4 + $0x38] sm:$0xff] %v314_v48 }
  0xde   :  { %v255_v49 = vpop.f32.mrf.mxu2 }
  0xdf   :  { %v304_v50 = vpop.f32.mrf.mxu3 }
  0xe0   :  { %v322_v51 = vpack.c.bf16 %v304_v50, %v255_v49 }
  0xe2   :  { %338 = vst [vmem:[%s719_s4 + $0x78] sm:$0xff] %v322_v51 }

// kernel: generator_forward.15
= control target key start
LH: loop header
LB: loop body
LE: loop exit
PB: predicated region body
PF: predicated region fallthrough
CT: control target
= control target key end

     0   :  { %s626_s0 = inlined_call_operand.vmem [shape: bf16[512,128], index: 0, kind: input, shape index: {}]   ;;  %s627_s1 = inlined_call_operand.vmem [shape: f32[1,1,128], index: 1, kind: output, shape index: {0}]   ;;  %s628_s2 = inlined_call_operand.vmem [shape: f32[1,1,128], index: 2, kind: output, shape index: {1}]  }
   0x1   :  { %v351_v0 = vld [vmem:[%s626_s0] sm:$0xff]   ;;  %v478_v1 = vld [vmem:[%s626_s0 + $0x8] sm:$0xff]   ;;  %v479_v5 = vld [vmem:[%s626_s0 + $0x10] sm:$0xff]  }
   0x2   :  { %v352_v2 = vunpack.c.l.bf16 %v351_v0  ;;  %v353_v3 = vunpack.c.h.bf16 %v351_v0  ;;  %v356_v4 = vunpack.c.l.bf16 %v478_v1  ;;  %v357_v7 = vunpack.c.h.bf16 %v478_v1  ;;  %v480_v13 = vld [vmem:[%s626_s0 + $0x18] sm:$0xff]   ;;  %v481_v22 = vld [vmem:[%s626_s0 + $0x20] sm:$0xff]   ;;  %v482_v31 = vld [vmem:[%s626_s0 + $0x28] sm:$0xff]  }
   0x3   :  { %v360_v11 = vunpack.c.l.bf16 %v479_v5  ;;  %v361_v15 = vunpack.c.h.bf16 %v479_v5  ;;  %v364_v19 = vunpack.c.l.bf16 %v480_v13  ;;  %v365_v24 = vunpack.c.h.bf16 %v480_v13  ;;  %v483_v40 = vld [vmem:[%s626_s0 + $0x30] sm:$0xff]   ;;  %v484_v49 = vld [vmem:[%s626_s0 + $0x38] sm:$0xff]   ;;  %v485_v58 = vld [vmem:[%s626_s0 + $0x40] sm:$0xff]  }
   0x4   :  { %v138_v6 = vadd.f32 %v353_v3, %v352_v2  ;;  %v208_v8 = vmul.f32 %v352_v2, %v352_v2  ;;  %v209_v9 = vmul.f32 %v353_v3, %v353_v3  ;;  %v210_v12 = vmul.f32 %v356_v4, %v356_v4  ;;  %v486_v3 = vld [vmem:[%s626_s0 + $0x48] sm:$0xff]  }
   0x5   :  { %v211_v16 = vmul.f32 %v357_v7, %v357_v7  ;;  %v212_v20 = vmul.f32 %v360_v11, %v360_v11  ;;  %v213_v25 = vmul.f32 %v361_v15, %v361_v15  ;;  %v368_v28 = vunpack.c.l.bf16 %v481_v22 }
   0x6   :  { %v139_v10 = vadd.f32 %v356_v4, %v138_v6  ;;  %v272_v17 = vadd.f32 %v209_v9, %v208_v8  ;;  %v214_v29 = vmul.f32 %v364_v19, %v364_v19  ;;  %v369_v33 = vunpack.c.h.bf16 %v481_v22 }
   0x7   :  { %v215_v34 = vmul.f32 %v365_v24, %v365_v24  ;;  %v372_v37 = vunpack.c.l.bf16 %v482_v31  ;;  %v216_v38 = vmul.f32 %v368_v28, %v368_v28  ;;  %v373_v42 = vunpack.c.h.bf16 %v482_v31 }
   0x8   :  { %v140_v14 = vadd.f32 %v357_v7, %v139_v10  ;;  %v273_v21 = vadd.f32 %v272_v17, %v210_v12  ;;  %v217_v43 = vmul.f32 %v369_v33, %v369_v33  ;;  %v376_v46 = vunpack.c.l.bf16 %v483_v40  ;;  %v487_v12 = vld [vmem:[%s626_s0 + $0x50] sm:$0xff]  }
   0x9   :  { %v218_v47 = vmul.f32 %v372_v37, %v372_v37  ;;  %v377_v51 = vunpack.c.h.bf16 %v483_v40  ;;  %v219_v52 = vmul.f32 %v373_v42, %v373_v42  ;;  %v380_v55 = vunpack.c.l.bf16 %v484_v49 }
   0xa   :  { %v141_v18 = vadd.f32 %v360_v11, %v140_v14  ;;  %v274_v26 = vadd.f32 %v273_v21, %v211_v16  ;;  %v220_v56 = vmul.f32 %v376_v46, %v376_v46  ;;  %v381_v60 = vunpack.c.h.bf16 %v484_v49  ;;  %v488_v21 = vld [vmem:[%s626_s0 + $0x58] sm:$0xff]  }
   0xb   :  { %v221_v61 = vmul.f32 %v377_v51, %v377_v51  ;;  %v384_v0 = vunpack.c.l.bf16 %v485_v58  ;;  %v222_v1 = vmul.f32 %v380_v55, %v380_v55  ;;  %v385_v5 = vunpack.c.h.bf16 %v485_v58 }
   0xc   :  { %v142_v23 = vadd.f32 %v361_v15, %v141_v18  ;;  %v275_v30 = vadd.f32 %v274_v26, %v212_v20  ;;  %v223_v6 = vmul.f32 %v381_v60, %v381_v60  ;;  %v388_v9 = vunpack.c.l.bf16 %v486_v3 }
   0xd   :  { %v224_v10 = vmul.f32 %v384_v0, %v384_v0  ;;  %v389_v14 = vunpack.c.h.bf16 %v486_v3  ;;  %v225_v15 = vmul.f32 %v385_v5, %v385_v5  ;;  %v392_v18 = vunpack.c.l.bf16 %v487_v12 }
   0xe   :  { %v143_v27 = vadd.f32 %v364_v19, %v142_v23  ;;  %v276_v35 = vadd.f32 %v275_v30, %v213_v25  ;;  %v226_v19 = vmul.f32 %v388_v9, %v388_v9  ;;  %v393_v23 = vunpack.c.h.bf16 %v487_v12  ;;  %v489_v30 = vld [vmem:[%s626_s0 + $0x60] sm:$0xff]  }
  0x10   :  { %v144_v32 = vadd.f32 %v365_v24, %v143_v27  ;;  %v277_v39 = vadd.f32 %v276_v35, %v214_v29  ;;  %v227_v24 = vmul.f32 %v389_v14, %v389_v14  ;;  %v396_v27 = vunpack.c.l.bf16 %v488_v21 }
  0x12   :  { %v145_v36 = vadd.f32 %v368_v28, %v144_v32  ;;  %v278_v44 = vadd.f32 %v277_v39, %v215_v34  ;;  %v228_v28 = vmul.f32 %v392_v18, %v392_v18  ;;  %v397_v32 = vunpack.c.h.bf16 %v488_v21  ;;  %v490_v39 = vld [vmem:[%s626_s0 + $0x68] sm:$0xff]  }
  0x14   :  { %v146_v41 = vadd.f32 %v369_v33, %v145_v36  ;;  %v279_v48 = vadd.f32 %v278_v44, %v216_v38  ;;  %v229_v33 = vmul.f32 %v393_v23, %v393_v23  ;;  %v400_v36 = vunpack.c.l.bf16 %v489_v30 }
  0x16   :  { %v147_v45 = vadd.f32 %v372_v37, %v146_v41  ;;  %v280_v53 = vadd.f32 %v279_v48, %v217_v43  ;;  %v230_v37 = vmul.f32 %v396_v27, %v396_v27  ;;  %v401_v41 = vunpack.c.h.bf16 %v489_v30  ;;  %v491_v48 = vld [vmem:[%s626_s0 + $0x70] sm:$0xff]  }
  0x18   :  { %v148_v50 = vadd.f32 %v373_v42, %v147_v45  ;;  %v281_v57 = vadd.f32 %v280_v53, %v218_v47  ;;  %v231_v42 = vmul.f32 %v397_v32, %v397_v32  ;;  %v404_v45 = vunpack.c.l.bf16 %v490_v39 }
  0x1a   :  { %v149_v54 = vadd.f32 %v376_v46, %v148_v50  ;;  %v282_v62 = vadd.f32 %v281_v57, %v219_v52  ;;  %v232_v46 = vmul.f32 %v400_v36, %v400_v36  ;;  %v405_v50 = vunpack.c.h.bf16 %v490_v39  ;;  %v492_v57 = vld [vmem:[%s626_s0 + $0x78] sm:$0xff]  }
  0x1c   :  { %v150_v59 = vadd.f32 %v377_v51, %v149_v54  ;;  %v283_v2 = vadd.f32 %v282_v62, %v220_v56  ;;  %v233_v51 = vmul.f32 %v401_v41, %v401_v41  ;;  %v408_v54 = vunpack.c.l.bf16 %v491_v48 }
  0x1e   :  { %v151_v63 = vadd.f32 %v380_v55, %v150_v59  ;;  %v284_v7 = vadd.f32 %v283_v2, %v221_v61  ;;  %v234_v55 = vmul.f32 %v404_v45, %v404_v45  ;;  %v409_v59 = vunpack.c.h.bf16 %v491_v48  ;;  %v493_v2 = vld [vmem:[%s626_s0 + $0x80] sm:$0xff]  }
  0x20   :  { %v152_v4 = vadd.f32 %v381_v60, %v151_v63  ;;  %v285_v11 = vadd.f32 %v284_v7, %v222_v1  ;;  %v235_v60 = vmul.f32 %v405_v50, %v405_v50  ;;  %v412_v63 = vunpack.c.l.bf16 %v492_v57 }
  0x22   :  { %v153_v8 = vadd.f32 %v384_v0, %v152_v4  ;;  %v286_v16 = vadd.f32 %v285_v11, %v223_v6  ;;  %v236_v0 = vmul.f32 %v408_v54, %v408_v54  ;;  %v413_v4 = vunpack.c.h.bf16 %v492_v57  ;;  %v494_v11 = vld [vmem:[%s626_s0 + $0x88] sm:$0xff]  }
  0x24   :  { %v154_v13 = vadd.f32 %v385_v5, %v153_v8  ;;  %v287_v20 = vadd.f32 %v286_v16, %v224_v10  ;;  %v237_v5 = vmul.f32 %v409_v59, %v409_v59  ;;  %v416_v8 = vunpack.c.l.bf16 %v493_v2 }
  0x26   :  { %v155_v17 = vadd.f32 %v388_v9, %v154_v13  ;;  %v288_v25 = vadd.f32 %v287_v20, %v225_v15  ;;  %v238_v9 = vmul.f32 %v412_v63, %v412_v63  ;;  %v417_v13 = vunpack.c.h.bf16 %v493_v2  ;;  %v495_v20 = vld [vmem:[%s626_s0 + $0x90] sm:$0xff]  }
  0x28   :  { %v156_v22 = vadd.f32 %v389_v14, %v155_v17  ;;  %v289_v29 = vadd.f32 %v288_v25, %v226_v19  ;;  %v239_v14 = vmul.f32 %v413_v4, %v413_v4  ;;  %v420_v17 = vunpack.c.l.bf16 %v494_v11 }
  0x2a   :  { %v157_v26 = vadd.f32 %v392_v18, %v156_v22  ;;  %v290_v34 = vadd.f32 %v289_v29, %v227_v24  ;;  %v240_v18 = vmul.f32 %v416_v8, %v416_v8  ;;  %v421_v22 = vunpack.c.h.bf16 %v494_v11  ;;  %v496_v29 = vld [vmem:[%s626_s0 + $0x98] sm:$0xff]  }
  0x2c   :  { %v158_v31 = vadd.f32 %v393_v23, %v157_v26  ;;  %v291_v38 = vadd.f32 %v290_v34, %v228_v28  ;;  %v241_v23 = vmul.f32 %v417_v13, %v417_v13  ;;  %v424_v26 = vunpack.c.l.bf16 %v495_v20 }
  0x2e   :  { %v159_v35 = vadd.f32 %v396_v27, %v158_v31  ;;  %v292_v43 = vadd.f32 %v291_v38, %v229_v33  ;;  %v242_v27 = vmul.f32 %v420_v17, %v420_v17  ;;  %v425_v31 = vunpack.c.h.bf16 %v495_v20  ;;  %v497_v38 = vld [vmem:[%s626_s0 + $0xa0] sm:$0xff]  }
  0x30   :  { %v160_v40 = vadd.f32 %v397_v32, %v159_v35  ;;  %v293_v47 = vadd.f32 %v292_v43, %v230_v37  ;;  %v243_v32 = vmul.f32 %v421_v22, %v421_v22  ;;  %v428_v35 = vunpack.c.l.bf16 %v496_v29 }
  0x32   :  { %v161_v44 = vadd.f32 %v400_v36, %v160_v40  ;;  %v294_v52 = vadd.f32 %v293_v47, %v231_v42  ;;  %v244_v36 = vmul.f32 %v424_v26, %v424_v26  ;;  %v429_v40 = vunpack.c.h.bf16 %v496_v29  ;;  %v498_v47 = vld [vmem:[%s626_s0 + $0xa8] sm:$0xff]  }
  0x34   :  { %v162_v49 = vadd.f32 %v401_v41, %v161_v44  ;;  %v295_v56 = vadd.f32 %v294_v52, %v232_v46  ;;  %v245_v41 = vmul.f32 %v425_v31, %v425_v31  ;;  %v432_v44 = vunpack.c.l.bf16 %v497_v38 }
  0x36   :  { %v163_v53 = vadd.f32 %v404_v45, %v162_v49  ;;  %v296_v61 = vadd.f32 %v295_v56, %v233_v51  ;;  %v246_v45 = vmul.f32 %v428_v35, %v428_v35  ;;  %v433_v49 = vunpack.c.h.bf16 %v497_v38  ;;  %v499_v56 = vld [vmem:[%s626_s0 + $0xb0] sm:$0xff]  }
  0x38   :  { %v164_v58 = vadd.f32 %v405_v50, %v163_v53  ;;  %v297_v1 = vadd.f32 %v296_v61, %v234_v55  ;;  %v247_v50 = vmul.f32 %v429_v40, %v429_v40  ;;  %v436_v53 = vunpack.c.l.bf16 %v498_v47 }
  0x3a   :  { %v165_v62 = vadd.f32 %v408_v54, %v164_v58  ;;  %v298_v6 = vadd.f32 %v297_v1, %v235_v60  ;;  %v248_v54 = vmul.f32 %v432_v44, %v432_v44  ;;  %v437_v58 = vunpack.c.h.bf16 %v498_v47  ;;  %v500_v1 = vld [vmem:[%s626_s0 + $0xb8] sm:$0xff]  }
  0x3c   :  { %v166_v3 = vadd.f32 %v409_v59, %v165_v62  ;;  %v299_v10 = vadd.f32 %v298_v6, %v236_v0  ;;  %v249_v59 = vmul.f32 %v433_v49, %v433_v49  ;;  %v440_v62 = vunpack.c.l.bf16 %v499_v56 }
  0x3e   :  { %v167_v7 = vadd.f32 %v412_v63, %v166_v3  ;;  %v300_v15 = vadd.f32 %v299_v10, %v237_v5  ;;  %v250_v63 = vmul.f32 %v436_v53, %v436_v53  ;;  %v441_v3 = vunpack.c.h.bf16 %v499_v56  ;;  %v501_v10 = vld [vmem:[%s626_s0 + $0xc0] sm:$0xff]  }
  0x40   :  { %v168_v12 = vadd.f32 %v413_v4, %v167_v7  ;;  %v301_v19 = vadd.f32 %v300_v15, %v238_v9  ;;  %v251_v4 = vmul.f32 %v437_v58, %v437_v58  ;;  %v444_v7 = vunpack.c.l.bf16 %v500_v1 }
  0x42   :  { %v169_v16 = vadd.f32 %v416_v8, %v168_v12  ;;  %v302_v24 = vadd.f32 %v301_v19, %v239_v14  ;;  %v252_v8 = vmul.f32 %v440_v62, %v440_v62  ;;  %v445_v12 = vunpack.c.h.bf16 %v500_v1  ;;  %v502_v19 = vld [vmem:[%s626_s0 + $0xc8] sm:$0xff]  }
  0x44   :  { %v170_v21 = vadd.f32 %v417_v13, %v169_v16  ;;  %v303_v28 = vadd.f32 %v302_v24, %v240_v18  ;;  %v253_v13 = vmul.f32 %v441_v3, %v441_v3  ;;  %v448_v16 = vunpack.c.l.bf16 %v501_v10 }
  0x46   :  { %v171_v25 = vadd.f32 %v420_v17, %v170_v21  ;;  %v304_v33 = vadd.f32 %v303_v28, %v241_v23  ;;  %v254_v17 = vmul.f32 %v444_v7, %v444_v7  ;;  %v449_v21 = vunpack.c.h.bf16 %v501_v10  ;;  %v503_v28 = vld [vmem:[%s626_s0 + $0xd0] sm:$0xff]  }
  0x48   :  { %v172_v30 = vadd.f32 %v421_v22, %v171_v25  ;;  %v305_v37 = vadd.f32 %v304_v33, %v242_v27  ;;  %v255_v22 = vmul.f32 %v445_v12, %v445_v12  ;;  %v452_v25 = vunpack.c.l.bf16 %v502_v19 }
  0x4a   :  { %v173_v34 = vadd.f32 %v424_v26, %v172_v30  ;;  %v306_v42 = vadd.f32 %v305_v37, %v243_v32  ;;  %v256_v26 = vmul.f32 %v448_v16, %v448_v16  ;;  %v453_v30 = vunpack.c.h.bf16 %v502_v19  ;;  %v504_v37 = vld [vmem:[%s626_s0 + $0xd8] sm:$0xff]  }
  0x4c   :  { %v174_v39 = vadd.f32 %v425_v31, %v173_v34  ;;  %v307_v46 = vadd.f32 %v306_v42, %v244_v36  ;;  %v257_v31 = vmul.f32 %v449_v21, %v449_v21  ;;  %v456_v34 = vunpack.c.l.bf16 %v503_v28 }
  0x4e   :  { %v175_v43 = vadd.f32 %v428_v35, %v174_v39  ;;  %v308_v51 = vadd.f32 %v307_v46, %v245_v41  ;;  %v258_v35 = vmul.f32 %v452_v25, %v452_v25  ;;  %v457_v39 = vunpack.c.h.bf16 %v503_v28  ;;  %v505_v46 = vld [vmem:[%s626_s0 + $0xe0] sm:$0xff]  }
  0x50   :  { %v176_v48 = vadd.f32 %v429_v40, %v175_v43  ;;  %v309_v55 = vadd.f32 %v308_v51, %v246_v45  ;;  %v259_v40 = vmul.f32 %v453_v30, %v453_v30  ;;  %v460_v43 = vunpack.c.l.bf16 %v504_v37 }
  0x52   :  { %v177_v52 = vadd.f32 %v432_v44, %v176_v48  ;;  %v310_v60 = vadd.f32 %v309_v55, %v247_v50  ;;  %v260_v44 = vmul.f32 %v456_v34, %v456_v34  ;;  %v461_v48 = vunpack.c.h.bf16 %v504_v37  ;;  %v506_v55 = vld [vmem:[%s626_s0 + $0xe8] sm:$0xff]  }
  0x54   :  { %v178_v57 = vadd.f32 %v433_v49, %v177_v52  ;;  %v311_v0 = vadd.f32 %v310_v60, %v248_v54  ;;  %v261_v49 = vmul.f32 %v457_v39, %v457_v39  ;;  %v464_v52 = vunpack.c.l.bf16 %v505_v46 }
  0x56   :  { %v179_v61 = vadd.f32 %v436_v53, %v178_v57  ;;  %v312_v5 = vadd.f32 %v311_v0, %v249_v59  ;;  %v262_v53 = vmul.f32 %v460_v43, %v460_v43  ;;  %v465_v57 = vunpack.c.h.bf16 %v505_v46  ;;  %v507_v0 = vld [vmem:[%s626_s0 + $0xf0] sm:$0xff]  }
  0x58   :  { %v180_v2 = vadd.f32 %v437_v58, %v179_v61  ;;  %v313_v9 = vadd.f32 %v312_v5, %v250_v63  ;;  %v263_v58 = vmul.f32 %v461_v48, %v461_v48  ;;  %v468_v61 = vunpack.c.l.bf16 %v506_v55 }
  0x5a   :  { %v181_v6 = vadd.f32 %v440_v62, %v180_v2  ;;  %v314_v14 = vadd.f32 %v313_v9, %v251_v4  ;;  %v264_v62 = vmul.f32 %v464_v52, %v464_v52  ;;  %v469_v2 = vunpack.c.h.bf16 %v506_v55  ;;  %v508_v9 = vld [vmem:[%s626_s0 + $0xf8] sm:$0xff]  }
  0x5b   :  { %v477_v19 = vunpack.c.h.bf16 %v508_v9 }
  0x5c   :  { %v182_v11 = vadd.f32 %v441_v3, %v181_v6  ;;  %v315_v18 = vadd.f32 %v314_v14, %v252_v8  ;;  %v265_v3 = vmul.f32 %v465_v57, %v465_v57  ;;  %v472_v6 = vunpack.c.l.bf16 %v507_v0 }
  0x5e   :  { %v183_v15 = vadd.f32 %v444_v7, %v182_v11  ;;  %v316_v23 = vadd.f32 %v315_v18, %v253_v13  ;;  %v266_v7 = vmul.f32 %v468_v61, %v468_v61  ;;  %v473_v11 = vunpack.c.h.bf16 %v507_v0 }
  0x60   :  { %v184_v20 = vadd.f32 %v445_v12, %v183_v15  ;;  %v317_v27 = vadd.f32 %v316_v23, %v254_v17  ;;  %v267_v12 = vmul.f32 %v469_v2, %v469_v2  ;;  %v476_v15 = vunpack.c.l.bf16 %v508_v9 }
  0x62   :  { %v185_v24 = vadd.f32 %v448_v16, %v184_v20  ;;  %v318_v32 = vadd.f32 %v317_v27, %v255_v22  ;;  %v268_v16 = vmul.f32 %v472_v6, %v472_v6  ;;  %v269_v20 = vmul.f32 %v473_v11, %v473_v11 }
  0x63   :  { %v270_v23 = vmul.f32 %v476_v15, %v476_v15 }
  0x64   :  { %v186_v29 = vadd.f32 %v449_v21, %v185_v24  ;;  %v319_v36 = vadd.f32 %v318_v32, %v256_v26  ;;  %v271_v26 = vmul.f32 %v477_v19, %v477_v19 }
  0x66   :  { %v187_v33 = vadd.f32 %v452_v25, %v186_v29  ;;  %v320_v41 = vadd.f32 %v319_v36, %v257_v31 }
  0x68   :  { %v188_v38 = vadd.f32 %v453_v30, %v187_v33  ;;  %v321_v45 = vadd.f32 %v320_v41, %v258_v35 }
  0x6a   :  { %v189_v42 = vadd.f32 %v456_v34, %v188_v38  ;;  %v322_v50 = vadd.f32 %v321_v45, %v259_v40 }
  0x6c   :  { %v190_v47 = vadd.f32 %v457_v39, %v189_v42  ;;  %v323_v54 = vadd.f32 %v322_v50, %v260_v44 }
  0x6e   :  { %v191_v51 = vadd.f32 %v460_v43, %v190_v47  ;;  %v324_v59 = vadd.f32 %v323_v54, %v261_v49 }
  0x70   :  { %v192_v56 = vadd.f32 %v461_v48, %v191_v51  ;;  %v325_v63 = vadd.f32 %v324_v59, %v262_v53 }
  0x72   :  { %v193_v60 = vadd.f32 %v464_v52, %v192_v56  ;;  %v326_v4 = vadd.f32 %v325_v63, %v263_v58 }
  0x74   :  { %v194_v1 = vadd.f32 %v465_v57, %v193_v60  ;;  %v327_v8 = vadd.f32 %v326_v4, %v264_v62 }
  0x76   :  { %v195_v5 = vadd.f32 %v468_v61, %v194_v1  ;;  %v328_v13 = vadd.f32 %v327_v8, %v265_v3 }
  0x78   :  { %v196_v10 = vadd.f32 %v469_v2, %v195_v5  ;;  %v329_v17 = vadd.f32 %v328_v13, %v266_v7 }
  0x7a   :  { %v197_v14 = vadd.f32 %v472_v6, %v196_v10  ;;  %v330_v21 = vadd.f32 %v329_v17, %v267_v12 }
  0x7c   :  { %v198_v18 = vadd.f32 %v473_v11, %v197_v14  ;;  %v331_v24 = vadd.f32 %v330_v21, %v268_v16 }
  0x7e   :  { %v199_v22 = vadd.f32 %v476_v15, %v198_v18  ;;  %v332_v27 = vadd.f32 %v331_v24, %v269_v20 }
  0x80   :  { %v200_v25 = vadd.f32 %v477_v19, %v199_v22  ;;  %v333_v29 = vadd.f32 %v332_v27, %v270_v23 }
  0x82   :  { %v201_v28 = vrot.slane %v200_v25, 4  ;;  %v334_v31 = vadd.f32 %v333_v29, %v271_v26 }
  0x84   :  { %v202_v30 = vadd.f32 %v201_v28, %v200_v25  ;;  %v335_v33 = vrot.slane %v334_v31, 4 }
  0x86   :  { %v203_v32 = vrot.slane %v202_v30, 2  ;;  %v336_v35 = vadd.f32 %v335_v33, %v334_v31 }
  0x88   :  { %v204_v34 = vadd.f32 %v203_v32, %v202_v30  ;;  %v337_v37 = vrot.slane %v336_v35, 2 }
  0x8a   :  { %v205_v36 = vrot.slane %v204_v34, 1  ;;  %v338_v39 = vadd.f32 %v337_v37, %v336_v35 }
  0x8c   :  { %v206_v38 = vadd.f32 %v205_v36, %v204_v34  ;;  %v339_v40 = vrot.slane %v338_v39, 1 }
  0x8e   :  { %207 = vst [vmem:[%s627_s1] sm:$0x1] %v206_v38  ;;  %v340_v41 = vadd.f32 %v339_v40, %v338_v39 }
  0x90   :  { %341 = vst [vmem:[%s628_s2] sm:$0x1] %v340_v41 }

// kernel: generator_forward.16
= control target key start
LH: loop header
LB: loop body
LE: loop exit
PB: predicated region body
PF: predicated region fallthrough
CT: control target
= control target key end

     0   :  { %s1537_s3 = inlined_call_operand.vmem [shape: bf16[128,128], index: 3, kind: input, shape index: {}]   ;;  %s1538_s1 = inlined_call_operand.vmem [shape: f32[1,128], index: 1, kind: input, shape index: {}]   ;;  %s1539_s2 = inlined_call_operand.vmem [shape: f32[1,128], index: 2, kind: input, shape index: {}]   ;;  %s1540_s0 = inlined_call_operand.vmem [shape: bf16[512,128], index: 0, kind: input, shape index: {}]   ;;  %s1541_s4 = inlined_call_operand.vmem [shape: bf16[512,128], index: 4, kind: output, shape index: {}]  }
   0x1   :  { %v781_v0 = vld [vmem:[%s1537_s3 + $0x38] sm:$0xff]  ;;  %v780_v1 = vld [vmem:[%s1537_s3 + $0x30] sm:$0xff]  ;;  %v779_v2 = vld [vmem:[%s1537_s3 + $0x28] sm:$0xff] }
   0x2   :  { %441 = vmatpush.bf16.msra.mxu0 %v781_v0  ;;  %1132 = vmatpush.bf16.msra.mxu1 %v781_v0  ;;  %v783_v3 = vld [vmem:[%s1540_s0] sm:$0xff]   ;;  %v777_v15 = vld [vmem:[%s1537_s3 + $0x18] sm:$0xff]  ;;  %v776_v25 = vld [vmem:[%s1537_s3 + $0x10] sm:$0xff] }
   0x3   :  { %1133 = vmatpush.bf16.msra.mxu2 %v781_v0  ;;  %1134 = vmatpush.bf16.msra.mxu3 %v781_v0  ;;  %v778_v4 = vld [vmem:[%s1537_s3 + $0x20] sm:$0xff]  ;;  %v784_v8 = vunpack.c.l.bf16 %v783_v3  ;;  %v785_v9 = vunpack.c.h.bf16 %v783_v3  ;;  %v775_v34 = vld [vmem:[%s1537_s3 + $0x8] sm:$0xff] }
   0x4   :  { %v1077_v5 = vld [vmem:[%s1540_s0 + $0x40] sm:$0xff]   ;;  %v1070_v43 = vld [vmem:[%s1540_s0 + $0x8] sm:$0xff]  }
   0x5   :  { %v1085_v6 = vld [vmem:[%s1540_s0 + $0x80] sm:$0xff]   ;;  %v816_v11 = vunpack.c.l.bf16 %v1077_v5  ;;  %v817_v12 = vunpack.c.h.bf16 %v1077_v5  ;;  %v1078_v44 = vld [vmem:[%s1540_s0 + $0x48] sm:$0xff]   ;;  %v788_v51 = vunpack.c.l.bf16 %v1070_v43  ;;  %v789_v52 = vunpack.c.h.bf16 %v1070_v43 }
   0x6   :  { %442 = vmatpush.bf16.msra.mxu0 %v780_v1  ;;  %1135 = vmatpush.bf16.msra.mxu1 %v780_v1  ;;  %v1093_v7 = vld [vmem:[%s1540_s0 + $0xc0] sm:$0xff]   ;;  %v848_v13 = vunpack.c.l.bf16 %v1085_v6  ;;  %v849_v14 = vunpack.c.h.bf16 %v1085_v6  ;;  %v1086_v48 = vld [vmem:[%s1540_s0 + $0x88] sm:$0xff]   ;;  %v820_v53 = vunpack.c.l.bf16 %v1078_v44  ;;  %v821_v56 = vunpack.c.h.bf16 %v1078_v44 }
   0x7   :  { %1136 = vmatpush.bf16.msra.mxu2 %v780_v1  ;;  %1137 = vmatpush.bf16.msra.mxu3 %v780_v1  ;;  %v1210_v10 = vld [vmem:[%s1538_s1] ss:$0 sm:$0xff]  ;;  %v880_v16 = vunpack.c.l.bf16 %v1093_v7  ;;  %v881_v17 = vunpack.c.h.bf16 %v1093_v7  ;;  %v1094_v49 = vld [vmem:[%s1540_s0 + $0xc8] sm:$0xff]   ;;  %v852_v57 = vunpack.c.l.bf16 %v1086_v48  ;;  %v853_v59 = vunpack.c.h.bf16 %v1086_v48 }
   0x8   :  { %v149_v18 = vmul.f32 %v1210_v10, %v784_v8  ;;  %v150_v19 = vmul.f32 %v1210_v10, %v785_v9  ;;  %v1220_v20 = vld [vmem:[%s1539_s2] ss:$0 sm:$0xff]  ;;  %v165_v21 = vmul.f32 %v1210_v10, %v816_v11  ;;  %v166_v22 = vmul.f32 %v1210_v10, %v817_v12 }
   0x9   :  { %v181_v23 = vmul.f32 %v1210_v10, %v848_v13  ;;  %v182_v24 = vmul.f32 %v1210_v10, %v849_v14  ;;  %v197_v26 = vmul.f32 %v1210_v10, %v880_v16  ;;  %v198_v27 = vmul.f32 %v1210_v10, %v881_v17  ;;  %v774_v45 = vld [vmem:[%s1537_s3] sm:$0xff] }
   0xa   :  { %443 = vmatpush.bf16.msra.mxu0 %v779_v2  ;;  %1138 = vmatpush.bf16.msra.mxu1 %v779_v2  ;;  %v217_v28 = vadd.f32 %v1220_v20, %v149_v18  ;;  %v218_v29 = vadd.f32 %v1220_v20, %v150_v19  ;;  %v233_v30 = vadd.f32 %v1220_v20, %v165_v21  ;;  %v884_v60 = vunpack.c.l.bf16 %v1094_v49  ;;  %v1071_v19 = vld [vmem:[%s1540_s0 + $0x10] sm:$0xff]  }
   0xb   :  { %1139 = vmatpush.bf16.msra.mxu2 %v779_v2  ;;  %1140 = vmatpush.bf16.msra.mxu3 %v779_v2  ;;  %v234_v31 = vadd.f32 %v1220_v20, %v166_v22  ;;  %v249_v32 = vadd.f32 %v1220_v20, %v181_v23  ;;  %v250_v33 = vadd.f32 %v1220_v20, %v182_v24  ;;  %v885_v61 = vunpack.c.h.bf16 %v1094_v49  ;;  %v1079_v21 = vld [vmem:[%s1540_s0 + $0x50] sm:$0xff]  }
   0xc   :  { %v265_v35 = vadd.f32 %v1220_v20, %v197_v26  ;;  %v266_v36 = vadd.f32 %v1220_v20, %v198_v27  ;;  %v281_v37 = vmax.f32 %v217_v28, 0.0  ;;  %v282_v38 = vmax.f32 %v218_v29, 0.0  ;;  %v1087_v26 = vld [vmem:[%s1540_s0 + $0x90] sm:$0xff]  }
   0xd   :  { %v297_v39 = vmax.f32 %v233_v30, 0.0  ;;  %v298_v40 = vmax.f32 %v234_v31, 0.0  ;;  %v313_v41 = vmax.f32 %v249_v32, 0.0  ;;  %v314_v42 = vmax.f32 %v250_v33, 0.0  ;;  %v1095_v27 = vld [vmem:[%s1540_s0 + $0xd0] sm:$0xff]  }
   0xe   :  { %444 = vmatpush.bf16.msra.mxu0 %v778_v4  ;;  %1141 = vmatpush.bf16.msra.mxu1 %v778_v4  ;;  %v329_v46 = vmax.f32 %v265_v35, 0.0  ;;  %v330_v47 = vmax.f32 %v266_v36, 0.0  ;;  %v345_v50 = vpack.c.bf16 %v282_v38, %v281_v37  ;;  %v151_v62 = vmul.f32 %v1210_v10, %v788_v51 }
   0xf   :  { %1142 = vmatpush.bf16.msra.mxu2 %v778_v4  ;;  %1143 = vmatpush.bf16.msra.mxu3 %v778_v4  ;;  %v353_v54 = vpack.c.bf16 %v298_v40, %v297_v39  ;;  %v361_v55 = vpack.c.bf16 %v314_v42, %v313_v41  ;;  %v152_v63 = vmul.f32 %v1210_v10, %v789_v52  ;;  %v792_v28 = vunpack.c.l.bf16 %v1071_v19 }
  0x10   :  { %v369_v58 = vpack.c.bf16 %v330_v47, %v329_v46  ;;  %v167_v0 = vmul.f32 %v1210_v10, %v820_v53  ;;  %v168_v1 = vmul.f32 %v1210_v10, %v821_v56  ;;  %v183_v2 = vmul.f32 %v1210_v10, %v852_v57 }
  0x11   :  { %v184_v3 = vmul.f32 %v1210_v10, %v853_v59  ;;  %v199_v4 = vmul.f32 %v1210_v10, %v884_v60  ;;  %v200_v5 = vmul.f32 %v1210_v10, %v885_v61  ;;  %v219_v6 = vadd.f32 %v1220_v20, %v151_v62  ;;  %v1072_v62 = vld [vmem:[%s1540_s0 + $0x18] sm:$0xff]  }
  0x12   :  { %445 = vmatpush.bf16.msra.mxu0 %v777_v15  ;;  %1144 = vmatpush.bf16.msra.mxu1 %v777_v15  ;;  %v220_v7 = vadd.f32 %v1220_v20, %v152_v63  ;;  %v235_v8 = vadd.f32 %v1220_v20, %v167_v0  ;;  %v236_v9 = vadd.f32 %v1220_v20, %v168_v1  ;;  %v793_v29 = vunpack.c.h.bf16 %v1071_v19  ;;  %v1080_v1 = vld [vmem:[%s1540_s0 + $0x58] sm:$0xff]  }
  0x13   :  { %1145 = vmatpush.bf16.msra.mxu2 %v777_v15  ;;  %1146 = vmatpush.bf16.msra.mxu3 %v777_v15  ;;  %v251_v11 = vadd.f32 %v1220_v20, %v183_v2  ;;  %v252_v12 = vadd.f32 %v1220_v20, %v184_v3  ;;  %v267_v13 = vadd.f32 %v1220_v20, %v199_v4  ;;  %v283_v15 = vmax.f32 %v219_v6, 0.0  ;;  %v1088_v2 = vld [vmem:[%s1540_s0 + $0x98] sm:$0xff]  }
  0x14   :  { %v268_v14 = vadd.f32 %v1220_v20, %v200_v5  ;;  %v284_v16 = vmax.f32 %v220_v7, 0.0  ;;  %v299_v17 = vmax.f32 %v235_v8, 0.0  ;;  %v300_v18 = vmax.f32 %v236_v9, 0.0  ;;  %v1096_v3 = vld [vmem:[%s1540_s0 + $0xd8] sm:$0xff]  }
  0x15   :  { %v315_v22 = vmax.f32 %v251_v11, 0.0  ;;  %v316_v23 = vmax.f32 %v252_v12, 0.0  ;;  %v331_v24 = vmax.f32 %v267_v13, 0.0  ;;  %v824_v30 = vunpack.c.l.bf16 %v1079_v21 }
  0x16   :  { %446 = vmatpush.bf16.msra.mxu0 %v776_v25  ;;  %1147 = vmatpush.bf16.msra.mxu1 %v776_v25  ;;  %v825_v31 = vunpack.c.h.bf16 %v1079_v21  ;;  %v346_v32 = vpack.c.bf16 %v284_v16, %v283_v15  ;;  %v354_v33 = vpack.c.bf16 %v300_v18, %v299_v17  ;;  %v857_v35 = vunpack.c.h.bf16 %v1087_v26 }
  0x17   :  { %1148 = vmatpush.bf16.msra.mxu2 %v776_v25  ;;  %1149 = vmatpush.bf16.msra.mxu3 %v776_v25  ;;  %v332_v25 = vmax.f32 %v268_v14, 0.0  ;;  %v362_v36 = vpack.c.bf16 %v316_v23, %v315_v22  ;;  %v888_v38 = vunpack.c.l.bf16 %v1095_v27  ;;  %v889_v39 = vunpack.c.h.bf16 %v1095_v27 }
  0x18   :  { %v153_v40 = vmul.f32 %v1210_v10, %v792_v28  ;;  %v154_v41 = vmul.f32 %v1210_v10, %v793_v29  ;;  %v169_v42 = vmul.f32 %v1210_v10, %v824_v30  ;;  %v170_v43 = vmul.f32 %v1210_v10, %v825_v31 }
  0x19   :  { %v370_v37 = vpack.c.bf16 %v332_v25, %v331_v24  ;;  %v201_v46 = vmul.f32 %v1210_v10, %v888_v38  ;;  %v202_v47 = vmul.f32 %v1210_v10, %v889_v39  ;;  %v796_v6 = vunpack.c.l.bf16 %v1072_v62  ;;  %v1073_v38 = vld [vmem:[%s1540_s0 + $0x20] sm:$0xff]  }
  0x1a   :  { %447 = vmatpush.bf16.msra.mxu0 %v775_v34  ;;  %1150 = vmatpush.bf16.msra.mxu1 %v775_v34  ;;  %v221_v48 = vadd.f32 %v1220_v20, %v153_v40  ;;  %v222_v49 = vadd.f32 %v1220_v20, %v154_v41  ;;  %v238_v51 = vadd.f32 %v1220_v20, %v170_v43  ;;  %v797_v7 = vunpack.c.h.bf16 %v1072_v62  ;;  %v1081_v39 = vld [vmem:[%s1540_s0 + $0x60] sm:$0xff]  }
  0x1b   :  { %1151 = vmatpush.bf16.msra.mxu2 %v775_v34  ;;  %1152 = vmatpush.bf16.msra.mxu3 %v775_v34  ;;  %v856_v34 = vunpack.c.l.bf16 %v1087_v26  ;;  %v828_v9 = vunpack.c.l.bf16 %v1080_v1  ;;  %v829_v11 = vunpack.c.h.bf16 %v1080_v1  ;;  %v860_v12 = vunpack.c.l.bf16 %v1088_v2 }
  0x1c   :  { %v285_v56 = vmax.f32 %v221_v48, 0.0  ;;  %v286_v57 = vmax.f32 %v222_v49, 0.0  ;;  %v302_v59 = vmax.f32 %v238_v51, 0.0  ;;  %v861_v14 = vunpack.c.h.bf16 %v1088_v2 }
  0x1d   :  { %v185_v44 = vmul.f32 %v1210_v10, %v856_v34  ;;  %v892_v15 = vunpack.c.l.bf16 %v1096_v3  ;;  %v893_v16 = vunpack.c.h.bf16 %v1096_v3  ;;  %v155_v17 = vmul.f32 %v1210_v10, %v796_v6 }
  0x1e   :  { %448 = vmatpush.bf16.msra.mxu0 %v774_v45  ;;  %1153 = vmatpush.bf16.msra.mxu1 %v774_v45  ;;  %v347_v4 = vpack.c.bf16 %v286_v57, %v285_v56  ;;  %v156_v18 = vmul.f32 %v1210_v10, %v797_v7  ;;  %v171_v19 = vmul.f32 %v1210_v10, %v828_v9  ;;  %v832_v48 = vunpack.c.l.bf16 %v1081_v39 }
  0x1f   :  { %1154 = vmatpush.bf16.msra.mxu2 %v774_v45  ;;  %1155 = vmatpush.bf16.msra.mxu3 %v774_v45  ;;  %v186_v45 = vmul.f32 %v1210_v10, %v857_v35  ;;  %v253_v52 = vadd.f32 %v1220_v20, %v185_v44  ;;  %v172_v21 = vmul.f32 %v1210_v10, %v829_v11  ;;  %v1089_v44 = vld [vmem:[%s1540_s0 + $0xa0] sm:$0xff]   ;;  %v833_v49 = vunpack.c.h.bf16 %v1081_v39 }
  0x20   :  { %v187_v22 = vmul.f32 %v1210_v10, %v860_v12  ;;  %v188_v23 = vmul.f32 %v1210_v10, %v861_v14  ;;  %v203_v24 = vmul.f32 %v1210_v10, %v892_v15  ;;  %v204_v25 = vmul.f32 %v1210_v10, %v893_v16 }
  0x21   :  { %449 = vmatmul.bf16.vlgmr.msra.gmra.mxu0 %v345_v50  ;;  %489 = vmatmul.bf16.vlgmr.msra.gmra.mxu1 %v353_v54  ;;  %v237_v50 = vadd.f32 %v1220_v20, %v169_v42  ;;  %v254_v53 = vadd.f32 %v1220_v20, %v186_v45  ;;  %v269_v54 = vadd.f32 %v1220_v20, %v201_v46  ;;  %v317_v60 = vmax.f32 %v253_v52, 0.0  ;;  %v1097_v45 = vld [vmem:[%s1540_s0 + $0xe0] sm:$0xff]  }
  0x22   :  { %529 = vmatmul.bf16.vlgmr.msra.gmra.mxu2 %v361_v55  ;;  %569 = vmatmul.bf16.vlgmr.msra.gmra.mxu3 %v369_v58  ;;  %v270_v55 = vadd.f32 %v1220_v20, %v202_v47  ;;  %v223_v26 = vadd.f32 %v1220_v20, %v155_v17  ;;  %v224_v27 = vadd.f32 %v1220_v20, %v156_v18  ;;  %v800_v46 = vunpack.c.l.bf16 %v1073_v38  ;;  %v1074_v17 = vld [vmem:[%s1540_s0 + $0x28] sm:$0xff]  }
  0x23   :  { %v301_v58 = vmax.f32 %v237_v50, 0.0  ;;  %v318_v61 = vmax.f32 %v254_v53, 0.0  ;;  %v333_v63 = vmax.f32 %v269_v54, 0.0  ;;  %v239_v28 = vadd.f32 %v1220_v20, %v171_v19 }
  0x24   :  { %v334_v0 = vmax.f32 %v270_v55, 0.0  ;;  %v240_v29 = vadd.f32 %v1220_v20, %v172_v21  ;;  %v255_v30 = vadd.f32 %v1220_v20, %v187_v22  ;;  %v256_v31 = vadd.f32 %v1220_v20, %v188_v23  ;;  %v1082_v21 = vld [vmem:[%s1540_s0 + $0x68] sm:$0xff]  }
  0x25   :  { %v355_v5 = vpack.c.bf16 %v302_v59, %v301_v58  ;;  %v363_v8 = vpack.c.bf16 %v318_v61, %v317_v60  ;;  %v287_v34 = vmax.f32 %v223_v26, 0.0  ;;  %v288_v35 = vmax.f32 %v224_v27, 0.0  ;;  %v1090_v22 = vld [vmem:[%s1540_s0 + $0xa8] sm:$0xff]  }
  0x26   :  { %v371_v13 = vpack.c.bf16 %v334_v0, %v333_v63  ;;  %v319_v40 = vmax.f32 %v255_v30, 0.0  ;;  %v320_v41 = vmax.f32 %v256_v31, 0.0  ;;  %v801_v47 = vunpack.c.h.bf16 %v1073_v38  ;;  %v1098_v23 = vld [vmem:[%s1540_s0 + $0xe8] sm:$0xff]  }
  0x27   :  { %v348_v50 = vpack.c.bf16 %v288_v35, %v287_v34  ;;  %v864_v52 = vunpack.c.l.bf16 %v1089_v44  ;;  %v865_v53 = vunpack.c.h.bf16 %v1089_v44  ;;  %v896_v56 = vunpack.c.l.bf16 %v1097_v45 }
  0x28   :  { %v364_v54 = vpack.c.bf16 %v320_v41, %v319_v40  ;;  %v897_v57 = vunpack.c.h.bf16 %v1097_v45  ;;  %v157_v58 = vmul.f32 %v1210_v10, %v800_v46  ;;  %v158_v59 = vmul.f32 %v1210_v10, %v801_v47 }
  0x29   :  { %v173_v60 = vmul.f32 %v1210_v10, %v832_v48  ;;  %v174_v61 = vmul.f32 %v1210_v10, %v833_v49  ;;  %v189_v62 = vmul.f32 %v1210_v10, %v864_v52  ;;  %v190_v63 = vmul.f32 %v1210_v10, %v865_v53 }
  0x2a   :  { %v205_v0 = vmul.f32 %v1210_v10, %v896_v56  ;;  %v206_v1 = vmul.f32 %v1210_v10, %v897_v57  ;;  %v225_v2 = vadd.f32 %v1220_v20, %v157_v58  ;;  %v226_v3 = vadd.f32 %v1220_v20, %v158_v59  ;;  %v1075_v56 = vld [vmem:[%s1540_s0 + $0x30] sm:$0xff]  }
  0x2b   :  { %v257_v6 = vadd.f32 %v1220_v20, %v189_v62  ;;  %v258_v7 = vadd.f32 %v1220_v20, %v190_v63  ;;  %v804_v26 = vunpack.c.l.bf16 %v1074_v17  ;;  %v805_v27 = vunpack.c.h.bf16 %v1074_v17  ;;  %v1083_v57 = vld [vmem:[%s1540_s0 + $0x70] sm:$0xff]  }
  0x2c   :  { %v274_v9 = vadd.f32 %v1220_v20, %v206_v1  ;;  %v289_v11 = vmax.f32 %v225_v2, 0.0  ;;  %v290_v12 = vmax.f32 %v226_v3, 0.0  ;;  %v837_v30 = vunpack.c.h.bf16 %v1082_v21  ;;  %v1091_v62 = vld [vmem:[%s1540_s0 + $0xb0] sm:$0xff]  }
  0x2d   :  { %v321_v15 = vmax.f32 %v257_v6, 0.0  ;;  %v322_v16 = vmax.f32 %v258_v7, 0.0  ;;  %v868_v31 = vunpack.c.l.bf16 %v1090_v22  ;;  %v900_v34 = vunpack.c.l.bf16 %v1098_v23  ;;  %v1099_v63 = vld [vmem:[%s1540_s0 + $0xf0] sm:$0xff]  }
  0x2e   :  { %v338_v19 = vmax.f32 %v274_v9, 0.0  ;;  %v901_v35 = vunpack.c.h.bf16 %v1098_v23  ;;  %v176_v39 = vmul.f32 %v1210_v10, %v837_v30  ;;  %v809_v1 = vunpack.c.h.bf16 %v1075_v56 }
  0x2f   :  { %v191_v40 = vmul.f32 %v1210_v10, %v868_v31  ;;  %v840_v2 = vunpack.c.l.bf16 %v1083_v57  ;;  %v841_v3 = vunpack.c.h.bf16 %v1083_v57  ;;  %v872_v6 = vunpack.c.l.bf16 %v1091_v62 }
  0x30   :  { %v244_v47 = vadd.f32 %v1220_v20, %v176_v39  ;;  %v873_v7 = vunpack.c.h.bf16 %v1091_v62  ;;  %v1084_v39 = vld [vmem:[%s1540_s0 + $0x78] sm:$0xff]  }
  0x31   :  { %454 = vmatmul.bf16.gmra.mxu0 %v346_v32  ;;  %494 = vmatmul.bf16.gmra.mxu1 %v354_v33  ;;  %v271_v32 = vadd.f32 %v1220_v20, %v203_v24  ;;  %v272_v33 = vadd.f32 %v1220_v20, %v204_v25  ;;  %v349_v24 = vpack.c.bf16 %v290_v12, %v289_v11  ;;  %v904_v11 = vunpack.c.l.bf16 %v1099_v63 }
  0x32   :  { %534 = vmatmul.bf16.gmra.mxu2 %v362_v36  ;;  %574 = vmatmul.bf16.gmra.mxu3 %v370_v37  ;;  %v303_v36 = vmax.f32 %v239_v28, 0.0  ;;  %v304_v37 = vmax.f32 %v240_v29, 0.0  ;;  %v365_v28 = vpack.c.bf16 %v322_v16, %v321_v15  ;;  %v836_v29 = vunpack.c.l.bf16 %v1082_v21 }
  0x33   :  { %v335_v42 = vmax.f32 %v271_v32, 0.0  ;;  %v336_v43 = vmax.f32 %v272_v33, 0.0  ;;  %v869_v33 = vunpack.c.h.bf16 %v1090_v22  ;;  %v259_v48 = vadd.f32 %v1220_v20, %v191_v40  ;;  %v1092_v40 = vld [vmem:[%s1540_s0 + $0xb8] sm:$0xff]  }
  0x34   :  { %v356_v51 = vpack.c.bf16 %v304_v37, %v303_v36  ;;  %v159_v36 = vmul.f32 %v1210_v10, %v804_v26  ;;  %v160_v37 = vmul.f32 %v1210_v10, %v805_v27  ;;  %v175_v38 = vmul.f32 %v1210_v10, %v836_v29 }
  0x35   :  { %v372_v55 = vpack.c.bf16 %v336_v43, %v335_v42  ;;  %v192_v41 = vmul.f32 %v1210_v10, %v869_v33  ;;  %v207_v42 = vmul.f32 %v1210_v10, %v900_v34  ;;  %v208_v43 = vmul.f32 %v1210_v10, %v901_v35 }
  0x36   :  { %v227_v44 = vadd.f32 %v1220_v20, %v159_v36  ;;  %v228_v45 = vadd.f32 %v1220_v20, %v160_v37  ;;  %v243_v46 = vadd.f32 %v1220_v20, %v175_v38  ;;  %v323_v58 = vmax.f32 %v259_v48, 0.0  ;;  %v1076_v36 = vld [vmem:[%s1540_s0 + $0x38] sm:$0xff]  }
  0x37   :  { %v260_v49 = vadd.f32 %v1220_v20, %v192_v41  ;;  %v905_v12 = vunpack.c.h.bf16 %v1099_v63  ;;  %v177_v15 = vmul.f32 %v1210_v10, %v840_v2  ;;  %v178_v16 = vmul.f32 %v1210_v10, %v841_v3  ;;  %v1100_v41 = vld [vmem:[%s1540_s0 + $0xf8] sm:$0xff]  }
  0x38   :  { %v291_v52 = vmax.f32 %v227_v44, 0.0  ;;  %v292_v53 = vmax.f32 %v228_v45, 0.0  ;;  %v193_v17 = vmul.f32 %v1210_v10, %v872_v6  ;;  %v812_v44 = vunpack.c.l.bf16 %v1076_v36 }
  0x39   :  { %v324_v59 = vmax.f32 %v260_v49, 0.0  ;;  %v210_v21 = vmul.f32 %v1210_v10, %v905_v12  ;;  %v813_v45 = vunpack.c.h.bf16 %v1076_v36  ;;  %v845_v48 = vunpack.c.h.bf16 %v1084_v39 }
  0x3a   :  { %v261_v26 = vadd.f32 %v1220_v20, %v193_v17  ;;  %v876_v49 = vunpack.c.l.bf16 %v1092_v40 }
  0x3b   :  { %v278_v29 = vadd.f32 %v1220_v20, %v210_v21  ;;  %v180_v57 = vmul.f32 %v1210_v10, %v845_v48 }
  0x3c   :  { %v325_v34 = vmax.f32 %v261_v26, 0.0 }
  0x3d   :  { %v342_v38 = vmax.f32 %v278_v29, 0.0 }
  0x41   :  { %459 = vmatmul.bf16.gmra.mxu0 %v347_v4  ;;  %499 = vmatmul.bf16.gmra.mxu1 %v355_v5  ;;  %v241_v4 = vadd.f32 %v1220_v20, %v173_v60  ;;  %v242_v5 = vadd.f32 %v1220_v20, %v174_v61 }
  0x42   :  { %539 = vmatmul.bf16.gmra.mxu2 %v363_v8  ;;  %579 = vmatmul.bf16.gmra.mxu3 %v371_v13  ;;  %v273_v8 = vadd.f32 %v1220_v20, %v205_v0  ;;  %v808_v0 = vunpack.c.l.bf16 %v1075_v56 }
  0x43   :  { %v305_v13 = vmax.f32 %v241_v4, 0.0  ;;  %v306_v14 = vmax.f32 %v242_v5, 0.0  ;;  %v350_v4 = vpack.c.bf16 %v292_v53, %v291_v52  ;;  %v908_v52 = vunpack.c.l.bf16 %v1100_v41 }
  0x44   :  { %v337_v18 = vmax.f32 %v273_v8, 0.0  ;;  %v366_v8 = vpack.c.bf16 %v324_v59, %v323_v58  ;;  %v909_v53 = vunpack.c.h.bf16 %v1100_v41  ;;  %v195_v58 = vmul.f32 %v1210_v10, %v876_v49 }
  0x45   :  { %v357_v25 = vpack.c.bf16 %v306_v14, %v305_v13  ;;  %v161_v13 = vmul.f32 %v1210_v10, %v808_v0  ;;  %v162_v14 = vmul.f32 %v1210_v10, %v809_v1  ;;  %v248_v1 = vadd.f32 %v1220_v20, %v180_v57 }
  0x46   :  { %v373_v32 = vpack.c.bf16 %v338_v19, %v337_v18  ;;  %v194_v18 = vmul.f32 %v1210_v10, %v873_v7  ;;  %v209_v19 = vmul.f32 %v1210_v10, %v904_v11  ;;  %v263_v2 = vadd.f32 %v1220_v20, %v195_v58 }
  0x47   :  { %v229_v22 = vadd.f32 %v1220_v20, %v161_v13  ;;  %v230_v23 = vadd.f32 %v1220_v20, %v162_v14 }
  0x48   :  { %v262_v27 = vadd.f32 %v1220_v20, %v194_v18 }
  0x49   :  { %v293_v30 = vmax.f32 %v229_v22, 0.0  ;;  %v294_v31 = vmax.f32 %v230_v23, 0.0 }
  0x4a   :  { %v326_v35 = vmax.f32 %v262_v27, 0.0 }
  0x51   :  { %464 = vmatmul.bf16.gmra.mxu0 %v348_v50  ;;  %504 = vmatmul.bf16.gmra.mxu1 %v356_v51  ;;  %v275_v50 = vadd.f32 %v1220_v20, %v207_v42  ;;  %v276_v51 = vadd.f32 %v1220_v20, %v208_v43  ;;  %v351_v42 = vpack.c.bf16 %v294_v31, %v293_v30 }
  0x52   :  { %544 = vmatmul.bf16.gmra.mxu2 %v364_v54  ;;  %584 = vmatmul.bf16.gmra.mxu3 %v372_v55  ;;  %v307_v54 = vmax.f32 %v243_v46, 0.0  ;;  %v308_v55 = vmax.f32 %v244_v47, 0.0  ;;  %v367_v46 = vpack.c.bf16 %v326_v35, %v325_v34  ;;  %v844_v47 = vunpack.c.l.bf16 %v1084_v39 }
  0x53   :  { %v339_v60 = vmax.f32 %v275_v50, 0.0  ;;  %v340_v61 = vmax.f32 %v276_v51, 0.0  ;;  %v877_v51 = vunpack.c.h.bf16 %v1092_v40 }
  0x54   :  { %v358_v5 = vpack.c.bf16 %v308_v55, %v307_v54  ;;  %v163_v54 = vmul.f32 %v1210_v10, %v812_v44  ;;  %v164_v55 = vmul.f32 %v1210_v10, %v813_v45  ;;  %v179_v56 = vmul.f32 %v1210_v10, %v844_v47 }
  0x55   :  { %v374_v9 = vpack.c.bf16 %v340_v61, %v339_v60  ;;  %v196_v59 = vmul.f32 %v1210_v10, %v877_v51  ;;  %v211_v60 = vmul.f32 %v1210_v10, %v908_v52  ;;  %v212_v61 = vmul.f32 %v1210_v10, %v909_v53 }
  0x56   :  { %v231_v62 = vadd.f32 %v1220_v20, %v163_v54  ;;  %v232_v63 = vadd.f32 %v1220_v20, %v164_v55  ;;  %v247_v0 = vadd.f32 %v1220_v20, %v179_v56  ;;  %v312_v10 = vmax.f32 %v248_v1, 0.0 }
  0x57   :  { %v264_v3 = vadd.f32 %v1220_v20, %v196_v59 }
  0x58   :  { %v295_v6 = vmax.f32 %v231_v62, 0.0  ;;  %v296_v7 = vmax.f32 %v232_v63, 0.0 }
  0x59   :  { %v328_v11 = vmax.f32 %v264_v3, 0.0 }
  0x5a   :  { %v352_v14 = vpack.c.bf16 %v296_v7, %v295_v6 }
  0x61   :  { %469 = vmatmul.bf16.gmra.mxu0 %v349_v24  ;;  %509 = vmatmul.bf16.gmra.mxu1 %v357_v25  ;;  %v245_v24 = vadd.f32 %v1220_v20, %v177_v15  ;;  %v246_v25 = vadd.f32 %v1220_v20, %v178_v16 }
  0x62   :  { %549 = vmatmul.bf16.gmra.mxu2 %v365_v28  ;;  %589 = vmatmul.bf16.gmra.mxu3 %v373_v32  ;;  %v277_v28 = vadd.f32 %v1220_v20, %v209_v19 }
  0x63   :  { %v309_v32 = vmax.f32 %v245_v24, 0.0  ;;  %v310_v33 = vmax.f32 %v246_v25, 0.0 }
  0x64   :  { %v341_v37 = vmax.f32 %v277_v28, 0.0 }
  0x65   :  { %v359_v43 = vpack.c.bf16 %v310_v33, %v309_v32 }
  0x66   :  { %v375_v50 = vpack.c.bf16 %v342_v38, %v341_v37 }
  0x71   :  { %474 = vmatmul.bf16.gmra.mxu0 %v350_v4  ;;  %514 = vmatmul.bf16.gmra.mxu1 %v358_v5  ;;  %v279_v4 = vadd.f32 %v1220_v20, %v211_v60  ;;  %v280_v5 = vadd.f32 %v1220_v20, %v212_v61 }
  0x72   :  { %554 = vmatmul.bf16.gmra.mxu2 %v366_v8  ;;  %594 = vmatmul.bf16.gmra.mxu3 %v374_v9  ;;  %v311_v8 = vmax.f32 %v247_v0, 0.0  ;;  %v327_v9 = vmax.f32 %v263_v2, 0.0 }
  0x73   :  { %v343_v12 = vmax.f32 %v279_v4, 0.0  ;;  %v344_v13 = vmax.f32 %v280_v5, 0.0 }
  0x74   :  { %v360_v15 = vpack.c.bf16 %v312_v10, %v311_v8  ;;  %v368_v16 = vpack.c.bf16 %v328_v11, %v327_v9 }
  0x75   :  { %v376_v17 = vpack.c.bf16 %v344_v13, %v343_v12 }
  0x81   :  { %479 = vmatmul.bf16.gmra.mxu0 %v351_v42  ;;  %519 = vmatmul.bf16.gmra.mxu1 %v359_v43 }
  0x82   :  { %559 = vmatmul.bf16.gmra.mxu2 %v367_v46  ;;  %599 = vmatmul.bf16.gmra.mxu3 %v375_v50 }
  0x91   :  { %484 = vmatmul.bf16.gmra.mxu0 %v352_v14  ;;  %524 = vmatmul.bf16.gmra.mxu1 %v360_v15 }
  0x92   :  { %564 = vmatmul.bf16.gmra.mxu2 %v368_v16  ;;  %604 = vmatmul.bf16.gmra.mxu3 %v376_v17 }
  0x9e   :  { %v450_v18 = vpop.f32.mrf.mxu0  ;;  %v490_v19 = vpop.f32.mrf.mxu1 }
  0xa5   :  { %v530_v21 = vpop.f32.mrf.mxu2  ;;  %v570_v20 = vpop.f32.mrf.mxu3 }
  0xa6   :  { %v452_v22 = vpop.f32.mrf.mxu0  ;;  %v492_v23 = vpop.f32.mrf.mxu1 }
  0xa7   :  { %v913_v24 = vpack.c.bf16 %v452_v22, %v450_v18  ;;  %v953_v25 = vpack.c.bf16 %v492_v23, %v490_v19 }
  0xa9   :  { %914 = vst [vmem:[%s1541_s4] sm:$0xff] %v913_v24  }
  0xaa   :  { %1108 = vst [vmem:[%s1541_s4 + $0x40] sm:$0xff] %v953_v25  }
  0xad   :  { %v532_v26 = vpop.f32.mrf.mxu2  ;;  %v572_v27 = vpop.f32.mrf.mxu3 }
  0xae   :  { %v993_v28 = vpack.c.bf16 %v532_v26, %v530_v21  ;;  %v1033_v29 = vpack.c.bf16 %v572_v27, %v570_v20  ;;  %v455_v30 = vpop.f32.mrf.mxu0  ;;  %v495_v31 = vpop.f32.mrf.mxu1 }
  0xb0   :  { %1116 = vst [vmem:[%s1541_s4 + $0x80] sm:$0xff] %v993_v28  }
  0xb1   :  { %1124 = vst [vmem:[%s1541_s4 + $0xc0] sm:$0xff] %v1033_v29  }
  0xb5   :  { %v535_v32 = vpop.f32.mrf.mxu2  ;;  %v575_v33 = vpop.f32.mrf.mxu3 }
  0xb6   :  { %v457_v34 = vpop.f32.mrf.mxu0  ;;  %v497_v35 = vpop.f32.mrf.mxu1 }
  0xb7   :  { %v918_v36 = vpack.c.bf16 %v457_v34, %v455_v30  ;;  %v958_v37 = vpack.c.bf16 %v497_v35, %v495_v31 }
  0xb9   :  { %1101 = vst [vmem:[%s1541_s4 + $0x8] sm:$0xff] %v918_v36  }
  0xba   :  { %1109 = vst [vmem:[%s1541_s4 + $0x48] sm:$0xff] %v958_v37  }
  0xbd   :  { %v537_v38 = vpop.f32.mrf.mxu2  ;;  %v577_v39 = vpop.f32.mrf.mxu3 }
  0xbe   :  { %v998_v40 = vpack.c.bf16 %v537_v38, %v535_v32  ;;  %v1038_v41 = vpack.c.bf16 %v577_v39, %v575_v33  ;;  %v460_v42 = vpop.f32.mrf.mxu0  ;;  %v500_v43 = vpop.f32.mrf.mxu1 }
  0xc0   :  { %1117 = vst [vmem:[%s1541_s4 + $0x88] sm:$0xff] %v998_v40  }
  0xc1   :  { %1125 = vst [vmem:[%s1541_s4 + $0xc8] sm:$0xff] %v1038_v41  }
  0xc5   :  { %v540_v44 = vpop.f32.mrf.mxu2  ;;  %v580_v45 = vpop.f32.mrf.mxu3 }
  0xc6   :  { %v462_v46 = vpop.f32.mrf.mxu0  ;;  %v502_v47 = vpop.f32.mrf.mxu1 }
  0xc7   :  { %v923_v48 = vpack.c.bf16 %v462_v46, %v460_v42  ;;  %v963_v49 = vpack.c.bf16 %v502_v47, %v500_v43 }
  0xc9   :  { %1102 = vst [vmem:[%s1541_s4 + $0x10] sm:$0xff] %v923_v48  }
  0xca   :  { %1110 = vst [vmem:[%s1541_s4 + $0x50] sm:$0xff] %v963_v49  }
  0xcd   :  { %v542_v50 = vpop.f32.mrf.mxu2  ;;  %v582_v51 = vpop.f32.mrf.mxu3 }
  0xce   :  { %v1003_v52 = vpack.c.bf16 %v542_v50, %v540_v44  ;;  %v1043_v53 = vpack.c.bf16 %v582_v51, %v580_v45  ;;  %v465_v54 = vpop.f32.mrf.mxu0  ;;  %v505_v55 = vpop.f32.mrf.mxu1 }
  0xd0   :  { %1118 = vst [vmem:[%s1541_s4 + $0x90] sm:$0xff] %v1003_v52  }
  0xd1   :  { %1126 = vst [vmem:[%s1541_s4 + $0xd0] sm:$0xff] %v1043_v53  }
  0xd5   :  { %v545_v56 = vpop.f32.mrf.mxu2  ;;  %v585_v57 = vpop.f32.mrf.mxu3 }
  0xd6   :  { %v467_v58 = vpop.f32.mrf.mxu0  ;;  %v507_v59 = vpop.f32.mrf.mxu1 }
  0xd7   :  { %v928_v60 = vpack.c.bf16 %v467_v58, %v465_v54  ;;  %v968_v61 = vpack.c.bf16 %v507_v59, %v505_v55 }
  0xd9   :  { %1103 = vst [vmem:[%s1541_s4 + $0x18] sm:$0xff] %v928_v60  }
  0xda   :  { %1111 = vst [vmem:[%s1541_s4 + $0x58] sm:$0xff] %v968_v61  }
  0xdd   :  { %v547_v62 = vpop.f32.mrf.mxu2  ;;  %v587_v63 = vpop.f32.mrf.mxu3 }
  0xde   :  { %v1008_v0 = vpack.c.bf16 %v547_v62, %v545_v56  ;;  %v1048_v1 = vpack.c.bf16 %v587_v63, %v585_v57  ;;  %v470_v2 = vpop.f32.mrf.mxu0  ;;  %v510_v3 = vpop.f32.mrf.mxu1 }
  0xe0   :  { %1119 = vst [vmem:[%s1541_s4 + $0x98] sm:$0xff] %v1008_v0  }
  0xe1   :  { %1127 = vst [vmem:[%s1541_s4 + $0xd8] sm:$0xff] %v1048_v1  }
  0xe5   :  { %v550_v4 = vpop.f32.mrf.mxu2  ;;  %v590_v5 = vpop.f32.mrf.mxu3 }
  0xe6   :  { %v472_v6 = vpop.f32.mrf.mxu0  ;;  %v512_v7 = vpop.f32.mrf.mxu1 }
  0xe7   :  { %v933_v8 = vpack.c.bf16 %v472_v6, %v470_v2  ;;  %v973_v10 = vpack.c.bf16 %v512_v7, %v510_v3 }
  0xe9   :  { %1104 = vst [vmem:[%s1541_s4 + $0x20] sm:$0xff] %v933_v8  }
  0xea   :  { %1112 = vst [vmem:[%s1541_s4 + $0x60] sm:$0xff] %v973_v10  }
  0xed   :  { %v552_v9 = vpop.f32.mrf.mxu2  ;;  %v592_v11 = vpop.f32.mrf.mxu3 }
  0xee   :  { %v1013_v12 = vpack.c.bf16 %v552_v9, %v550_v4  ;;  %v1053_v13 = vpack.c.bf16 %v592_v11, %v590_v5  ;;  %v475_v14 = vpop.f32.mrf.mxu0  ;;  %v515_v15 = vpop.f32.mrf.mxu1 }
  0xf0   :  { %1120 = vst [vmem:[%s1541_s4 + $0xa0] sm:$0xff] %v1013_v12  }
  0xf1   :  { %1128 = vst [vmem:[%s1541_s4 + $0xe0] sm:$0xff] %v1053_v13  }
  0xf5   :  { %v555_v16 = vpop.f32.mrf.mxu2  ;;  %v595_v17 = vpop.f32.mrf.mxu3 }
  0xf6   :  { %v477_v18 = vpop.f32.mrf.mxu0  ;;  %v517_v19 = vpop.f32.mrf.mxu1 }
  0xf7   :  { %v938_v21 = vpack.c.bf16 %v477_v18, %v475_v14  ;;  %v978_v20 = vpack.c.bf16 %v517_v19, %v515_v15 }
  0xf9   :  { %1105 = vst [vmem:[%s1541_s4 + $0x28] sm:$0xff] %v938_v21  }
  0xfa   :  { %1113 = vst [vmem:[%s1541_s4 + $0x68] sm:$0xff] %v978_v20  }
  0xfd   :  { %v557_v22 = vpop.f32.mrf.mxu2  ;;  %v597_v23 = vpop.f32.mrf.mxu3 }
  0xfe   :  { %v1018_v24 = vpack.c.bf16 %v557_v22, %v555_v16  ;;  %v1058_v25 = vpack.c.bf16 %v597_v23, %v595_v17  ;;  %v480_v26 = vpop.f32.mrf.mxu0  ;;  %v520_v27 = vpop.f32.mrf.mxu1 }
 0x100   :  { %1121 = vst [vmem:[%s1541_s4 + $0xa8] sm:$0xff] %v1018_v24  }
 0x101   :  { %1129 = vst [vmem:[%s1541_s4 + $0xe8] sm:$0xff] %v1058_v25  }
 0x105   :  { %v560_v28 = vpop.f32.mrf.mxu2  ;;  %v600_v29 = vpop.f32.mrf.mxu3 }
 0x106   :  { %v482_v30 = vpop.f32.mrf.mxu0  ;;  %v522_v31 = vpop.f32.mrf.mxu1 }
 0x107   :  { %v943_v32 = vpack.c.bf16 %v482_v30, %v480_v26  ;;  %v983_v33 = vpack.c.bf16 %v522_v31, %v520_v27 }
 0x109   :  { %1106 = vst [vmem:[%s1541_s4 + $0x30] sm:$0xff] %v943_v32  }
 0x10a   :  { %1114 = vst [vmem:[%s1541_s4 + $0x70] sm:$0xff] %v983_v33  }
 0x10d   :  { %v562_v34 = vpop.f32.mrf.mxu2  ;;  %v602_v35 = vpop.f32.mrf.mxu3 }
 0x10e   :  { %v1023_v36 = vpack.c.bf16 %v562_v34, %v560_v28  ;;  %v1063_v37 = vpack.c.bf16 %v602_v35, %v600_v29  ;;  %v485_v38 = vpop.f32.mrf.mxu0  ;;  %v525_v39 = vpop.f32.mrf.mxu1 }
 0x110   :  { %1122 = vst [vmem:[%s1541_s4 + $0xb0] sm:$0xff] %v1023_v36  }
 0x111   :  { %1130 = vst [vmem:[%s1541_s4 + $0xf0] sm:$0xff] %v1063_v37  }
 0x115   :  { %v565_v40 = vpop.f32.mrf.mxu2  ;;  %v605_v41 = vpop.f32.mrf.mxu3 }
 0x116   :  { %v487_v42 = vpop.f32.mrf.mxu0  ;;  %v527_v43 = vpop.f32.mrf.mxu1 }
 0x117   :  { %v948_v44 = vpack.c.bf16 %v487_v42, %v485_v38  ;;  %v988_v45 = vpack.c.bf16 %v527_v43, %v525_v39 }
 0x119   :  { %1107 = vst [vmem:[%s1541_s4 + $0x38] sm:$0xff] %v948_v44  }
 0x11a   :  { %1115 = vst [vmem:[%s1541_s4 + $0x78] sm:$0xff] %v988_v45  }
 0x11d   :  { %v567_v46 = vpop.f32.mrf.mxu2  ;;  %v607_v47 = vpop.f32.mrf.mxu3 }
 0x11e   :  { %v1028_v48 = vpack.c.bf16 %v567_v46, %v565_v40  ;;  %v1068_v49 = vpack.c.bf16 %v607_v47, %v605_v41 }
 0x120   :  { %1123 = vst [vmem:[%s1541_s4 + $0xb8] sm:$0xff] %v1028_v48  }
 0x121   :  { %1131 = vst [vmem:[%s1541_s4 + $0xf8] sm:$0xff] %v1068_v49  }

// kernel: generator_forward.17
= control target key start
LH: loop header
LB: loop body
LE: loop exit
PB: predicated region body
PF: predicated region fallthrough
CT: control target
= control target key end

     0   :  { %s754_s9 = smov 0   ;;  %s813_s0 = inlined_call_operand.vmem [shape: bf16[2048,128], index: 0, kind: input, shape index: {}]   ;;  %s814_s1 = inlined_call_operand.vmem [shape: f32[4,1,128], index: 1, kind: output, shape index: {0}]   ;;  %s815_s2 = inlined_call_operand.vmem [shape: f32[4,1,128], index: 2, kind: output, shape index: {1}]  }
   0x1 LB: > { %s760_s10 = sadd.s32 4294967295, %s737_s9   ;;  %p559_p0 = scmp.ge.s32.totalorder %s737_s9, 1  ;;  %s737_s9 = sphi %s754_s9, %s13_s9  }
   0x2   : > { %p116_p1 = scmp.lt.s32.totalorder %s737_s9, 5 }
   0x4   : > { %p117_p2 = pnand %p559_p0, %p116_p1 }
   0x5   : > { %s560_s11 = sshll.u32 (!%p117_p2), %s760_s10, 6  ;;  %p145_p4 = scmp.lt.s32.totalorder (!%p117_p2), %s760_s10, 3 }
   0x6   : > { %120 = sbr.rel (%p117_p2) target bundleno = 158 (0x9e), region = 24  ;;  %p140_p3 = scmp.lt.s32.totalorder (!%p117_p2), %s560_s11, 255 }
   0xb   : > { %s817_s11 = smov (!%p140_p3, %s560_s11), 255  ;;  %s819_s10 = smov (!%p145_p4, %s760_s10), 3 }
   0xc   : > { %s561_s12 = sshll.u32 %s817_s11, 2  ;;  %s147_s18 = scalar_lea.vmem %s814_s1, %s819_s10 }
   0xd   : > { %s768_s15 = scalar_lea.vmem %s813_s0, %s561_s12  ;;  %s150_s21 = scalar_lea.vmem %s815_s2, %s819_s10 }
   0xe   : > { %v565_v0 = vld [vmem:[%s768_s15] sm:$0xff]   ;;  %v692_v1 = vld [vmem:[%s768_s15 + $0x8] sm:$0xff]   ;;  %v693_v5 = vld [vmem:[%s768_s15 + $0x10] sm:$0xff]  }
   0xf   : > { %v566_v2 = vunpack.c.l.bf16 %v565_v0  ;;  %v567_v3 = vunpack.c.h.bf16 %v565_v0  ;;  %v570_v4 = vunpack.c.l.bf16 %v692_v1  ;;  %v571_v7 = vunpack.c.h.bf16 %v692_v1  ;;  %v694_v13 = vld [vmem:[%s768_s15 + $0x18] sm:$0xff]   ;;  %v695_v22 = vld [vmem:[%s768_s15 + $0x20] sm:$0xff]   ;;  %v696_v31 = vld [vmem:[%s768_s15 + $0x28] sm:$0xff]  }
  0x10   : > { %v574_v11 = vunpack.c.l.bf16 %v693_v5  ;;  %v575_v15 = vunpack.c.h.bf16 %v693_v5  ;;  %v578_v19 = vunpack.c.l.bf16 %v694_v13  ;;  %v579_v24 = vunpack.c.h.bf16 %v694_v13  ;;  %v697_v40 = vld [vmem:[%s768_s15 + $0x30] sm:$0xff]   ;;  %v698_v49 = vld [vmem:[%s768_s15 + $0x38] sm:$0xff]   ;;  %v699_v58 = vld [vmem:[%s768_s15 + $0x40] sm:$0xff]  }
  0x11   : > { %v279_v6 = vadd.f32 %v567_v3, %v566_v2  ;;  %v349_v8 = vmul.f32 %v566_v2, %v566_v2  ;;  %v350_v9 = vmul.f32 %v567_v3, %v567_v3  ;;  %v351_v12 = vmul.f32 %v570_v4, %v570_v4  ;;  %v700_v3 = vld [vmem:[%s768_s15 + $0x48] sm:$0xff]  }
  0x12   : > { %v352_v16 = vmul.f32 %v571_v7, %v571_v7  ;;  %v353_v20 = vmul.f32 %v574_v11, %v574_v11  ;;  %v354_v25 = vmul.f32 %v575_v15, %v575_v15  ;;  %v582_v28 = vunpack.c.l.bf16 %v695_v22 }
  0x13   : > { %v280_v10 = vadd.f32 %v570_v4, %v279_v6  ;;  %v413_v17 = vadd.f32 %v350_v9, %v349_v8  ;;  %v355_v29 = vmul.f32 %v578_v19, %v578_v19  ;;  %v583_v33 = vunpack.c.h.bf16 %v695_v22 }
  0x14   : > { %v356_v34 = vmul.f32 %v579_v24, %v579_v24  ;;  %v586_v37 = vunpack.c.l.bf16 %v696_v31  ;;  %v357_v38 = vmul.f32 %v582_v28, %v582_v28  ;;  %v587_v42 = vunpack.c.h.bf16 %v696_v31 }
  0x15   : > { %v281_v14 = vadd.f32 %v571_v7, %v280_v10  ;;  %v414_v21 = vadd.f32 %v413_v17, %v351_v12  ;;  %v358_v43 = vmul.f32 %v583_v33, %v583_v33  ;;  %v590_v46 = vunpack.c.l.bf16 %v697_v40  ;;  %v701_v12 = vld [vmem:[%s768_s15 + $0x50] sm:$0xff]  }
  0x16   : > { %v359_v47 = vmul.f32 %v586_v37, %v586_v37  ;;  %v591_v51 = vunpack.c.h.bf16 %v697_v40  ;;  %v360_v52 = vmul.f32 %v587_v42, %v587_v42  ;;  %v594_v55 = vunpack.c.l.bf16 %v698_v49 }
  0x17   : > { %v282_v18 = vadd.f32 %v574_v11, %v281_v14  ;;  %v415_v26 = vadd.f32 %v414_v21, %v352_v16  ;;  %v361_v56 = vmul.f32 %v590_v46, %v590_v46  ;;  %v595_v60 = vunpack.c.h.bf16 %v698_v49  ;;  %v702_v21 = vld [vmem:[%s768_s15 + $0x58] sm:$0xff]  }
  0x18   : > { %v362_v61 = vmul.f32 %v591_v51, %v591_v51  ;;  %v598_v0 = vunpack.c.l.bf16 %v699_v58  ;;  %v363_v1 = vmul.f32 %v594_v55, %v594_v55  ;;  %v599_v5 = vunpack.c.h.bf16 %v699_v58 }
  0x19   : > { %v283_v23 = vadd.f32 %v575_v15, %v282_v18  ;;  %v416_v30 = vadd.f32 %v415_v26, %v353_v20  ;;  %v364_v6 = vmul.f32 %v595_v60, %v595_v60  ;;  %v602_v9 = vunpack.c.l.bf16 %v700_v3 }
  0x1a   : > { %v365_v10 = vmul.f32 %v598_v0, %v598_v0  ;;  %v603_v14 = vunpack.c.h.bf16 %v700_v3  ;;  %v366_v15 = vmul.f32 %v599_v5, %v599_v5  ;;  %v606_v18 = vunpack.c.l.bf16 %v701_v12 }
  0x1b   : > { %v284_v27 = vadd.f32 %v578_v19, %v283_v23  ;;  %v417_v35 = vadd.f32 %v416_v30, %v354_v25  ;;  %v367_v19 = vmul.f32 %v602_v9, %v602_v9  ;;  %v607_v23 = vunpack.c.h.bf16 %v701_v12  ;;  %v703_v30 = vld [vmem:[%s768_s15 + $0x60] sm:$0xff]  }
  0x1d   : > { %v285_v32 = vadd.f32 %v579_v24, %v284_v27  ;;  %v418_v39 = vadd.f32 %v417_v35, %v355_v29  ;;  %v368_v24 = vmul.f32 %v603_v14, %v603_v14  ;;  %v610_v27 = vunpack.c.l.bf16 %v702_v21 }
  0x1f   : > { %v286_v36 = vadd.f32 %v582_v28, %v285_v32  ;;  %v419_v44 = vadd.f32 %v418_v39, %v356_v34  ;;  %v369_v28 = vmul.f32 %v606_v18, %v606_v18  ;;  %v611_v32 = vunpack.c.h.bf16 %v702_v21  ;;  %v704_v39 = vld [vmem:[%s768_s15 + $0x68] sm:$0xff]  }
  0x21   : > { %v287_v41 = vadd.f32 %v583_v33, %v286_v36  ;;  %v420_v48 = vadd.f32 %v419_v44, %v357_v38  ;;  %v370_v33 = vmul.f32 %v607_v23, %v607_v23  ;;  %v614_v36 = vunpack.c.l.bf16 %v703_v30 }
  0x23   : > { %v288_v45 = vadd.f32 %v586_v37, %v287_v41  ;;  %v421_v53 = vadd.f32 %v420_v48, %v358_v43  ;;  %v371_v37 = vmul.f32 %v610_v27, %v610_v27  ;;  %v615_v41 = vunpack.c.h.bf16 %v703_v30  ;;  %v705_v48 = vld [vmem:[%s768_s15 + $0x70] sm:$0xff]  }
  0x25   : > { %v289_v50 = vadd.f32 %v587_v42, %v288_v45  ;;  %v422_v57 = vadd.f32 %v421_v53, %v359_v47  ;;  %v372_v42 = vmul.f32 %v611_v32, %v611_v32  ;;  %v618_v45 = vunpack.c.l.bf16 %v704_v39 }
  0x27   : > { %v290_v54 = vadd.f32 %v590_v46, %v289_v50  ;;  %v423_v62 = vadd.f32 %v422_v57, %v360_v52  ;;  %v373_v46 = vmul.f32 %v614_v36, %v614_v36  ;;  %v619_v50 = vunpack.c.h.bf16 %v704_v39  ;;  %v706_v57 = vld [vmem:[%s768_s15 + $0x78] sm:$0xff]  }
  0x29   : > { %v291_v59 = vadd.f32 %v591_v51, %v290_v54  ;;  %v424_v2 = vadd.f32 %v423_v62, %v361_v56  ;;  %v374_v51 = vmul.f32 %v615_v41, %v615_v41  ;;  %v622_v54 = vunpack.c.l.bf16 %v705_v48 }
  0x2b   : > { %v292_v63 = vadd.f32 %v594_v55, %v291_v59  ;;  %v425_v7 = vadd.f32 %v424_v2, %v362_v61  ;;  %v375_v55 = vmul.f32 %v618_v45, %v618_v45  ;;  %v623_v59 = vunpack.c.h.bf16 %v705_v48  ;;  %v707_v2 = vld [vmem:[%s768_s15 + $0x80] sm:$0xff]  }
  0x2d   : > { %v293_v4 = vadd.f32 %v595_v60, %v292_v63  ;;  %v426_v11 = vadd.f32 %v425_v7, %v363_v1  ;;  %v376_v60 = vmul.f32 %v619_v50, %v619_v50  ;;  %v626_v63 = vunpack.c.l.bf16 %v706_v57 }
  0x2f   : > { %v294_v8 = vadd.f32 %v598_v0, %v293_v4  ;;  %v427_v16 = vadd.f32 %v426_v11, %v364_v6  ;;  %v377_v0 = vmul.f32 %v622_v54, %v622_v54  ;;  %v627_v4 = vunpack.c.h.bf16 %v706_v57  ;;  %v708_v11 = vld [vmem:[%s768_s15 + $0x88] sm:$0xff]  }
  0x31   : > { %v295_v13 = vadd.f32 %v599_v5, %v294_v8  ;;  %v428_v20 = vadd.f32 %v427_v16, %v365_v10  ;;  %v378_v5 = vmul.f32 %v623_v59, %v623_v59  ;;  %v630_v8 = vunpack.c.l.bf16 %v707_v2 }
  0x33   : > { %v296_v17 = vadd.f32 %v602_v9, %v295_v13  ;;  %v429_v25 = vadd.f32 %v428_v20, %v366_v15  ;;  %v379_v9 = vmul.f32 %v626_v63, %v626_v63  ;;  %v631_v13 = vunpack.c.h.bf16 %v707_v2  ;;  %v709_v20 = vld [vmem:[%s768_s15 + $0x90] sm:$0xff]  }
  0x35   : > { %v297_v22 = vadd.f32 %v603_v14, %v296_v17  ;;  %v430_v29 = vadd.f32 %v429_v25, %v367_v19  ;;  %v380_v14 = vmul.f32 %v627_v4, %v627_v4  ;;  %v634_v17 = vunpack.c.l.bf16 %v708_v11 }
  0x37   : > { %v298_v26 = vadd.f32 %v606_v18, %v297_v22  ;;  %v431_v34 = vadd.f32 %v430_v29, %v368_v24  ;;  %v381_v18 = vmul.f32 %v630_v8, %v630_v8  ;;  %v635_v22 = vunpack.c.h.bf16 %v708_v11  ;;  %v710_v29 = vld [vmem:[%s768_s15 + $0x98] sm:$0xff]  }
  0x39   : > { %v299_v31 = vadd.f32 %v607_v23, %v298_v26  ;;  %v432_v38 = vadd.f32 %v431_v34, %v369_v28  ;;  %v382_v23 = vmul.f32 %v631_v13, %v631_v13  ;;  %v638_v26 = vunpack.c.l.bf16 %v709_v20 }
  0x3b   : > { %v300_v35 = vadd.f32 %v610_v27, %v299_v31  ;;  %v433_v43 = vadd.f32 %v432_v38, %v370_v33  ;;  %v383_v27 = vmul.f32 %v634_v17, %v634_v17  ;;  %v639_v31 = vunpack.c.h.bf16 %v709_v20  ;;  %v711_v38 = vld [vmem:[%s768_s15 + $0xa0] sm:$0xff]  }
  0x3d   : > { %v301_v40 = vadd.f32 %v611_v32, %v300_v35  ;;  %v434_v47 = vadd.f32 %v433_v43, %v371_v37  ;;  %v384_v32 = vmul.f32 %v635_v22, %v635_v22  ;;  %v642_v35 = vunpack.c.l.bf16 %v710_v29 }
  0x3f   : > { %v302_v44 = vadd.f32 %v614_v36, %v301_v40  ;;  %v435_v52 = vadd.f32 %v434_v47, %v372_v42  ;;  %v385_v36 = vmul.f32 %v638_v26, %v638_v26  ;;  %v643_v40 = vunpack.c.h.bf16 %v710_v29  ;;  %v712_v47 = vld [vmem:[%s768_s15 + $0xa8] sm:$0xff]  }
  0x41   : > { %v303_v49 = vadd.f32 %v615_v41, %v302_v44  ;;  %v436_v56 = vadd.f32 %v435_v52, %v373_v46  ;;  %v386_v41 = vmul.f32 %v639_v31, %v639_v31  ;;  %v646_v44 = vunpack.c.l.bf16 %v711_v38 }
  0x43   : > { %v304_v53 = vadd.f32 %v618_v45, %v303_v49  ;;  %v437_v61 = vadd.f32 %v436_v56, %v374_v51  ;;  %v387_v45 = vmul.f32 %v642_v35, %v642_v35  ;;  %v647_v49 = vunpack.c.h.bf16 %v711_v38  ;;  %v713_v56 = vld [vmem:[%s768_s15 + $0xb0] sm:$0xff]  }
  0x45   : > { %v305_v58 = vadd.f32 %v619_v50, %v304_v53  ;;  %v438_v1 = vadd.f32 %v437_v61, %v375_v55  ;;  %v388_v50 = vmul.f32 %v643_v40, %v643_v40  ;;  %v650_v53 = vunpack.c.l.bf16 %v712_v47 }
  0x47   : > { %v306_v62 = vadd.f32 %v622_v54, %v305_v58  ;;  %v439_v6 = vadd.f32 %v438_v1, %v376_v60  ;;  %v389_v54 = vmul.f32 %v646_v44, %v646_v44  ;;  %v651_v58 = vunpack.c.h.bf16 %v712_v47  ;;  %v714_v1 = vld [vmem:[%s768_s15 + $0xb8] sm:$0xff]  }
  0x49   : > { %v307_v3 = vadd.f32 %v623_v59, %v306_v62  ;;  %v440_v10 = vadd.f32 %v439_v6, %v377_v0  ;;  %v390_v59 = vmul.f32 %v647_v49, %v647_v49  ;;  %v654_v62 = vunpack.c.l.bf16 %v713_v56 }
  0x4b   : > { %v308_v7 = vadd.f32 %v626_v63, %v307_v3  ;;  %v441_v15 = vadd.f32 %v440_v10, %v378_v5  ;;  %v391_v63 = vmul.f32 %v650_v53, %v650_v53  ;;  %v655_v3 = vunpack.c.h.bf16 %v713_v56  ;;  %v715_v10 = vld [vmem:[%s768_s15 + $0xc0] sm:$0xff]  }
  0x4d   : > { %v309_v12 = vadd.f32 %v627_v4, %v308_v7  ;;  %v442_v19 = vadd.f32 %v441_v15, %v379_v9  ;;  %v392_v4 = vmul.f32 %v651_v58, %v651_v58  ;;  %v658_v7 = vunpack.c.l.bf16 %v714_v1 }
  0x4f   : > { %v310_v16 = vadd.f32 %v630_v8, %v309_v12  ;;  %v443_v24 = vadd.f32 %v442_v19, %v380_v14  ;;  %v393_v8 = vmul.f32 %v654_v62, %v654_v62  ;;  %v659_v12 = vunpack.c.h.bf16 %v714_v1  ;;  %v716_v19 = vld [vmem:[%s768_s15 + $0xc8] sm:$0xff]  }
  0x51   : > { %v311_v21 = vadd.f32 %v631_v13, %v310_v16  ;;  %v444_v28 = vadd.f32 %v443_v24, %v381_v18  ;;  %v394_v13 = vmul.f32 %v655_v3, %v655_v3  ;;  %v662_v16 = vunpack.c.l.bf16 %v715_v10 }
  0x53   : > { %v312_v25 = vadd.f32 %v634_v17, %v311_v21  ;;  %v445_v33 = vadd.f32 %v444_v28, %v382_v23  ;;  %v395_v17 = vmul.f32 %v658_v7, %v658_v7  ;;  %v663_v21 = vunpack.c.h.bf16 %v715_v10  ;;  %v717_v28 = vld [vmem:[%s768_s15 + $0xd0] sm:$0xff]  }
  0x55   : > { %v313_v30 = vadd.f32 %v635_v22, %v312_v25  ;;  %v446_v37 = vadd.f32 %v445_v33, %v383_v27  ;;  %v396_v22 = vmul.f32 %v659_v12, %v659_v12  ;;  %v666_v25 = vunpack.c.l.bf16 %v716_v19 }
  0x57   : > { %v314_v34 = vadd.f32 %v638_v26, %v313_v30  ;;  %v447_v42 = vadd.f32 %v446_v37, %v384_v32  ;;  %v397_v26 = vmul.f32 %v662_v16, %v662_v16  ;;  %v667_v30 = vunpack.c.h.bf16 %v716_v19  ;;  %v718_v37 = vld [vmem:[%s768_s15 + $0xd8] sm:$0xff]  }
  0x59   : > { %v315_v39 = vadd.f32 %v639_v31, %v314_v34  ;;  %v448_v46 = vadd.f32 %v447_v42, %v385_v36  ;;  %v398_v31 = vmul.f32 %v663_v21, %v663_v21  ;;  %v670_v34 = vunpack.c.l.bf16 %v717_v28 }
  0x5b   : > { %v316_v43 = vadd.f32 %v642_v35, %v315_v39  ;;  %v449_v51 = vadd.f32 %v448_v46, %v386_v41  ;;  %v399_v35 = vmul.f32 %v666_v25, %v666_v25  ;;  %v671_v39 = vunpack.c.h.bf16 %v717_v28  ;;  %v719_v46 = vld [vmem:[%s768_s15 + $0xe0] sm:$0xff]  }
  0x5d   : > { %v317_v48 = vadd.f32 %v643_v40, %v316_v43  ;;  %v450_v55 = vadd.f32 %v449_v51, %v387_v45  ;;  %v400_v40 = vmul.f32 %v667_v30, %v667_v30  ;;  %v674_v43 = vunpack.c.l.bf16 %v718_v37 }
  0x5f   : > { %v318_v52 = vadd.f32 %v646_v44, %v317_v48  ;;  %v451_v60 = vadd.f32 %v450_v55, %v388_v50  ;;  %v401_v44 = vmul.f32 %v670_v34, %v670_v34  ;;  %v675_v48 = vunpack.c.h.bf16 %v718_v37  ;;  %v720_v55 = vld [vmem:[%s768_s15 + $0xe8] sm:$0xff]  }
  0x61   : > { %v319_v57 = vadd.f32 %v647_v49, %v318_v52  ;;  %v452_v0 = vadd.f32 %v451_v60, %v389_v54  ;;  %v402_v49 = vmul.f32 %v671_v39, %v671_v39  ;;  %v678_v52 = vunpack.c.l.bf16 %v719_v46 }
  0x63   : > { %v320_v61 = vadd.f32 %v650_v53, %v319_v57  ;;  %v453_v5 = vadd.f32 %v452_v0, %v390_v59  ;;  %v403_v53 = vmul.f32 %v674_v43, %v674_v43  ;;  %v679_v57 = vunpack.c.h.bf16 %v719_v46  ;;  %v721_v0 = vld [vmem:[%s768_s15 + $0xf0] sm:$0xff]  }
  0x65   : > { %v321_v2 = vadd.f32 %v651_v58, %v320_v61  ;;  %v454_v9 = vadd.f32 %v453_v5, %v391_v63  ;;  %v404_v58 = vmul.f32 %v675_v48, %v675_v48  ;;  %v682_v61 = vunpack.c.l.bf16 %v720_v55 }
  0x67   : > { %v322_v6 = vadd.f32 %v654_v62, %v321_v2  ;;  %v455_v14 = vadd.f32 %v454_v9, %v392_v4  ;;  %v405_v62 = vmul.f32 %v678_v52, %v678_v52  ;;  %v683_v2 = vunpack.c.h.bf16 %v720_v55  ;;  %v722_v9 = vld [vmem:[%s768_s15 + $0xf8] sm:$0xff]  }
  0x68   : > { %v691_v19 = vunpack.c.h.bf16 %v722_v9 }
  0x69   : > { %v323_v11 = vadd.f32 %v655_v3, %v322_v6  ;;  %v456_v18 = vadd.f32 %v455_v14, %v393_v8  ;;  %v406_v3 = vmul.f32 %v679_v57, %v679_v57  ;;  %v686_v6 = vunpack.c.l.bf16 %v721_v0 }
  0x6b   : > { %v324_v15 = vadd.f32 %v658_v7, %v323_v11  ;;  %v457_v23 = vadd.f32 %v456_v18, %v394_v13  ;;  %v407_v7 = vmul.f32 %v682_v61, %v682_v61  ;;  %v687_v11 = vunpack.c.h.bf16 %v721_v0 }
  0x6d   : > { %v325_v20 = vadd.f32 %v659_v12, %v324_v15  ;;  %v458_v27 = vadd.f32 %v457_v23, %v395_v17  ;;  %v408_v12 = vmul.f32 %v683_v2, %v683_v2  ;;  %v690_v15 = vunpack.c.l.bf16 %v722_v9 }
  0x6f   : > { %v326_v24 = vadd.f32 %v662_v16, %v325_v20  ;;  %v459_v32 = vadd.f32 %v458_v27, %v396_v22  ;;  %v409_v16 = vmul.f32 %v686_v6, %v686_v6  ;;  %v410_v20 = vmul.f32 %v687_v11, %v687_v11 }
  0x70   : > { %v411_v23 = vmul.f32 %v690_v15, %v690_v15 }
  0x71   : > { %v327_v29 = vadd.f32 %v663_v21, %v326_v24  ;;  %v460_v36 = vadd.f32 %v459_v32, %v397_v26  ;;  %v412_v26 = vmul.f32 %v691_v19, %v691_v19 }
  0x73   : > { %v328_v33 = vadd.f32 %v666_v25, %v327_v29  ;;  %v461_v41 = vadd.f32 %v460_v36, %v398_v31 }
  0x75   : > { %v329_v38 = vadd.f32 %v667_v30, %v328_v33  ;;  %v462_v45 = vadd.f32 %v461_v41, %v399_v35 }
  0x77   : > { %v330_v42 = vadd.f32 %v670_v34, %v329_v38  ;;  %v463_v50 = vadd.f32 %v462_v45, %v400_v40 }
  0x79   : > { %v331_v47 = vadd.f32 %v671_v39, %v330_v42  ;;  %v464_v54 = vadd.f32 %v463_v50, %v401_v44 }
  0x7b   : > { %v332_v51 = vadd.f32 %v674_v43, %v331_v47  ;;  %v465_v59 = vadd.f32 %v464_v54, %v402_v49 }
  0x7d   : > { %v333_v56 = vadd.f32 %v675_v48, %v332_v51  ;;  %v466_v63 = vadd.f32 %v465_v59, %v403_v53 }
  0x7f   : > { %v334_v60 = vadd.f32 %v678_v52, %v333_v56  ;;  %v467_v4 = vadd.f32 %v466_v63, %v404_v58 }
  0x81   : > { %v335_v1 = vadd.f32 %v679_v57, %v334_v60  ;;  %v468_v8 = vadd.f32 %v467_v4, %v405_v62 }
  0x83   : > { %v336_v5 = vadd.f32 %v682_v61, %v335_v1  ;;  %v469_v13 = vadd.f32 %v468_v8, %v406_v3 }
  0x85   : > { %v337_v10 = vadd.f32 %v683_v2, %v336_v5  ;;  %v470_v17 = vadd.f32 %v469_v13, %v407_v7 }
  0x87   : > { %v338_v14 = vadd.f32 %v686_v6, %v337_v10  ;;  %v471_v21 = vadd.f32 %v470_v17, %v408_v12 }
  0x89   : > { %v339_v18 = vadd.f32 %v687_v11, %v338_v14  ;;  %v472_v24 = vadd.f32 %v471_v21, %v409_v16 }
  0x8b   : > { %v340_v22 = vadd.f32 %v690_v15, %v339_v18  ;;  %v473_v27 = vadd.f32 %v472_v24, %v410_v20 }
  0x8d   : > { %v341_v25 = vadd.f32 %v691_v19, %v340_v22  ;;  %v474_v29 = vadd.f32 %v473_v27, %v411_v23 }
  0x8f   : > { %v342_v28 = vrot.slane %v341_v25, 4  ;;  %v475_v31 = vadd.f32 %v474_v29, %v412_v26 }
  0x91   : > { %v343_v30 = vadd.f32 %v342_v28, %v341_v25  ;;  %v476_v33 = vrot.slane %v475_v31, 4 }
  0x93   : > { %v344_v32 = vrot.slane %v343_v30, 2  ;;  %v477_v35 = vadd.f32 %v476_v33, %v475_v31 }
  0x95   : > { %v345_v34 = vadd.f32 %v344_v32, %v343_v30  ;;  %v478_v37 = vrot.slane %v477_v35, 2 }
  0x97   : > { %v346_v36 = vrot.slane %v345_v34, 1  ;;  %v479_v39 = vadd.f32 %v478_v37, %v477_v35 }
  0x99   : > { %v347_v38 = vadd.f32 %v346_v36, %v345_v34  ;;  %v480_v40 = vrot.slane %v479_v39, 1 }
  0x9b   : > { %348 = vst [vmem:[%s147_s18] sm:$0x1] %v347_v38  ;;  %v481_v41 = vadd.f32 %v480_v40, %v479_v39 }
  0x9d   : > { %482 = vst [vmem:[%s150_s21] sm:$0x1] %v481_v41 }
  0x9e PF: > { %s13_s9 = sadd.s32 1, %s737_s9  }
  0x9f   : > { %p10_p5 = scmp.ge.s32.totalorder %s13_s9, 6  }
  0xa1   :  { %12 = sbr.rel (!%p10_p5) target bundleno = 1 (0x1), region = 66 }

// kernel: generator_forward.18
= control target key start
LH: loop header
LB: loop body
LE: loop exit
PB: predicated region body
PF: predicated region fallthrough
CT: control target
= control target key end

     0   :  { %s1256_s15 = smov 0   ;;  %s1606_s0 = inlined_call_operand.vmem [shape: bf16[2048,128], index: 0, kind: input, shape index: {}]   ;;  %s1607_s1 = inlined_call_operand.vmem [shape: f32[1,128], index: 1, kind: input, shape index: {}]   ;;  %s1608_s2 = inlined_call_operand.vmem [shape: f32[1,128], index: 2, kind: input, shape index: {}]   ;;  %s1609_s3 = inlined_call_operand.vmem [shape: bf16[128,16], index: 3, kind: input, shape index: {}]   ;;  %s1610_s4 = inlined_call_operand.vmem [shape: bf16[2048,16], index: 4, kind: output, shape index: {}]  }
   0x1 LB: > { %s979_s16 = sadd.s32 4294967295, %s1229_s15   ;;  %p983_p0 = scmp.ge.s32.totalorder %s1229_s15, 1  ;;  %s1229_s15 = sphi %s1256_s15, %s14_s15  }
   0x2   : > { %p163_p1 = scmp.lt.s32.totalorder %s1229_s15, 5 }
   0x4   : > { %p164_p2 = pnand %p983_p0, %p163_p1 }
   0x5   : > { %s984_s19 = sshll.u32 (!%p164_p2), %s979_s16, 6 }
   0x6   : > { %167 = sbr.rel (%p164_p2) target bundleno = 300 (0x12c), region = 36  ;;  %p190_p3 = scmp.lt.s32.totalorder (!%p164_p2), %s984_s19, 255 }
   0xb   : > { %v1029_v0 = vld [vmem:[%s1609_s3 + $0x38] sm:$0xff]  ;;  %v1028_v1 = vld [vmem:[%s1609_s3 + $0x30] sm:$0xff]  ;;  %s1612_s19 = smov (!%p190_p3, %s984_s19), 255  ;;  %v1027_v2 = vld [vmem:[%s1609_s3 + $0x28] sm:$0xff]  ;;  %vm858_vm0 = vcmask 125952  }
   0xc   : > { %625 = vmatpush.bf16.msra.mxu0 %v1029_v0  ;;  %1189 = vmatpush.bf16.msra.mxu1 %v1029_v0  ;;  %s985_s22 = sshll.u32 %s1612_s19, 2  ;;  %v1026_v5 = vld [vmem:[%s1609_s3 + $0x20] sm:$0xff]  ;;  %v1025_v15 = vld [vmem:[%s1609_s3 + $0x18] sm:$0xff]  ;;  %v1024_v25 = vld [vmem:[%s1609_s3 + $0x10] sm:$0xff] }
   0xd   : > { %1190 = vmatpush.bf16.msra.mxu2 %v1029_v0  ;;  %1191 = vmatpush.bf16.msra.mxu3 %v1029_v0  ;;  %s1281_s27 = scalar_lea.vmem %s1606_s0, %s985_s22  ;;  %v1293_v10 = vld [vmem:[%s1607_s1] ss:$0 sm:$0xff]  ;;  %v1023_v34 = vld [vmem:[%s1609_s3 + $0x8] sm:$0xff]  ;;  %s1473_s20 = scalar_lea.vmem %s1610_s4, %s985_s22 }
   0xe   : > { %v1031_v3 = vld [vmem:[%s1281_s27] sm:$0xff]   ;;  %v1158_v43 = vld [vmem:[%s1281_s27 + $0x8] sm:$0xff]  }
   0xf   : > { %v1165_v4 = vld [vmem:[%s1281_s27 + $0x40] sm:$0xff]   ;;  %v1032_v8 = vunpack.c.l.bf16 %v1031_v3  ;;  %v1033_v9 = vunpack.c.h.bf16 %v1031_v3  ;;  %v1166_v47 = vld [vmem:[%s1281_s27 + $0x48] sm:$0xff]   ;;  %v1036_v52 = vunpack.c.l.bf16 %v1158_v43  ;;  %v1037_v53 = vunpack.c.h.bf16 %v1158_v43 }
  0x10   : > { %626 = vmatpush.bf16.msra.mxu0 %v1028_v1  ;;  %1192 = vmatpush.bf16.msra.mxu1 %v1028_v1  ;;  %v1173_v6 = vld [vmem:[%s1281_s27 + $0x80] sm:$0xff]   ;;  %v1064_v11 = vunpack.c.l.bf16 %v1165_v4  ;;  %v1065_v12 = vunpack.c.h.bf16 %v1165_v4  ;;  %v1174_v48 = vld [vmem:[%s1281_s27 + $0x88] sm:$0xff]   ;;  %v1068_v55 = vunpack.c.l.bf16 %v1166_v47  ;;  %v1069_v56 = vunpack.c.h.bf16 %v1166_v47 }
  0x11   : > { %1193 = vmatpush.bf16.msra.mxu2 %v1028_v1  ;;  %1194 = vmatpush.bf16.msra.mxu3 %v1028_v1  ;;  %v1181_v7 = vld [vmem:[%s1281_s27 + $0xc0] sm:$0xff]   ;;  %v1096_v13 = vunpack.c.l.bf16 %v1173_v6  ;;  %v1097_v14 = vunpack.c.h.bf16 %v1173_v6  ;;  %v333_v18 = vmul.f32 %v1293_v10, %v1032_v8  ;;  %v334_v19 = vmul.f32 %v1293_v10, %v1033_v9  ;;  %v1182_v49 = vld [vmem:[%s1281_s27 + $0xc8] sm:$0xff]  }
  0x12   : > { %v1128_v16 = vunpack.c.l.bf16 %v1181_v7  ;;  %v1129_v17 = vunpack.c.h.bf16 %v1181_v7  ;;  %v1303_v20 = vld [vmem:[%s1608_s2] ss:$0 sm:$0xff]  ;;  %v349_v21 = vmul.f32 %v1293_v10, %v1064_v11  ;;  %v350_v22 = vmul.f32 %v1293_v10, %v1065_v12 }
  0x13   : > { %v365_v23 = vmul.f32 %v1293_v10, %v1096_v13  ;;  %v366_v24 = vmul.f32 %v1293_v10, %v1097_v14  ;;  %v401_v28 = vadd.f32 %v1303_v20, %v333_v18  ;;  %v402_v29 = vadd.f32 %v1303_v20, %v334_v19  ;;  %v1022_v44 = vld [vmem:[%s1609_s3] sm:$0xff]  ;;  %v1159_v19 = vld [vmem:[%s1281_s27 + $0x10] sm:$0xff]  }
  0x14   : > { %627 = vmatpush.bf16.msra.mxu0 %v1027_v2  ;;  %1195 = vmatpush.bf16.msra.mxu1 %v1027_v2  ;;  %v381_v26 = vmul.f32 %v1293_v10, %v1128_v16  ;;  %v382_v27 = vmul.f32 %v1293_v10, %v1129_v17  ;;  %v417_v30 = vadd.f32 %v1303_v20, %v349_v21  ;;  %v1100_v57 = vunpack.c.l.bf16 %v1174_v48  ;;  %v1167_v21 = vld [vmem:[%s1281_s27 + $0x50] sm:$0xff]  }
  0x15   : > { %1196 = vmatpush.bf16.msra.mxu2 %v1027_v2  ;;  %1197 = vmatpush.bf16.msra.mxu3 %v1027_v2  ;;  %v418_v31 = vadd.f32 %v1303_v20, %v350_v22  ;;  %v433_v32 = vadd.f32 %v1303_v20, %v365_v23  ;;  %v434_v33 = vadd.f32 %v1303_v20, %v366_v24  ;;  %v465_v37 = vmax.f32 %v401_v28, 0.0 }
  0x16   : > { %v449_v35 = vadd.f32 %v1303_v20, %v381_v26  ;;  %v450_v36 = vadd.f32 %v1303_v20, %v382_v27  ;;  %v466_v38 = vmax.f32 %v402_v29, 0.0  ;;  %v481_v39 = vmax.f32 %v417_v30, 0.0  ;;  %v1175_v26 = vld [vmem:[%s1281_s27 + $0x90] sm:$0xff]  }
  0x17   : > { %v482_v40 = vmax.f32 %v418_v31, 0.0  ;;  %v497_v41 = vmax.f32 %v433_v32, 0.0  ;;  %v498_v42 = vmax.f32 %v434_v33, 0.0  ;;  %v1101_v59 = vunpack.c.h.bf16 %v1174_v48  ;;  %v1183_v27 = vld [vmem:[%s1281_s27 + $0xd0] sm:$0xff]  }
  0x18   : > { %628 = vmatpush.bf16.msra.mxu0 %v1026_v5  ;;  %1198 = vmatpush.bf16.msra.mxu1 %v1026_v5  ;;  %v513_v45 = vmax.f32 %v449_v35, 0.0  ;;  %v514_v46 = vmax.f32 %v450_v36, 0.0  ;;  %v529_v50 = vpack.c.bf16 %v466_v38, %v465_v37  ;;  %v1132_v60 = vunpack.c.l.bf16 %v1182_v49 }
  0x19   : > { %1199 = vmatpush.bf16.msra.mxu2 %v1026_v5  ;;  %1200 = vmatpush.bf16.msra.mxu3 %v1026_v5  ;;  %v537_v51 = vpack.c.bf16 %v482_v40, %v481_v39  ;;  %v545_v54 = vpack.c.bf16 %v498_v42, %v497_v41  ;;  %v1133_v61 = vunpack.c.h.bf16 %v1182_v49  ;;  %v335_v62 = vmul.f32 %v1293_v10, %v1036_v52 }
  0x1a   : > { %v553_v58 = vpack.c.bf16 %v514_v46, %v513_v45  ;;  %v336_v63 = vmul.f32 %v1293_v10, %v1037_v53  ;;  %v351_v0 = vmul.f32 %v1293_v10, %v1068_v55  ;;  %v352_v1 = vmul.f32 %v1293_v10, %v1069_v56 }
  0x1b   : > { %v367_v2 = vmul.f32 %v1293_v10, %v1100_v57  ;;  %v368_v3 = vmul.f32 %v1293_v10, %v1101_v59  ;;  %v383_v4 = vmul.f32 %v1293_v10, %v1132_v60  ;;  %v384_v5 = vmul.f32 %v1293_v10, %v1133_v61 }
  0x1c   : > { %629 = vmatpush.bf16.msra.mxu0 %v1025_v15  ;;  %1201 = vmatpush.bf16.msra.mxu1 %v1025_v15  ;;  %v403_v6 = vadd.f32 %v1303_v20, %v335_v62  ;;  %v404_v7 = vadd.f32 %v1303_v20, %v336_v63  ;;  %v419_v8 = vadd.f32 %v1303_v20, %v351_v0  ;;  %v1040_v28 = vunpack.c.l.bf16 %v1159_v19  ;;  %v1160_v62 = vld [vmem:[%s1281_s27 + $0x18] sm:$0xff]  }
  0x1d   : > { %1202 = vmatpush.bf16.msra.mxu2 %v1025_v15  ;;  %1203 = vmatpush.bf16.msra.mxu3 %v1025_v15  ;;  %v420_v9 = vadd.f32 %v1303_v20, %v352_v1  ;;  %v435_v11 = vadd.f32 %v1303_v20, %v367_v2  ;;  %v436_v12 = vadd.f32 %v1303_v20, %v368_v3  ;;  %v1041_v29 = vunpack.c.h.bf16 %v1159_v19  ;;  %v1168_v1 = vld [vmem:[%s1281_s27 + $0x58] sm:$0xff]  }
  0x1e   : > { %v451_v13 = vadd.f32 %v1303_v20, %v383_v4  ;;  %v452_v14 = vadd.f32 %v1303_v20, %v384_v5  ;;  %v467_v15 = vmax.f32 %v403_v6, 0.0  ;;  %v468_v16 = vmax.f32 %v404_v7, 0.0  ;;  %v1176_v2 = vld [vmem:[%s1281_s27 + $0x98] sm:$0xff]  }
  0x1f   : > { %v483_v17 = vmax.f32 %v419_v8, 0.0  ;;  %v484_v18 = vmax.f32 %v420_v9, 0.0  ;;  %v499_v22 = vmax.f32 %v435_v11, 0.0  ;;  %v500_v23 = vmax.f32 %v436_v12, 0.0  ;;  %v1184_v3 = vld [vmem:[%s1281_s27 + $0xd8] sm:$0xff]  }
  0x20   : > { %630 = vmatpush.bf16.msra.mxu0 %v1024_v25  ;;  %1204 = vmatpush.bf16.msra.mxu1 %v1024_v25  ;;  %v515_v24 = vmax.f32 %v451_v13, 0.0  ;;  %v1072_v30 = vunpack.c.l.bf16 %v1167_v21  ;;  %v1073_v31 = vunpack.c.h.bf16 %v1167_v21  ;;  %v530_v32 = vpack.c.bf16 %v468_v16, %v467_v15 }
  0x21   : > { %1205 = vmatpush.bf16.msra.mxu2 %v1024_v25  ;;  %1206 = vmatpush.bf16.msra.mxu3 %v1024_v25  ;;  %v516_v25 = vmax.f32 %v452_v14, 0.0  ;;  %v538_v33 = vpack.c.bf16 %v484_v18, %v483_v17  ;;  %v1105_v35 = vunpack.c.h.bf16 %v1175_v26  ;;  %v546_v36 = vpack.c.bf16 %v500_v23, %v499_v22 }
  0x22   : > { %v1136_v38 = vunpack.c.l.bf16 %v1183_v27  ;;  %v1137_v39 = vunpack.c.h.bf16 %v1183_v27  ;;  %v337_v40 = vmul.f32 %v1293_v10, %v1040_v28  ;;  %v338_v41 = vmul.f32 %v1293_v10, %v1041_v29 }
  0x23   : > { %v554_v37 = vpack.c.bf16 %v516_v25, %v515_v24  ;;  %v353_v42 = vmul.f32 %v1293_v10, %v1072_v30  ;;  %v354_v43 = vmul.f32 %v1293_v10, %v1073_v31  ;;  %v370_v45 = vmul.f32 %v1293_v10, %v1105_v35 }
  0x24   : > { %631 = vmatpush.bf16.msra.mxu0 %v1023_v34  ;;  %1207 = vmatpush.bf16.msra.mxu1 %v1023_v34  ;;  %v385_v46 = vmul.f32 %v1293_v10, %v1136_v38  ;;  %v386_v47 = vmul.f32 %v1293_v10, %v1137_v39  ;;  %v405_v48 = vadd.f32 %v1303_v20, %v337_v40  ;;  %v1044_v6 = vunpack.c.l.bf16 %v1160_v62  ;;  %v1161_v38 = vld [vmem:[%s1281_s27 + $0x20] sm:$0xff]  }
  0x25   : > { %1208 = vmatpush.bf16.msra.mxu2 %v1023_v34  ;;  %1209 = vmatpush.bf16.msra.mxu3 %v1023_v34  ;;  %v1104_v34 = vunpack.c.l.bf16 %v1175_v26  ;;  %v406_v49 = vadd.f32 %v1303_v20, %v338_v41  ;;  %v438_v53 = vadd.f32 %v1303_v20, %v370_v45  ;;  %v1045_v7 = vunpack.c.h.bf16 %v1160_v62  ;;  %v1169_v39 = vld [vmem:[%s1281_s27 + $0x60] sm:$0xff]  }
  0x26   : > { %v454_v55 = vadd.f32 %v1303_v20, %v386_v47  ;;  %v469_v56 = vmax.f32 %v405_v48, 0.0  ;;  %v1076_v9 = vunpack.c.l.bf16 %v1168_v1  ;;  %v1077_v11 = vunpack.c.h.bf16 %v1168_v1  ;;  %v1185_v45 = vld [vmem:[%s1281_s27 + $0xe0] sm:$0xff]  }
  0x27   : > { %v470_v57 = vmax.f32 %v406_v49, 0.0  ;;  %v502_v61 = vmax.f32 %v438_v53, 0.0  ;;  %v1108_v12 = vunpack.c.l.bf16 %v1176_v2  ;;  %v1109_v14 = vunpack.c.h.bf16 %v1176_v2 }
  0x28   : > { %632 = vmatpush.bf16.msra.mxu0 %v1022_v44  ;;  %1210 = vmatpush.bf16.msra.mxu1 %v1022_v44  ;;  %v518_v0 = vmax.f32 %v454_v55, 0.0  ;;  %v1140_v15 = vunpack.c.l.bf16 %v1184_v3  ;;  %v1141_v16 = vunpack.c.h.bf16 %v1184_v3  ;;  %v339_v17 = vmul.f32 %v1293_v10, %v1044_v6 }
  0x29   : > { %1211 = vmatpush.bf16.msra.mxu2 %v1022_v44  ;;  %1212 = vmatpush.bf16.msra.mxu3 %v1022_v44  ;;  %v369_v44 = vmul.f32 %v1293_v10, %v1104_v34  ;;  %v531_v4 = vpack.c.bf16 %v470_v57, %v469_v56  ;;  %v340_v18 = vmul.f32 %v1293_v10, %v1045_v7  ;;  %v1049_v47 = vunpack.c.h.bf16 %v1161_v38 }
  0x2a   : > { %v355_v19 = vmul.f32 %v1293_v10, %v1076_v9  ;;  %v356_v21 = vmul.f32 %v1293_v10, %v1077_v11  ;;  %v371_v22 = vmul.f32 %v1293_v10, %v1108_v12  ;;  %v372_v23 = vmul.f32 %v1293_v10, %v1109_v14 }
  0x2b   : > { %633 = vmatmul.bf16.vlgmr.msra.gmra.mxu0 %v529_v50  ;;  %673 = vmatmul.bf16.vlgmr.msra.gmra.mxu1 %v537_v51  ;;  %v421_v50 = vadd.f32 %v1303_v20, %v353_v42  ;;  %v422_v51 = vadd.f32 %v1303_v20, %v354_v43  ;;  %v437_v52 = vadd.f32 %v1303_v20, %v369_v44  ;;  %v1177_v44 = vld [vmem:[%s1281_s27 + $0xa0] sm:$0xff]   ;;  %v1080_v48 = vunpack.c.l.bf16 %v1169_v39 }
  0x2c   : > { %713 = vmatmul.bf16.vlgmr.msra.gmra.mxu2 %v545_v54  ;;  %753 = vmatmul.bf16.vlgmr.msra.gmra.mxu3 %v553_v58  ;;  %v453_v54 = vadd.f32 %v1303_v20, %v385_v46  ;;  %v387_v24 = vmul.f32 %v1293_v10, %v1140_v15  ;;  %v388_v25 = vmul.f32 %v1293_v10, %v1141_v16  ;;  %v1048_v46 = vunpack.c.l.bf16 %v1161_v38 }
  0x2d   : > { %v485_v58 = vmax.f32 %v421_v50, 0.0  ;;  %v486_v59 = vmax.f32 %v422_v51, 0.0  ;;  %v501_v60 = vmax.f32 %v437_v52, 0.0  ;;  %v407_v26 = vadd.f32 %v1303_v20, %v339_v17  ;;  %v1162_v17 = vld [vmem:[%s1281_s27 + $0x28] sm:$0xff]  }
  0x2e   : > { %v517_v63 = vmax.f32 %v453_v54, 0.0  ;;  %v408_v27 = vadd.f32 %v1303_v20, %v340_v18  ;;  %v423_v28 = vadd.f32 %v1303_v20, %v355_v19  ;;  %v424_v29 = vadd.f32 %v1303_v20, %v356_v21  ;;  %v1170_v21 = vld [vmem:[%s1281_s27 + $0x68] sm:$0xff]  }
  0x2f   : > { %v539_v5 = vpack.c.bf16 %v486_v59, %v485_v58  ;;  %v547_v8 = vpack.c.bf16 %v502_v61, %v501_v60  ;;  %v439_v30 = vadd.f32 %v1303_v20, %v371_v22  ;;  %v440_v31 = vadd.f32 %v1303_v20, %v372_v23  ;;  %v1178_v22 = vld [vmem:[%s1281_s27 + $0xa8] sm:$0xff]  }
  0x30   : > { %v555_v13 = vpack.c.bf16 %v518_v0, %v517_v63  ;;  %v471_v34 = vmax.f32 %v407_v26, 0.0  ;;  %v472_v35 = vmax.f32 %v408_v27, 0.0  ;;  %v1081_v49 = vunpack.c.h.bf16 %v1169_v39  ;;  %v1186_v23 = vld [vmem:[%s1281_s27 + $0xe8] sm:$0xff]  }
  0x31   : > { %v503_v40 = vmax.f32 %v439_v30, 0.0  ;;  %v504_v41 = vmax.f32 %v440_v31, 0.0  ;;  %v1112_v52 = vunpack.c.l.bf16 %v1177_v44  ;;  %v1113_v53 = vunpack.c.h.bf16 %v1177_v44 }
  0x32   : > { %v532_v50 = vpack.c.bf16 %v472_v35, %v471_v34  ;;  %v1144_v56 = vunpack.c.l.bf16 %v1185_v45  ;;  %v1145_v57 = vunpack.c.h.bf16 %v1185_v45  ;;  %v341_v58 = vmul.f32 %v1293_v10, %v1048_v46 }
  0x33   : > { %v548_v54 = vpack.c.bf16 %v504_v41, %v503_v40  ;;  %v342_v59 = vmul.f32 %v1293_v10, %v1049_v47  ;;  %v357_v60 = vmul.f32 %v1293_v10, %v1080_v48  ;;  %v358_v61 = vmul.f32 %v1293_v10, %v1081_v49 }
  0x34   : > { %v373_v62 = vmul.f32 %v1293_v10, %v1112_v52  ;;  %v374_v63 = vmul.f32 %v1293_v10, %v1113_v53  ;;  %v389_v0 = vmul.f32 %v1293_v10, %v1144_v56  ;;  %v390_v1 = vmul.f32 %v1293_v10, %v1145_v57  ;;  %v1163_v56 = vld [vmem:[%s1281_s27 + $0x30] sm:$0xff]  }
  0x35   : > { %v409_v2 = vadd.f32 %v1303_v20, %v341_v58  ;;  %v410_v3 = vadd.f32 %v1303_v20, %v342_v59  ;;  %v1052_v26 = vunpack.c.l.bf16 %v1162_v17  ;;  %v1053_v27 = vunpack.c.h.bf16 %v1162_v17  ;;  %v1171_v57 = vld [vmem:[%s1281_s27 + $0x70] sm:$0xff]  }
  0x36   : > { %v441_v6 = vadd.f32 %v1303_v20, %v373_v62  ;;  %v442_v7 = vadd.f32 %v1303_v20, %v374_v63  ;;  %v458_v9 = vadd.f32 %v1303_v20, %v390_v1  ;;  %v1085_v30 = vunpack.c.h.bf16 %v1170_v21  ;;  %v1179_v62 = vld [vmem:[%s1281_s27 + $0xb0] sm:$0xff]  }
  0x37   : > { %v473_v11 = vmax.f32 %v409_v2, 0.0  ;;  %v474_v12 = vmax.f32 %v410_v3, 0.0  ;;  %v1116_v31 = vunpack.c.l.bf16 %v1178_v22  ;;  %v1148_v34 = vunpack.c.l.bf16 %v1186_v23  ;;  %v1187_v63 = vld [vmem:[%s1281_s27 + $0xf0] sm:$0xff]  }
  0x38   : > { %v505_v15 = vmax.f32 %v441_v6, 0.0  ;;  %v506_v16 = vmax.f32 %v442_v7, 0.0  ;;  %v522_v19 = vmax.f32 %v458_v9, 0.0  ;;  %v1149_v35 = vunpack.c.h.bf16 %v1186_v23 }
  0x39   : > { %v360_v39 = vmul.f32 %v1293_v10, %v1085_v30  ;;  %v375_v40 = vmul.f32 %v1293_v10, %v1116_v31  ;;  %v1057_v1 = vunpack.c.h.bf16 %v1163_v56  ;;  %v1088_v2 = vunpack.c.l.bf16 %v1171_v57 }
  0x3a   : > { %v1089_v3 = vunpack.c.h.bf16 %v1171_v57  ;;  %v1120_v6 = vunpack.c.l.bf16 %v1179_v62  ;;  %v1121_v7 = vunpack.c.h.bf16 %v1179_v62 }
  0x3b   : > { %638 = vmatmul.bf16.gmra.mxu0 %v530_v32  ;;  %678 = vmatmul.bf16.gmra.mxu1 %v538_v33  ;;  %v455_v32 = vadd.f32 %v1303_v20, %v387_v24  ;;  %v456_v33 = vadd.f32 %v1303_v20, %v388_v25  ;;  %v533_v24 = vpack.c.bf16 %v474_v12, %v473_v11  ;;  %v1152_v11 = vunpack.c.l.bf16 %v1187_v63 }
  0x3c   : > { %718 = vmatmul.bf16.gmra.mxu2 %v546_v36  ;;  %758 = vmatmul.bf16.gmra.mxu3 %v554_v37  ;;  %v487_v36 = vmax.f32 %v423_v28, 0.0  ;;  %v488_v37 = vmax.f32 %v424_v29, 0.0  ;;  %v549_v28 = vpack.c.bf16 %v506_v16, %v505_v15  ;;  %v1084_v29 = vunpack.c.l.bf16 %v1170_v21 }
  0x3d   : > { %v519_v42 = vmax.f32 %v455_v32, 0.0  ;;  %v520_v43 = vmax.f32 %v456_v33, 0.0  ;;  %v1117_v33 = vunpack.c.h.bf16 %v1178_v22  ;;  %v428_v47 = vadd.f32 %v1303_v20, %v360_v39  ;;  %v1172_v39 = vld [vmem:[%s1281_s27 + $0x78] sm:$0xff]  }
  0x3e   : > { %v540_v51 = vpack.c.bf16 %v488_v37, %v487_v36  ;;  %v343_v36 = vmul.f32 %v1293_v10, %v1052_v26  ;;  %v344_v37 = vmul.f32 %v1293_v10, %v1053_v27  ;;  %v359_v38 = vmul.f32 %v1293_v10, %v1084_v29 }
  0x3f   : > { %v556_v55 = vpack.c.bf16 %v520_v43, %v519_v42  ;;  %v376_v41 = vmul.f32 %v1293_v10, %v1117_v33  ;;  %v391_v42 = vmul.f32 %v1293_v10, %v1148_v34  ;;  %v392_v43 = vmul.f32 %v1293_v10, %v1149_v35 }
  0x40   : > { %v411_v44 = vadd.f32 %v1303_v20, %v343_v36  ;;  %v412_v45 = vadd.f32 %v1303_v20, %v344_v37  ;;  %v427_v46 = vadd.f32 %v1303_v20, %v359_v38  ;;  %v443_v48 = vadd.f32 %v1303_v20, %v375_v40  ;;  %v1164_v36 = vld [vmem:[%s1281_s27 + $0x38] sm:$0xff]  }
  0x41   : > { %v444_v49 = vadd.f32 %v1303_v20, %v376_v41  ;;  %v1153_v12 = vunpack.c.h.bf16 %v1187_v63  ;;  %v361_v15 = vmul.f32 %v1293_v10, %v1088_v2  ;;  %v362_v16 = vmul.f32 %v1293_v10, %v1089_v3  ;;  %v1180_v40 = vld [vmem:[%s1281_s27 + $0xb8] sm:$0xff]  }
  0x42   : > { %v475_v52 = vmax.f32 %v411_v44, 0.0  ;;  %v476_v53 = vmax.f32 %v412_v45, 0.0  ;;  %v507_v58 = vmax.f32 %v443_v48, 0.0  ;;  %v377_v17 = vmul.f32 %v1293_v10, %v1120_v6  ;;  %v1188_v41 = vld [vmem:[%s1281_s27 + $0xf8] sm:$0xff]  }
  0x43   : > { %v508_v59 = vmax.f32 %v444_v49, 0.0  ;;  %v394_v21 = vmul.f32 %v1293_v10, %v1153_v12  ;;  %v1060_v44 = vunpack.c.l.bf16 %v1164_v36  ;;  %v1061_v45 = vunpack.c.h.bf16 %v1164_v36 }
  0x44   : > { %v445_v26 = vadd.f32 %v1303_v20, %v377_v17  ;;  %v1093_v48 = vunpack.c.h.bf16 %v1172_v39  ;;  %v1124_v49 = vunpack.c.l.bf16 %v1180_v40 }
  0x45   : > { %v462_v29 = vadd.f32 %v1303_v20, %v394_v21 }
  0x46   : > { %v509_v34 = vmax.f32 %v445_v26, 0.0  ;;  %v364_v57 = vmul.f32 %v1293_v10, %v1093_v48 }
  0x47   : > { %v526_v38 = vmax.f32 %v462_v29, 0.0 }
  0x4b   : > { %643 = vmatmul.bf16.gmra.mxu0 %v531_v4  ;;  %683 = vmatmul.bf16.gmra.mxu1 %v539_v5  ;;  %v425_v4 = vadd.f32 %v1303_v20, %v357_v60  ;;  %v426_v5 = vadd.f32 %v1303_v20, %v358_v61 }
  0x4c   : > { %723 = vmatmul.bf16.gmra.mxu2 %v547_v8  ;;  %763 = vmatmul.bf16.gmra.mxu3 %v555_v13  ;;  %v457_v8 = vadd.f32 %v1303_v20, %v389_v0  ;;  %v1056_v0 = vunpack.c.l.bf16 %v1163_v56 }
  0x4d   : > { %v489_v13 = vmax.f32 %v425_v4, 0.0  ;;  %v490_v14 = vmax.f32 %v426_v5, 0.0  ;;  %v534_v4 = vpack.c.bf16 %v476_v53, %v475_v52  ;;  %v1156_v52 = vunpack.c.l.bf16 %v1188_v41 }
  0x4e   : > { %v521_v18 = vmax.f32 %v457_v8, 0.0  ;;  %v550_v8 = vpack.c.bf16 %v508_v59, %v507_v58  ;;  %v1157_v53 = vunpack.c.h.bf16 %v1188_v41  ;;  %v379_v58 = vmul.f32 %v1293_v10, %v1124_v49 }
  0x4f   : > { %v541_v25 = vpack.c.bf16 %v490_v14, %v489_v13  ;;  %v345_v13 = vmul.f32 %v1293_v10, %v1056_v0  ;;  %v346_v14 = vmul.f32 %v1293_v10, %v1057_v1  ;;  %v432_v1 = vadd.f32 %v1303_v20, %v364_v57 }
  0x50   : > { %v557_v32 = vpack.c.bf16 %v522_v19, %v521_v18  ;;  %v378_v18 = vmul.f32 %v1293_v10, %v1121_v7  ;;  %v393_v19 = vmul.f32 %v1293_v10, %v1152_v11  ;;  %v447_v2 = vadd.f32 %v1303_v20, %v379_v58 }
  0x51   : > { %v413_v22 = vadd.f32 %v1303_v20, %v345_v13  ;;  %v414_v23 = vadd.f32 %v1303_v20, %v346_v14 }
  0x52   : > { %v446_v27 = vadd.f32 %v1303_v20, %v378_v18 }
  0x53   : > { %v477_v30 = vmax.f32 %v413_v22, 0.0  ;;  %v478_v31 = vmax.f32 %v414_v23, 0.0 }
  0x54   : > { %v510_v35 = vmax.f32 %v446_v27, 0.0 }
  0x5b   : > { %648 = vmatmul.bf16.gmra.mxu0 %v532_v50  ;;  %688 = vmatmul.bf16.gmra.mxu1 %v540_v51  ;;  %v459_v50 = vadd.f32 %v1303_v20, %v391_v42  ;;  %v460_v51 = vadd.f32 %v1303_v20, %v392_v43  ;;  %v535_v42 = vpack.c.bf16 %v478_v31, %v477_v30 }
  0x5c   : > { %728 = vmatmul.bf16.gmra.mxu2 %v548_v54  ;;  %768 = vmatmul.bf16.gmra.mxu3 %v556_v55  ;;  %v491_v54 = vmax.f32 %v427_v46, 0.0  ;;  %v492_v55 = vmax.f32 %v428_v47, 0.0  ;;  %v551_v46 = vpack.c.bf16 %v510_v35, %v509_v34  ;;  %v1092_v47 = vunpack.c.l.bf16 %v1172_v39 }
  0x5d   : > { %v523_v60 = vmax.f32 %v459_v50, 0.0  ;;  %v524_v61 = vmax.f32 %v460_v51, 0.0  ;;  %v1125_v51 = vunpack.c.h.bf16 %v1180_v40 }
  0x5e   : > { %v542_v5 = vpack.c.bf16 %v492_v55, %v491_v54  ;;  %v347_v54 = vmul.f32 %v1293_v10, %v1060_v44  ;;  %v348_v55 = vmul.f32 %v1293_v10, %v1061_v45  ;;  %v363_v56 = vmul.f32 %v1293_v10, %v1092_v47 }
  0x5f   : > { %v558_v9 = vpack.c.bf16 %v524_v61, %v523_v60  ;;  %v380_v59 = vmul.f32 %v1293_v10, %v1125_v51  ;;  %v395_v60 = vmul.f32 %v1293_v10, %v1156_v52  ;;  %v396_v61 = vmul.f32 %v1293_v10, %v1157_v53 }
  0x60   : > { %v415_v62 = vadd.f32 %v1303_v20, %v347_v54  ;;  %v416_v63 = vadd.f32 %v1303_v20, %v348_v55  ;;  %v431_v0 = vadd.f32 %v1303_v20, %v363_v56 }
  0x61   : > { %v448_v3 = vadd.f32 %v1303_v20, %v380_v59 }
  0x62   : > { %v479_v6 = vmax.f32 %v415_v62, 0.0  ;;  %v480_v7 = vmax.f32 %v416_v63, 0.0  ;;  %v495_v10 = vmax.f32 %v431_v0, 0.0 }
  0x63   : > { %v512_v11 = vmax.f32 %v448_v3, 0.0 }
  0x64   : > { %v536_v14 = vpack.c.bf16 %v480_v7, %v479_v6 }
  0x6b   : > { %653 = vmatmul.bf16.gmra.mxu0 %v533_v24  ;;  %693 = vmatmul.bf16.gmra.mxu1 %v541_v25  ;;  %v429_v24 = vadd.f32 %v1303_v20, %v361_v15  ;;  %v430_v25 = vadd.f32 %v1303_v20, %v362_v16 }
  0x6c   : > { %733 = vmatmul.bf16.gmra.mxu2 %v549_v28  ;;  %773 = vmatmul.bf16.gmra.mxu3 %v557_v32  ;;  %v461_v28 = vadd.f32 %v1303_v20, %v393_v19 }
  0x6d   : > { %v493_v32 = vmax.f32 %v429_v24, 0.0  ;;  %v494_v33 = vmax.f32 %v430_v25, 0.0 }
  0x6e   : > { %v525_v37 = vmax.f32 %v461_v28, 0.0 }
  0x6f   : > { %v543_v43 = vpack.c.bf16 %v494_v33, %v493_v32 }
  0x70   : > { %v559_v50 = vpack.c.bf16 %v526_v38, %v525_v37 }
  0x7b   : > { %658 = vmatmul.bf16.gmra.mxu0 %v534_v4  ;;  %698 = vmatmul.bf16.gmra.mxu1 %v542_v5  ;;  %v463_v4 = vadd.f32 %v1303_v20, %v395_v60  ;;  %v464_v5 = vadd.f32 %v1303_v20, %v396_v61 }
  0x7c   : > { %738 = vmatmul.bf16.gmra.mxu2 %v550_v8  ;;  %778 = vmatmul.bf16.gmra.mxu3 %v558_v9  ;;  %v496_v8 = vmax.f32 %v432_v1, 0.0  ;;  %v511_v9 = vmax.f32 %v447_v2, 0.0 }
  0x7d   : > { %v527_v12 = vmax.f32 %v463_v4, 0.0  ;;  %v528_v13 = vmax.f32 %v464_v5, 0.0 }
  0x7e   : > { %v544_v15 = vpack.c.bf16 %v496_v8, %v495_v10  ;;  %v552_v16 = vpack.c.bf16 %v512_v11, %v511_v9 }
  0x7f   : > { %v560_v17 = vpack.c.bf16 %v528_v13, %v527_v12 }
  0x8b   : > { %663 = vmatmul.bf16.gmra.mxu0 %v535_v42  ;;  %703 = vmatmul.bf16.gmra.mxu1 %v543_v43 }
  0x8c   : > { %743 = vmatmul.bf16.gmra.mxu2 %v551_v46  ;;  %783 = vmatmul.bf16.gmra.mxu3 %v559_v50 }
  0x9b   : > { %668 = vmatmul.bf16.gmra.mxu0 %v536_v14  ;;  %708 = vmatmul.bf16.gmra.mxu1 %v544_v15 }
  0x9c   : > { %748 = vmatmul.bf16.gmra.mxu2 %v552_v16  ;;  %788 = vmatmul.bf16.gmra.mxu3 %v560_v17 }
  0xa8   : > { %v634_v20 = vpop.f32.mrf.mxu0  ;;  %v674_v18 = vpop.f32.mrf.mxu1 }
  0xa9   : > { %v794_v19 = vpack.c.bf16 %v634_v20, %v634_v20  ;;  %v810_v21 = vpack.c.bf16 %v674_v18, %v674_v18 }
  0xab   : > { %859 = vst.msk [vmem:[%s1473_s20] sm:$0xf] %vm858_vm0, %v794_v19 }
  0xac   : > { %875 = vst.msk [vmem:[%s1473_s20 + $0x40] sm:$0xf] %vm858_vm0, %v810_v21 }
  0xaf   : > { %v714_v22 = vpop.f32.mrf.mxu2  ;;  %v754_v23 = vpop.f32.mrf.mxu3 }
  0xb0   : > { %v826_v24 = vpack.c.bf16 %v714_v22, %v714_v22  ;;  %v842_v25 = vpack.c.bf16 %v754_v23, %v754_v23  ;;  %v636_v26 = vpop.f32.mrf.mxu0  ;;  %v676_v27 = vpop.f32.mrf.mxu1 }
  0xb1   : > { %v795_v28 = vpack.c.bf16 %v636_v26, %v636_v26  ;;  %v811_v29 = vpack.c.bf16 %v676_v27, %v676_v27 }
  0xb2   : > { %891 = vst.msk [vmem:[%s1473_s20 + $0x80] sm:$0xf] %vm858_vm0, %v826_v24 }
  0xb3   : > { %907 = vst.msk [vmem:[%s1473_s20 + $0xc0] sm:$0xf] %vm858_vm0, %v842_v25 }
  0xb4   : > { %860 = vst.msk [vmem:[%s1473_s20 + $0x4] sm:$0xf] %vm858_vm0, %v795_v28 }
  0xb5   : > { %876 = vst.msk [vmem:[%s1473_s20 + $0x44] sm:$0xf] %vm858_vm0, %v811_v29 }
  0xb7   : > { %v716_v30 = vpop.f32.mrf.mxu2  ;;  %v756_v31 = vpop.f32.mrf.mxu3 }
  0xb8   : > { %v827_v32 = vpack.c.bf16 %v716_v30, %v716_v30  ;;  %v843_v33 = vpack.c.bf16 %v756_v31, %v756_v31  ;;  %v639_v34 = vpop.f32.mrf.mxu0  ;;  %v679_v35 = vpop.f32.mrf.mxu1 }
  0xb9   : > { %v796_v36 = vpack.c.bf16 %v639_v34, %v639_v34  ;;  %v812_v37 = vpack.c.bf16 %v679_v35, %v679_v35 }
  0xba   : > { %892 = vst.msk [vmem:[%s1473_s20 + $0x84] sm:$0xf] %vm858_vm0, %v827_v32 }
  0xbb   : > { %908 = vst.msk [vmem:[%s1473_s20 + $0xc4] sm:$0xf] %vm858_vm0, %v843_v33 }
  0xbc   : > { %861 = vst.msk [vmem:[%s1473_s20 + $0x8] sm:$0xf] %vm858_vm0, %v796_v36 }
  0xbd   : > { %877 = vst.msk [vmem:[%s1473_s20 + $0x48] sm:$0xf] %vm858_vm0, %v812_v37 }
  0xbf   : > { %v719_v38 = vpop.f32.mrf.mxu2  ;;  %v759_v39 = vpop.f32.mrf.mxu3 }
  0xc0   : > { %v828_v40 = vpack.c.bf16 %v719_v38, %v719_v38  ;;  %v844_v41 = vpack.c.bf16 %v759_v39, %v759_v39  ;;  %v641_v42 = vpop.f32.mrf.mxu0  ;;  %v681_v43 = vpop.f32.mrf.mxu1 }
  0xc1   : > { %v797_v44 = vpack.c.bf16 %v641_v42, %v641_v42  ;;  %v813_v45 = vpack.c.bf16 %v681_v43, %v681_v43 }
  0xc2   : > { %893 = vst.msk [vmem:[%s1473_s20 + $0x88] sm:$0xf] %vm858_vm0, %v828_v40 }
  0xc3   : > { %909 = vst.msk [vmem:[%s1473_s20 + $0xc8] sm:$0xf] %vm858_vm0, %v844_v41 }
  0xc4   : > { %862 = vst.msk [vmem:[%s1473_s20 + $0xc] sm:$0xf] %vm858_vm0, %v797_v44 }
  0xc5   : > { %878 = vst.msk [vmem:[%s1473_s20 + $0x4c] sm:$0xf] %vm858_vm0, %v813_v45 }
  0xc7   : > { %v721_v46 = vpop.f32.mrf.mxu2  ;;  %v761_v47 = vpop.f32.mrf.mxu3 }
  0xc8   : > { %v829_v48 = vpack.c.bf16 %v721_v46, %v721_v46  ;;  %v845_v49 = vpack.c.bf16 %v761_v47, %v761_v47  ;;  %v644_v50 = vpop.f32.mrf.mxu0  ;;  %v684_v51 = vpop.f32.mrf.mxu1 }
  0xc9   : > { %v798_v52 = vpack.c.bf16 %v644_v50, %v644_v50  ;;  %v814_v53 = vpack.c.bf16 %v684_v51, %v684_v51 }
  0xca   : > { %894 = vst.msk [vmem:[%s1473_s20 + $0x8c] sm:$0xf] %vm858_vm0, %v829_v48 }
  0xcb   : > { %910 = vst.msk [vmem:[%s1473_s20 + $0xcc] sm:$0xf] %vm858_vm0, %v845_v49 }
  0xcc   : > { %863 = vst.msk [vmem:[%s1473_s20 + $0x10] sm:$0xf] %vm858_vm0, %v798_v52 }
  0xcd   : > { %879 = vst.msk [vmem:[%s1473_s20 + $0x50] sm:$0xf] %vm858_vm0, %v814_v53 }
  0xcf   : > { %v724_v54 = vpop.f32.mrf.mxu2  ;;  %v764_v55 = vpop.f32.mrf.mxu3 }
  0xd0   : > { %v830_v56 = vpack.c.bf16 %v724_v54, %v724_v54  ;;  %v846_v57 = vpack.c.bf16 %v764_v55, %v764_v55  ;;  %v646_v58 = vpop.f32.mrf.mxu0  ;;  %v686_v59 = vpop.f32.mrf.mxu1 }
  0xd1   : > { %v799_v60 = vpack.c.bf16 %v646_v58, %v646_v58  ;;  %v815_v61 = vpack.c.bf16 %v686_v59, %v686_v59 }
  0xd2   : > { %895 = vst.msk [vmem:[%s1473_s20 + $0x90] sm:$0xf] %vm858_vm0, %v830_v56 }
  0xd3   : > { %911 = vst.msk [vmem:[%s1473_s20 + $0xd0] sm:$0xf] %vm858_vm0, %v846_v57 }
  0xd4   : > { %864 = vst.msk [vmem:[%s1473_s20 + $0x14] sm:$0xf] %vm858_vm0, %v799_v60 }
  0xd5   : > { %880 = vst.msk [vmem:[%s1473_s20 + $0x54] sm:$0xf] %vm858_vm0, %v815_v61 }
  0xd7   : > { %v726_v62 = vpop.f32.mrf.mxu2  ;;  %v766_v63 = vpop.f32.mrf.mxu3 }
  0xd8   : > { %v831_v0 = vpack.c.bf16 %v726_v62, %v726_v62  ;;  %v847_v1 = vpack.c.bf16 %v766_v63, %v766_v63  ;;  %v649_v2 = vpop.f32.mrf.mxu0  ;;  %v689_v3 = vpop.f32.mrf.mxu1 }
  0xd9   : > { %v800_v4 = vpack.c.bf16 %v649_v2, %v649_v2  ;;  %v816_v5 = vpack.c.bf16 %v689_v3, %v689_v3 }
  0xda   : > { %896 = vst.msk [vmem:[%s1473_s20 + $0x94] sm:$0xf] %vm858_vm0, %v831_v0 }
  0xdb   : > { %912 = vst.msk [vmem:[%s1473_s20 + $0xd4] sm:$0xf] %vm858_vm0, %v847_v1 }
  0xdc   : > { %865 = vst.msk [vmem:[%s1473_s20 + $0x18] sm:$0xf] %vm858_vm0, %v800_v4 }
  0xdd   : > { %881 = vst.msk [vmem:[%s1473_s20 + $0x58] sm:$0xf] %vm858_vm0, %v816_v5 }
  0xdf   : > { %v729_v6 = vpop.f32.mrf.mxu2  ;;  %v769_v7 = vpop.f32.mrf.mxu3 }
  0xe0   : > { %v832_v10 = vpack.c.bf16 %v729_v6, %v729_v6  ;;  %v848_v8 = vpack.c.bf16 %v769_v7, %v769_v7  ;;  %v651_v9 = vpop.f32.mrf.mxu0  ;;  %v691_v11 = vpop.f32.mrf.mxu1 }
  0xe1   : > { %v801_v12 = vpack.c.bf16 %v651_v9, %v651_v9  ;;  %v817_v13 = vpack.c.bf16 %v691_v11, %v691_v11 }
  0xe2   : > { %897 = vst.msk [vmem:[%s1473_s20 + $0x98] sm:$0xf] %vm858_vm0, %v832_v10 }
  0xe3   : > { %913 = vst.msk [vmem:[%s1473_s20 + $0xd8] sm:$0xf] %vm858_vm0, %v848_v8 }
  0xe4   : > { %866 = vst.msk [vmem:[%s1473_s20 + $0x1c] sm:$0xf] %vm858_vm0, %v801_v12 }
  0xe5   : > { %882 = vst.msk [vmem:[%s1473_s20 + $0x5c] sm:$0xf] %vm858_vm0, %v817_v13 }
  0xe7   : > { %v731_v14 = vpop.f32.mrf.mxu2  ;;  %v771_v15 = vpop.f32.mrf.mxu3 }
  0xe8   : > { %v833_v16 = vpack.c.bf16 %v731_v14, %v731_v14  ;;  %v849_v17 = vpack.c.bf16 %v771_v15, %v771_v15  ;;  %v654_v20 = vpop.f32.mrf.mxu0  ;;  %v694_v18 = vpop.f32.mrf.mxu1 }
  0xe9   : > { %v802_v19 = vpack.c.bf16 %v654_v20, %v654_v20  ;;  %v818_v21 = vpack.c.bf16 %v694_v18, %v694_v18 }
  0xea   : > { %898 = vst.msk [vmem:[%s1473_s20 + $0x9c] sm:$0xf] %vm858_vm0, %v833_v16 }
  0xeb   : > { %914 = vst.msk [vmem:[%s1473_s20 + $0xdc] sm:$0xf] %vm858_vm0, %v849_v17 }
  0xec   : > { %867 = vst.msk [vmem:[%s1473_s20 + $0x20] sm:$0xf] %vm858_vm0, %v802_v19 }
  0xed   : > { %883 = vst.msk [vmem:[%s1473_s20 + $0x60] sm:$0xf] %vm858_vm0, %v818_v21 }
  0xef   : > { %v734_v22 = vpop.f32.mrf.mxu2  ;;  %v774_v23 = vpop.f32.mrf.mxu3 }
  0xf0   : > { %v834_v24 = vpack.c.bf16 %v734_v22, %v734_v22  ;;  %v850_v25 = vpack.c.bf16 %v774_v23, %v774_v23  ;;  %v656_v26 = vpop.f32.mrf.mxu0  ;;  %v696_v27 = vpop.f32.mrf.mxu1 }
  0xf1   : > { %v803_v28 = vpack.c.bf16 %v656_v26, %v656_v26  ;;  %v819_v29 = vpack.c.bf16 %v696_v27, %v696_v27 }
  0xf2   : > { %899 = vst.msk [vmem:[%s1473_s20 + $0xa0] sm:$0xf] %vm858_vm0, %v834_v24 }
  0xf3   : > { %915 = vst.msk [vmem:[%s1473_s20 + $0xe0] sm:$0xf] %vm858_vm0, %v850_v25 }
  0xf4   : > { %868 = vst.msk [vmem:[%s1473_s20 + $0x24] sm:$0xf] %vm858_vm0, %v803_v28 }
  0xf5   : > { %884 = vst.msk [vmem:[%s1473_s20 + $0x64] sm:$0xf] %vm858_vm0, %v819_v29 }
  0xf7   : > { %v736_v30 = vpop.f32.mrf.mxu2  ;;  %v776_v31 = vpop.f32.mrf.mxu3 }
  0xf8   : > { %v835_v32 = vpack.c.bf16 %v736_v30, %v736_v30  ;;  %v851_v33 = vpack.c.bf16 %v776_v31, %v776_v31  ;;  %v659_v34 = vpop.f32.mrf.mxu0  ;;  %v699_v35 = vpop.f32.mrf.mxu1 }
  0xf9   : > { %v804_v36 = vpack.c.bf16 %v659_v34, %v659_v34  ;;  %v820_v37 = vpack.c.bf16 %v699_v35, %v699_v35 }
  0xfa   : > { %900 = vst.msk [vmem:[%s1473_s20 + $0xa4] sm:$0xf] %vm858_vm0, %v835_v32 }
  0xfb   : > { %916 = vst.msk [vmem:[%s1473_s20 + $0xe4] sm:$0xf] %vm858_vm0, %v851_v33 }
  0xfc   : > { %869 = vst.msk [vmem:[%s1473_s20 + $0x28] sm:$0xf] %vm858_vm0, %v804_v36 }
  0xfd   : > { %885 = vst.msk [vmem:[%s1473_s20 + $0x68] sm:$0xf] %vm858_vm0, %v820_v37 }
  0xff   : > { %v739_v38 = vpop.f32.mrf.mxu2  ;;  %v779_v39 = vpop.f32.mrf.mxu3 }
 0x100   : > { %v836_v40 = vpack.c.bf16 %v739_v38, %v739_v38  ;;  %v852_v41 = vpack.c.bf16 %v779_v39, %v779_v39  ;;  %v661_v42 = vpop.f32.mrf.mxu0  ;;  %v701_v43 = vpop.f32.mrf.mxu1 }
 0x101   : > { %v805_v44 = vpack.c.bf16 %v661_v42, %v661_v42  ;;  %v821_v45 = vpack.c.bf16 %v701_v43, %v701_v43 }
 0x102   : > { %901 = vst.msk [vmem:[%s1473_s20 + $0xa8] sm:$0xf] %vm858_vm0, %v836_v40 }
 0x103   : > { %917 = vst.msk [vmem:[%s1473_s20 + $0xe8] sm:$0xf] %vm858_vm0, %v852_v41 }
 0x104   : > { %870 = vst.msk [vmem:[%s1473_s20 + $0x2c] sm:$0xf] %vm858_vm0, %v805_v44 }
 0x105   : > { %886 = vst.msk [vmem:[%s1473_s20 + $0x6c] sm:$0xf] %vm858_vm0, %v821_v45 }
 0x107   : > { %v741_v46 = vpop.f32.mrf.mxu2  ;;  %v781_v47 = vpop.f32.mrf.mxu3 }
 0x108   : > { %v837_v48 = vpack.c.bf16 %v741_v46, %v741_v46  ;;  %v853_v49 = vpack.c.bf16 %v781_v47, %v781_v47  ;;  %v664_v50 = vpop.f32.mrf.mxu0  ;;  %v704_v51 = vpop.f32.mrf.mxu1 }
 0x109   : > { %v806_v52 = vpack.c.bf16 %v664_v50, %v664_v50  ;;  %v822_v53 = vpack.c.bf16 %v704_v51, %v704_v51 }
 0x10a   : > { %902 = vst.msk [vmem:[%s1473_s20 + $0xac] sm:$0xf] %vm858_vm0, %v837_v48 }
 0x10b   : > { %918 = vst.msk [vmem:[%s1473_s20 + $0xec] sm:$0xf] %vm858_vm0, %v853_v49 }
 0x10c   : > { %871 = vst.msk [vmem:[%s1473_s20 + $0x30] sm:$0xf] %vm858_vm0, %v806_v52 }
 0x10d   : > { %887 = vst.msk [vmem:[%s1473_s20 + $0x70] sm:$0xf] %vm858_vm0, %v822_v53 }
 0x10f   : > { %v744_v54 = vpop.f32.mrf.mxu2  ;;  %v784_v55 = vpop.f32.mrf.mxu3 }
 0x110   : > { %v838_v56 = vpack.c.bf16 %v744_v54, %v744_v54  ;;  %v854_v57 = vpack.c.bf16 %v784_v55, %v784_v55  ;;  %v666_v58 = vpop.f32.mrf.mxu0  ;;  %v706_v59 = vpop.f32.mrf.mxu1 }
 0x111   : > { %v807_v60 = vpack.c.bf16 %v666_v58, %v666_v58  ;;  %v823_v61 = vpack.c.bf16 %v706_v59, %v706_v59 }
 0x112   : > { %903 = vst.msk [vmem:[%s1473_s20 + $0xb0] sm:$0xf] %vm858_vm0, %v838_v56 }
 0x113   : > { %919 = vst.msk [vmem:[%s1473_s20 + $0xf0] sm:$0xf] %vm858_vm0, %v854_v57 }
 0x114   : > { %872 = vst.msk [vmem:[%s1473_s20 + $0x34] sm:$0xf] %vm858_vm0, %v807_v60 }
 0x115   : > { %888 = vst.msk [vmem:[%s1473_s20 + $0x74] sm:$0xf] %vm858_vm0, %v823_v61 }
 0x117   : > { %v746_v62 = vpop.f32.mrf.mxu2  ;;  %v786_v63 = vpop.f32.mrf.mxu3 }
 0x118   : > { %v839_v0 = vpack.c.bf16 %v746_v62, %v746_v62  ;;  %v855_v1 = vpack.c.bf16 %v786_v63, %v786_v63  ;;  %v669_v2 = vpop.f32.mrf.mxu0  ;;  %v709_v3 = vpop.f32.mrf.mxu1 }
 0x119   : > { %v808_v4 = vpack.c.bf16 %v669_v2, %v669_v2  ;;  %v824_v5 = vpack.c.bf16 %v709_v3, %v709_v3 }
 0x11a   : > { %904 = vst.msk [vmem:[%s1473_s20 + $0xb4] sm:$0xf] %vm858_vm0, %v839_v0 }
 0x11b   : > { %920 = vst.msk [vmem:[%s1473_s20 + $0xf4] sm:$0xf] %vm858_vm0, %v855_v1 }
 0x11c   : > { %873 = vst.msk [vmem:[%s1473_s20 + $0x38] sm:$0xf] %vm858_vm0, %v808_v4 }
 0x11d   : > { %889 = vst.msk [vmem:[%s1473_s20 + $0x78] sm:$0xf] %vm858_vm0, %v824_v5 }
 0x11f   : > { %v749_v6 = vpop.f32.mrf.mxu2  ;;  %v789_v7 = vpop.f32.mrf.mxu3 }
 0x120   : > { %v840_v10 = vpack.c.bf16 %v749_v6, %v749_v6  ;;  %v856_v8 = vpack.c.bf16 %v789_v7, %v789_v7  ;;  %v671_v9 = vpop.f32.mrf.mxu0  ;;  %v711_v11 = vpop.f32.mrf.mxu1 }
 0x121   : > { %v809_v12 = vpack.c.bf16 %v671_v9, %v671_v9  ;;  %v825_v13 = vpack.c.bf16 %v711_v11, %v711_v11 }
 0x122   : > { %905 = vst.msk [vmem:[%s1473_s20 + $0xb8] sm:$0xf] %vm858_vm0, %v840_v10 }
 0x123   : > { %921 = vst.msk [vmem:[%s1473_s20 + $0xf8] sm:$0xf] %vm858_vm0, %v856_v8 }
 0x124   : > { %874 = vst.msk [vmem:[%s1473_s20 + $0x3c] sm:$0xf] %vm858_vm0, %v809_v12 }
 0x125   : > { %890 = vst.msk [vmem:[%s1473_s20 + $0x7c] sm:$0xf] %vm858_vm0, %v825_v13 }
 0x127   : > { %v751_v14 = vpop.f32.mrf.mxu2  ;;  %v791_v15 = vpop.f32.mrf.mxu3 }
 0x128   : > { %v841_v16 = vpack.c.bf16 %v751_v14, %v751_v14  ;;  %v857_v17 = vpack.c.bf16 %v791_v15, %v791_v15 }
 0x12a   : > { %906 = vst.msk [vmem:[%s1473_s20 + $0xbc] sm:$0xf] %vm858_vm0, %v841_v16 }
 0x12b   : > { %922 = vst.msk [vmem:[%s1473_s20 + $0xfc] sm:$0xf] %vm858_vm0, %v857_v17 }
 0x12c PF: > { %s14_s15 = sadd.s32 1, %s1229_s15  }
 0x12d   : > { %p11_p4 = scmp.ge.s32.totalorder %s14_s15, 6  }
 0x12f   :  { %13 = sbr.rel (!%p11_p4) target bundleno = 1 (0x1), region = 66 }

// kernel: generator_forward.19
= control target key start
LH: loop header
LB: loop body
LE: loop exit
PB: predicated region body
PF: predicated region fallthrough
CT: control target
= control target key end

     0   :  { %s110_s0 = inlined_call_operand.vmem [shape: f32[16,512], index: 0, kind: input, shape index: {}]   ;;  %s111_s1 = inlined_call_operand.vmem [shape: f32[16,512], index: 1, kind: output, shape index: {}]  }
   0x1   :  { %v8_v0 = vld [vmem:[%s110_s0] sm:$0xff]  ;;  %v9_v1 = vld [vmem:[%s110_s0 + $0x8] sm:$0xff]  ;;  %v10_v2 = vld [vmem:[%s110_s0 + $0x10] sm:$0xff] }
   0x2   :  { %36 = vtanh.f32 %v8_v0  ;;  %v11_v3 = vld [vmem:[%s110_s0 + $0x18] sm:$0xff]  ;;  %v12_v4 = vld [vmem:[%s110_s0 + $0x20] sm:$0xff]  ;;  %v13_v5 = vld [vmem:[%s110_s0 + $0x28] sm:$0xff] }
   0x3   :  { %38 = vtanh.f32 %v9_v1  ;;  %v14_v6 = vld [vmem:[%s110_s0 + $0x30] sm:$0xff]  ;;  %v15_v7 = vld [vmem:[%s110_s0 + $0x38] sm:$0xff] }
   0x4   :  { %40 = vtanh.f32 %v10_v2 }
   0x5   :  { %42 = vtanh.f32 %v11_v3 }
   0x6   :  { %44 = vtanh.f32 %v12_v4 }
   0x7   :  { %46 = vtanh.f32 %v13_v5 }
   0x8   :  { %v37_v8 = vpop.eup %36  ;;  %48 = vtanh.f32 %v14_v6 }
   0x9   :  { %v39_v9 = vpop.eup %38  ;;  %24 = vst [vmem:[%s111_s1] sm:$0xff] %v37_v8  ;;  %50 = vtanh.f32 %v15_v7 }
   0xa   :  { %v41_v10 = vpop.eup %40  ;;  %25 = vst [vmem:[%s111_s1 + $0x8] sm:$0xff] %v39_v9 }
   0xb   :  { %v43_v11 = vpop.eup %42  ;;  %26 = vst [vmem:[%s111_s1 + $0x10] sm:$0xff] %v41_v10 }
   0xc   :  { %v45_v12 = vpop.eup %44  ;;  %27 = vst [vmem:[%s111_s1 + $0x18] sm:$0xff] %v43_v11 }
   0xd   :  { %v47_v13 = vpop.eup %46  ;;  %28 = vst [vmem:[%s111_s1 + $0x20] sm:$0xff] %v45_v12 }
   0xe   :  { %v49_v14 = vpop.eup %48  ;;  %29 = vst [vmem:[%s111_s1 + $0x28] sm:$0xff] %v47_v13 }
   0xf   :  { %v51_v15 = vpop.eup %50  ;;  %30 = vst [vmem:[%s111_s1 + $0x30] sm:$0xff] %v49_v14 }
  0x10   :  { %31 = vst [vmem:[%s111_s1 + $0x38] sm:$0xff] %v51_v15 }

</bundles_post_ra>
